<compile_context>
chip_gen: v7x
topology: tpu7x:2x2x1
jax: 0.10.0
libtpu: 0.0.40
codegen_flags: <defaults>
</compile_context>

<pallas_src>
import functools

import jax
import jax.numpy as jnp
from jax.experimental import pallas as pl
from jax.experimental.pallas import tpu as pltpu

EPS = 1e-5   # PyTorch BatchNorm2d default eps
LANES = 128


def _round_up(v, m):
    return (v + m - 1) // m * m


# ------------------------------ kernel helpers --------------------------------

def _bn_scale_shift(stat_ref, aff_ref, inv_count):
    """Global batch stats -> per-channel scale/shift (biased variance)."""
    mean = stat_ref[0:1, :] * inv_count
    var = stat_ref[1:2, :] * inv_count - mean * mean
    scale = aff_ref[0:1, :] * jax.lax.rsqrt(var + EPS)
    shift = aff_ref[1:2, :] - mean * scale
    return scale, shift


def _store_partial_stats(stat_ref, acc_m):
    """Per-image partial sum / sum-of-squares (mask is 0/1, already applied)."""
    stat_ref[0:1, :] = jnp.sum(acc_m, axis=0, keepdims=True)
    stat_ref[1:2, :] = jnp.sum(acc_m * acc_m, axis=0, keepdims=True)


# --------------------------------- kernels ------------------------------------

def _conv1_stats_kernel(xc_ref, w_ref, mask_ref, y_ref, stat_ref):
    """Conv1 as one K=9*cin MXU matmul + per-image BN1 partial statistics."""
    acc = jnp.dot(xc_ref[...], w_ref[...], preferred_element_type=jnp.float32)
    acc_m = acc * mask_ref[...]                       # mask once, reuse
    y_ref[...] = acc_m.astype(y_ref.dtype)            # bf16, lane-dense
    _store_partial_stats(stat_ref, acc_m)


def _bn1_relu_conv2_stats_kernel(y1_ref, stat1_ref, aff1_ref, w_ref, mask_ref,
                                 y2_ref, stat2_ref, lhs_ref, *,
                                 pitch, m_rows, m_store, cin, inv_count):
    """BN1 (global stats) + ReLU, conv2 as one K=9*128 matmul, BN2 partials."""
    scale, shift = _bn_scale_shift(stat1_ref, aff1_ref, inv_count)
    act = jnp.maximum(y1_ref[...] * scale + shift, 0.0).astype(jnp.bfloat16)
    # Build the (m_rows, 9*cin) LHS in VMEM from 9 shifted slices (lane-aligned
    # 128-channel pieces), then issue a single deep-K matmul.
    for t in range(9):
        off = (t // 3) * pitch + (t % 3)
        lhs_ref[:, t * cin:(t + 1) * cin] = act[off:off + m_rows, :]
    acc = jnp.dot(lhs_ref[...], w_ref[...], preferred_element_type=jnp.float32)
    acc_m = acc * mask_ref[...]
    y2_ref[...] = acc_m[0:m_store].astype(y2_ref.dtype)   # bf16 HBM activation
    _store_partial_stats(stat2_ref, acc_m)


def _bn2_pool_kernel(y2_ref, stat2_ref, aff2_ref, o_ref, *, pitch, inv_count):
    """Fused BN2 affine + AvgPool2d(2) on a 2-row band (pure VPU, no matmul)."""
    scale, shift = _bn_scale_shift(stat2_ref, aff2_ref, inv_count)
    band = y2_ref[...].astype(jnp.float32)                 # (2*pitch, C)
    a = band[0:2 * pitch - 1, :] + band[1:2 * pitch, :]    # horizontal pairs
    v = a[0:pitch - 1, :] + a[pitch:2 * pitch - 1, :]      # + vertical pairs
    # valid pooled pixels sit at even rows of v; compaction is a tiny wrapper
    # strided slice on the (already 4x smaller) pooled output.
    o_ref[...] = ((0.25 * v) * scale + shift).astype(o_ref.dtype)


# ----------------------------- host-side helpers -------------------------------

def _cparams(semantics):
    # TODO(synk): raise vmem_limit_bytes on v5e/v6e for large spatial sizes;
    #   keep 32 MiB on v7x (64 MiB physical).
    return pltpu.CompilerParams(dimension_semantics=semantics,
                                vmem_limit_bytes=32 * 1024 * 1024)


def _w_to_mat(w_oihw, cin_pad, cout_pad):
    """PyTorch (Cout, Cin, 3, 3) -> (9*cin_pad, cout_pad) tap-major bf16."""
    cout, cin, kh, kw = w_oihw.shape
    m = jnp.transpose(w_oihw, (2, 3, 1, 0)).astype(jnp.float32)
    m = jnp.pad(m, ((0, 0), (0, 0), (0, cin_pad - cin), (0, cout_pad - cout)))
    return m.reshape(kh * kw * cin_pad, cout_pad).astype(jnp.bfloat16)


def _pad_vec(v, cout_pad):
    return jnp.pad(v.astype(jnp.float32), (0, cout_pad - v.shape[0]))


def _valid_mask(m_rows, pitch, h_out, w_out, stride=1):
    """1.0 at flat positions that belong to the (strided) conv output grid."""
    p = jnp.arange(m_rows)
    i, j = p // pitch, p % pitch
    ok = ((i % stride == 0) & (j % stride == 0)
          & (i // stride < h_out) & (j // stride < w_out))
    return ok.astype(jnp.float32)[:, None]


# -------------------------------- forward pass ---------------------------------

def layer_type4_forward(x_nchw, params, stride=1):
    (w1, _b1, g1, be1, w2, _b2, g2, be2) = params
    # _b1/_b2 (conv biases) are intentionally unused: a per-channel constant is
    # exactly cancelled by the batch-statistics BatchNorm following each conv.
    n, cin, h, w = x_nchw.shape
    cout = w1.shape[0]
    coutp = _round_up(cout, LANES)

    # ------------------------------ geometry ---------------------------------
    # Flat-pixel layouts: pixel (i, j) -> flat row i*pitch + j.  pitch is a
    # multiple of 4 so the pool kernel's 2-row band (2*pitch) is 8-aligned.
    pitch0 = _round_up(w + 2, 4)                 # padded-input / conv1 pitch
    h1 = (h - 1) // stride + 1
    w1v = (w - 1) // stride + 1
    pitch1 = pitch0 if stride == 1 else _round_up(w1v, 4)   # conv1-output pitch
    h2, w2v = h1 - 2, w1v - 2
    h3, w3 = h2 // 2, w2v // 2

    m2 = (h2 - 1) * pitch1 + w2v                 # valid conv2 extent (flat)
    m2s = 2 * h3 * pitch1                        # stored conv2 rows (pool bands)
    m2a = max(m2, m2s)                           # conv2 rows actually computed
    m1s = m2a + 2 * pitch1 + 2                   # y1 rows read by conv2 kernel
    if stride == 1:
        m1rows = m1s                             # conv1 rows computed/stored
    else:
        m1rows = (h1 - 1) * stride * pitch0 + (w1v - 1) * stride + 1
    xs = m1rows + 2 * pitch0 + 2                 # input rows read by conv1

    # --------------------------- input preparation ---------------------------
    x = jnp.transpose(x_nchw, (0, 2, 3, 1)).astype(jnp.bfloat16)   # bf16 once
    xpad = jnp.pad(x, ((0, 0), (1, 1), (1, 1 + pitch0 - (w + 2)), (0, 0)))
    x_flat = xpad.reshape(n, (h + 2) * pitch0, cin)
    xs_nat = (h + 2) * pitch0
    if xs > xs_nat:
        x_flat = jnp.pad(x_flat, ((0, 0), (0, xs - xs_nat), (0, 0)))
    else:
        x_flat = x_flat[:, :xs, :]
    # conv1 LHS (tap-major im2col, 9*cin channels) — cheap because cin is tiny.
    x_col = jnp.concatenate(
        [x_flat[:, (t // 3) * pitch0 + t % 3:
                   (t // 3) * pitch0 + t % 3 + m1rows, :] for t in range(9)],
        axis=-1)

    mask1 = _valid_mask(m1rows, pitch0, h1, w1v, stride)
    w1m = _w_to_mat(w1, cin, coutp)
    aff1 = jnp.stack([_pad_vec(g1, coutp), _pad_vec(be1, coutp)])
    count1 = float(n * h1 * w1v)

    # ------------------------- kernel 1: conv1 + stats -----------------------
    y1_raw, stat1_part = pl.pallas_call(
        _conv1_stats_kernel,
        out_shape=[jax.ShapeDtypeStruct((n, m1rows, coutp), jnp.bfloat16),
                   jax.ShapeDtypeStruct((n, 2, coutp), jnp.float32)],
        grid_spec=pltpu.PrefetchScalarGridSpec(
            num_scalar_prefetch=0, grid=(n,),
            in_specs=[pl.BlockSpec((None, m1rows, 9 * cin), lambda b: (b, 0, 0)),
                      pl.BlockSpec((9 * cin, coutp), lambda b: (0, 0)),
                      pl.BlockSpec((m1rows, 1), lambda b: (0, 0))],
            out_specs=[pl.BlockSpec((None, m1rows, coutp), lambda b: (b, 0, 0)),
                       pl.BlockSpec((None, 2, coutp), lambda b: (b, 0, 0))]),
        compiler_params=_cparams(("parallel",)),
    )(x_col, w1m, mask1)
    stat1 = jnp.sum(stat1_part, axis=0)          # tiny (2, 128) reduction

    if stride == 1:
        y1_in = y1_raw
    else:
        # TODO(synk): this gather costs an extra HBM round trip of y1; write
        #   the compact strided layout from the conv1 kernel instead.
        idx = (jnp.arange(h1)[:, None] * stride * pitch0
               + jnp.arange(w1v)[None, :] * stride).reshape(-1)
        g = jnp.take(y1_raw, idx, axis=1).reshape(n, h1, w1v, coutp)
        g = jnp.pad(g, ((0, 0), (0, 0), (0, pitch1 - w1v), (0, 0)))
        y1_in = g.reshape(n, h1 * pitch1, coutp)
    rows = y1_in.shape[1]
    if m1s > rows:
        y1_in = jnp.pad(y1_in, ((0, 0), (0, m1s - rows), (0, 0)))
    elif m1s < rows:
        y1_in = y1_in[:, :m1s, :]

    # -------------------- kernel 2: BN1+ReLU -> conv2 + stats ----------------
    mask2 = _valid_mask(m2a, pitch1, h2, w2v, 1)
    w2m = _w_to_mat(w2, coutp, coutp)
    aff2 = jnp.stack([_pad_vec(g2, coutp), _pad_vec(be2, coutp)])
    count2 = float(n * h2 * w2v)

    y2, stat2_part = pl.pallas_call(
        functools.partial(_bn1_relu_conv2_stats_kernel, pitch=pitch1,
                          m_rows=m2a, m_store=m2s, cin=coutp,
                          inv_count=1.0 / count1),
        out_shape=[jax.ShapeDtypeStruct((n, m2s, coutp), jnp.bfloat16),
                   jax.ShapeDtypeStruct((n, 2, coutp), jnp.float32)],
        grid_spec=pltpu.PrefetchScalarGridSpec(
            num_scalar_prefetch=0, grid=(n,),
            in_specs=[pl.BlockSpec((None, m1s, coutp), lambda b: (b, 0, 0)),
                      pl.BlockSpec((2, coutp), lambda b: (0, 0)),
                      pl.BlockSpec((2, coutp), lambda b: (0, 0)),
                      pl.BlockSpec((9 * coutp, coutp), lambda b: (0, 0)),
                      pl.BlockSpec((m2a, 1), lambda b: (0, 0))],
            out_specs=[pl.BlockSpec((None, m2s, coutp), lambda b: (b, 0, 0)),
                       pl.BlockSpec((None, 2, coutp), lambda b: (b, 0, 0))],
            scratch_shapes=[pltpu.VMEM((m2a, 9 * coutp), jnp.bfloat16)]),
        compiler_params=_cparams(("parallel",)),
    )(y1_in, stat1, aff1, w2m, mask2)
    stat2 = jnp.sum(stat2_part, axis=0)

    # -------------------- kernel 3: BN2 affine + AvgPool2d(2) ----------------
    pout = pitch1 - 1
    pooled = pl.pallas_call(
        functools.partial(_bn2_pool_kernel, pitch=pitch1,
                          inv_count=1.0 / count2),
        out_shape=jax.ShapeDtypeStruct((n, h3, pout, coutp), jnp.float32),
        grid_spec=pltpu.PrefetchScalarGridSpec(
            num_scalar_prefetch=0, grid=(n, h3),
            in_specs=[pl.BlockSpec((None, 2 * pitch1, coutp),
                                   lambda b, i: (b, i, 0)),
                      pl.BlockSpec((2, coutp), lambda b, i: (0, 0)),
                      pl.BlockSpec((2, coutp), lambda b, i: (0, 0))],
            out_specs=pl.BlockSpec((None, None, pout, coutp),
                                   lambda b, i: (b, i, 0, 0))),
        compiler_params=_cparams(("parallel", "parallel")),
    )(y2, stat2, aff2)

    # compact the (tiny) pooled output: valid columns sit at even positions.
    out = pooled[:, :, 0:2 * w3 - 1:2, :cout]            # (n, h3, w3, cout)
    return jnp.transpose(out, (0, 3, 1, 2))              # back to NCHW


# ---------------------------------- reference -----------------------------------

def _ref_forward(x, params, stride=1):
    (w1, b1, g1, be1, w2, b2, g2, be2) = params

    def bn(z, g, b):   # training-mode batch stats, NCHW
        mean = z.mean(axis=(0, 2, 3), keepdims=True)
        var = ((z - mean) ** 2).mean(axis=(0, 2, 3), keepdims=True)
        return ((z - mean) * jax.lax.rsqrt(var + EPS) * g.reshape(1, -1, 1, 1)
                + b.reshape(1, -1, 1, 1))

    dn = ('NCHW', 'OIHW', 'NCHW')
    y = jax.lax.conv_general_dilated(x, w1, (stride, stride), [(1, 1), (1, 1)],
                                     dimension_numbers=dn) + b1.reshape(1, -1, 1, 1)
    y = jnp.maximum(bn(y, g1, be1), 0.0)
    y = jax.lax.conv_general_dilated(y, w2, (1, 1), [(0, 0), (0, 0)],
                                     dimension_numbers=dn) + b2.reshape(1, -1, 1, 1)
    y = bn(y, g2, be2)
    n, c, h, w = y.shape
    h3, w3 = h // 2, w // 2
    y = y[:, :, :2 * h3, :2 * w3].reshape(n, c, h3, 2, w3, 2).mean(axis=(3, 5))
    return y


# -------------------------------- params & main ----------------------------------

def init_params(key, cin, cout):
    k1, k2, k3, k4 = jax.random.split(key, 4)
    s1 = 1.0 / jnp.sqrt(cin * 9.0)
    s2 = 1.0 / jnp.sqrt(cout * 9.0)
    w1 = jax.random.uniform(k1, (cout, cin, 3, 3), jnp.float32, -1.0, 1.0) * s1
    b1 = jax.random.uniform(k2, (cout,), jnp.float32, -1.0, 1.0) * s1
    w2 = jax.random.uniform(k3, (cout, cout, 3, 3), jnp.float32, -1.0, 1.0) * s2
    b2 = jax.random.uniform(k4, (cout,), jnp.float32, -1.0, 1.0) * s2
    g1 = 0.5 + jnp.arange(cout, dtype=jnp.float32) / cout
    be1 = 0.01 * jnp.arange(cout, dtype=jnp.float32)
    g2 = 1.5 - jnp.arange(cout, dtype=jnp.float32) / cout
    be2 = -0.02 * jnp.arange(cout, dtype=jnp.float32)
    return (w1, b1, g1, be1, w2, b2, g2, be2)


if __name__ == "__main__":
    key = jax.random.PRNGKey(0)
    kx, kp = jax.random.split(key)

    N, C_IN, C_OUT, H, W, STRIDE = 2, 4, 8, 16, 16, 1
    x = jax.random.normal(kx, (N, C_IN, H, W), jnp.float32)
    params = init_params(kp, C_IN, C_OUT)

    fwd = jax.jit(functools.partial(layer_type4_forward, stride=STRIDE))
    out = jax.block_until_ready(fwd(x, params))

    ref = jax.block_until_ready(_ref_forward(x, params, stride=STRIDE))
    assert out.shape == (N, C_OUT, (H - 2) // 2, (W - 2) // 2), out.shape
    # Matmul operands and stored activations are bfloat16 (f32 accumulation /
    # statistics) -> relaxed tolerance vs the all-f32 XLA reference.
    assert jnp.allclose(out, ref, rtol=2e-2, atol=2.5e-2), \
        float(jnp.max(jnp.abs(out - ref)))

    print("KERNEL_OK")
</pallas_src>

<mosaic_0001>
module attributes {stable_mosaic.version = 11 : i64} {
  func.func @_conv1_stats_kernel(%arg0: i32, %arg1: memref<1x322x36xbf16, #tpu.memory_space<vmem>>, %arg2: memref<36x128xbf16, #tpu.memory_space<vmem>>, %arg3: memref<322x1xf32, #tpu.memory_space<vmem>>, %arg4: memref<1x322x128xbf16, #tpu.memory_space<vmem>>, %arg5: memref<1x2x128xf32, #tpu.memory_space<vmem>>) attributes {dimension_semantics = [#tpu.dimension_semantics<parallel>], iteration_bounds = array<i64: 2>, scalar_prefetch = 0 : i64, scratch_operands = 0 : i64, tpu.core_type = #tpu.core_type<tc>, window_params = [{transform_indices = @transform_0, window_bounds = array<i64: 1, 322, 36>}, {pipeline_mode = #tpu.pipeline_mode<synchronous>, transform_indices = @transform_1, window_bounds = array<i64: 36, 128>}, {pipeline_mode = #tpu.pipeline_mode<synchronous>, transform_indices = @transform_2, window_bounds = array<i64: 322, 1>}, {transform_indices = @transform_3, window_bounds = array<i64: 1, 322, 128>}, {transform_indices = @transform_4, window_bounds = array<i64: 1, 2, 128>}]} {
    %c0 = arith.constant 0 : index
    %c0_0 = arith.constant 0 : index
    %c0_1 = arith.constant 0 : index
    %0 = vector.load %arg1[%c0, %c0_0, %c0_1] : memref<1x322x36xbf16, #tpu.memory_space<vmem>>, vector<1x322x36xbf16>
    %1 = vector.shape_cast %0 : vector<1x322x36xbf16> to vector<322x36xbf16>
    %c0_2 = arith.constant 0 : index
    %c0_3 = arith.constant 0 : index
    %2 = vector.load %arg2[%c0_2, %c0_3] : memref<36x128xbf16, #tpu.memory_space<vmem>>, vector<36x128xbf16>
    %cst = arith.constant dense<0.000000e+00> : vector<322x128xf32>
    %3 = tpu.matmul %1, %2, %cst {dimension_numbers = #tpu.dot_dimension_numbers<[1], [0], [0], [1], [0, 0, 1, 1], [], []>} : vector<322x36xbf16>, vector<36x128xbf16>, vector<322x128xf32> -> vector<322x128xf32>
    %c0_4 = arith.constant 0 : index
    %c0_5 = arith.constant 0 : index
    %4 = vector.load %arg3[%c0_4, %c0_5] : memref<322x1xf32, #tpu.memory_space<vmem>>, vector<322x1xf32>
    %5 = vector.broadcast %4 : vector<322x1xf32> to vector<322x128xf32>
    %6 = arith.mulf %3, %5 : vector<322x128xf32>
    %7 = arith.truncf %6 : vector<322x128xf32> to vector<322x128xbf16>
    %c0_6 = arith.constant 0 : index
    %c0_7 = arith.constant 0 : index
    %c0_8 = arith.constant 0 : index
    %8 = vector.load %arg4[%c0_6, %c0_7, %c0_8] : memref<1x322x128xbf16, #tpu.memory_space<vmem>>, vector<1x322x128xbf16>
    %9 = vector.shape_cast %8 : vector<1x322x128xbf16> to vector<322x128xbf16>
    %10 = vector.shape_cast %7 : vector<322x128xbf16> to vector<1x322x128xbf16>
    tpu.vector_store %arg4[%c0_6, %c0_7, %c0_8], %10 {strides = array<i32>} : memref<1x322x128xbf16, #tpu.memory_space<vmem>>, vector<1x322x128xbf16>,
    %cst_9 = arith.constant dense<0.000000e+00> : vector<128xf32>
    %11 = vector.multi_reduction <add>, %6, %cst_9 [0] : vector<322x128xf32> to vector<128xf32>
    %12 = vector.shape_cast %11 : vector<128xf32> to vector<1x128xf32>
    %c0_10 = arith.constant 0 : index
    %c0_11 = arith.constant 0 : index
    %c0_12 = arith.constant 0 : index
    %13 = vector.load %arg5[%c0_10, %c0_11, %c0_12] : memref<1x2x128xf32, #tpu.memory_space<vmem>>, vector<1x1x128xf32>
    %14 = vector.shape_cast %13 : vector<1x1x128xf32> to vector<1x128xf32>
    %15 = vector.shape_cast %12 : vector<1x128xf32> to vector<1x1x128xf32>
    tpu.vector_store %arg5[%c0_10, %c0_11, %c0_12], %15 {strides = array<i32>} : memref<1x2x128xf32, #tpu.memory_space<vmem>>, vector<1x1x128xf32>,
    %16 = arith.mulf %6, %6 : vector<322x128xf32>
    %cst_13 = arith.constant dense<0.000000e+00> : vector<128xf32>
    %17 = vector.multi_reduction <add>, %16, %cst_13 [0] : vector<322x128xf32> to vector<128xf32>
    %18 = vector.shape_cast %17 : vector<128xf32> to vector<1x128xf32>
    %c0_14 = arith.constant 0 : index
    %c1 = arith.constant 1 : index
    %c0_15 = arith.constant 0 : index
    %19 = vector.load %arg5[%c0_14, %c1, %c0_15] : memref<1x2x128xf32, #tpu.memory_space<vmem>>, vector<1x1x128xf32>
    %20 = vector.shape_cast %19 : vector<1x1x128xf32> to vector<1x128xf32>
    %21 = vector.shape_cast %18 : vector<1x128xf32> to vector<1x1x128xf32>
    tpu.vector_store %arg5[%c0_14, %c1, %c0_15], %21 {strides = array<i32>} : memref<1x2x128xf32, #tpu.memory_space<vmem>>, vector<1x1x128xf32>,
    return
  }
  func.func @transform_0(%arg0: i32) -> (i32, i32, i32) {
    %c0_i32 = arith.constant 0 : i32
    %c0_i32_0 = arith.constant 0 : i32
    %c0_i32_1 = arith.constant 0 : i32
    return %arg0, %c0_i32, %c0_i32_0 : i32, i32, i32
  }
  func.func @transform_1(%arg0: i32) -> (i32, i32) {
    %c0_i32 = arith.constant 0 : i32
    %c0_i32_0 = arith.constant 0 : i32
    %c0_i32_1 = arith.constant 0 : i32
    return %c0_i32, %c0_i32_0 : i32, i32
  }
  func.func @transform_2(%arg0: i32) -> (i32, i32) {
    %c0_i32 = arith.constant 0 : i32
    %c0_i32_0 = arith.constant 0 : i32
    %c0_i32_1 = arith.constant 0 : i32
    return %c0_i32, %c0_i32_0 : i32, i32
  }
  func.func @transform_3(%arg0: i32) -> (i32, i32, i32) {
    %c0_i32 = arith.constant 0 : i32
    %c0_i32_0 = arith.constant 0 : i32
    %c0_i32_1 = arith.constant 0 : i32
    return %arg0, %c0_i32, %c0_i32_0 : i32, i32, i32
  }
  func.func @transform_4(%arg0: i32) -> (i32, i32, i32) {
    %c0_i32 = arith.constant 0 : i32
    %c0_i32_0 = arith.constant 0 : i32
    %c0_i32_1 = arith.constant 0 : i32
    return %arg0, %c0_i32, %c0_i32_0 : i32, i32, i32
  }
}

module attributes {stable_mosaic.version = 11 : i64} {
  func.func @_bn1_relu_conv2_stats_kernel(%arg0: i32, %arg1: memref<1x322x128xbf16, #tpu.memory_space<vmem>>, %arg2: memref<2x128xf32, #tpu.memory_space<vmem>>, %arg3: memref<2x128xf32, #tpu.memory_space<vmem>>, %arg4: memref<1152x128xbf16, #tpu.memory_space<vmem>>, %arg5: memref<280x1xf32, #tpu.memory_space<vmem>>, %arg6: memref<1x280x128xbf16, #tpu.memory_space<vmem>>, %arg7: memref<1x2x128xf32, #tpu.memory_space<vmem>>, %arg8: memref<280x1152xbf16, #tpu.memory_space<vmem>>) attributes {dimension_semantics = [#tpu.dimension_semantics<parallel>], iteration_bounds = array<i64: 2>, scalar_prefetch = 0 : i64, scratch_operands = 1 : i64, tpu.core_type = #tpu.core_type<tc>, window_params = [{transform_indices = @transform_0, window_bounds = array<i64: 1, 322, 128>}, {pipeline_mode = #tpu.pipeline_mode<synchronous>, transform_indices = @transform_1, window_bounds = array<i64: 2, 128>}, {pipeline_mode = #tpu.pipeline_mode<synchronous>, transform_indices = @transform_2, window_bounds = array<i64: 2, 128>}, {pipeline_mode = #tpu.pipeline_mode<synchronous>, transform_indices = @transform_3, window_bounds = array<i64: 1152, 128>}, {pipeline_mode = #tpu.pipeline_mode<synchronous>, transform_indices = @transform_4, window_bounds = array<i64: 280, 1>}, {transform_indices = @transform_5, window_bounds = array<i64: 1, 280, 128>}, {transform_indices = @transform_6, window_bounds = array<i64: 1, 2, 128>}]} {
    %c0 = arith.constant 0 : index
    %c0_0 = arith.constant 0 : index
    %0 = vector.load %arg2[%c0, %c0_0] : memref<2x128xf32, #tpu.memory_space<vmem>>, vector<1x128xf32>
    %cst = arith.constant 0.001953125 : f32
    %1 = vector.broadcast %cst : f32 to vector<1x128xf32>
    %2 = arith.mulf %0, %1 : vector<1x128xf32>
    %c1 = arith.constant 1 : index
    %c0_1 = arith.constant 0 : index
    %3 = vector.load %arg2[%c1, %c0_1] : memref<2x128xf32, #tpu.memory_space<vmem>>, vector<1x128xf32>
    %cst_2 = arith.constant 0.001953125 : f32
    %4 = vector.broadcast %cst_2 : f32 to vector<1x128xf32>
    %5 = arith.mulf %3, %4 : vector<1x128xf32>
    %6 = arith.mulf %2, %2 : vector<1x128xf32>
    %7 = arith.subf %5, %6 : vector<1x128xf32>
    %c0_3 = arith.constant 0 : index
    %c0_4 = arith.constant 0 : index
    %8 = vector.load %arg3[%c0_3, %c0_4] : memref<2x128xf32, #tpu.memory_space<vmem>>, vector<1x128xf32>
    %cst_5 = arith.constant 9.99999974E-6 : f32
    %9 = vector.broadcast %cst_5 : f32 to vector<1x128xf32>
    %10 = arith.addf %7, %9 : vector<1x128xf32>
    %11 = math.rsqrt %10 : vector<1x128xf32>
    %12 = arith.mulf %8, %11 : vector<1x128xf32>
    %c1_6 = arith.constant 1 : index
    %c0_7 = arith.constant 0 : index
    %13 = vector.load %arg3[%c1_6, %c0_7] : memref<2x128xf32, #tpu.memory_space<vmem>>, vector<1x128xf32>
    %14 = arith.mulf %2, %12 : vector<1x128xf32>
    %15 = arith.subf %13, %14 : vector<1x128xf32>
    %c0_8 = arith.constant 0 : index
    %c0_9 = arith.constant 0 : index
    %c0_10 = arith.constant 0 : index
    %16 = vector.load %arg1[%c0_8, %c0_9, %c0_10] : memref<1x322x128xbf16, #tpu.memory_space<vmem>>, vector<1x322x128xbf16>
    %17 = vector.shape_cast %16 : vector<1x322x128xbf16> to vector<322x128xbf16>
    %18 = arith.extf %17 : vector<322x128xbf16> to vector<322x128xf32>
    %19 = vector.broadcast %12 : vector<1x128xf32> to vector<322x128xf32>
    %20 = arith.mulf %18, %19 : vector<322x128xf32>
    %21 = vector.broadcast %15 : vector<1x128xf32> to vector<322x128xf32>
    %22 = arith.addf %20, %21 : vector<322x128xf32>
    %cst_11 = arith.constant 0.000000e+00 : f32
    %23 = vector.broadcast %cst_11 : f32 to vector<322x128xf32>
    %24 = arith.maximumf %22, %23 : vector<322x128xf32>
    %25 = arith.truncf %24 : vector<322x128xf32> to vector<322x128xbf16>
    %26 = vector.extract_strided_slice %25 {offsets = [0, 0], sizes = [280, 128], strides = [1, 1]} : vector<322x128xbf16> to vector<280x128xbf16>
    %c0_12 = arith.constant 0 : index
    %c0_13 = arith.constant 0 : index
    %27 = vector.load %arg8[%c0_12, %c0_13] : memref<280x1152xbf16, #tpu.memory_space<vmem>>, vector<280x128xbf16>
    tpu.vector_store %arg8[%c0_12, %c0_13], %26 {strides = array<i32>} : memref<280x1152xbf16, #tpu.memory_space<vmem>>, vector<280x128xbf16>,
    %28 = vector.extract_strided_slice %25 {offsets = [1, 0], sizes = [280, 128], strides = [1, 1]} : vector<322x128xbf16> to vector<280x128xbf16>
    %c0_14 = arith.constant 0 : index
    %c128 = arith.constant 128 : index
    %29 = vector.load %arg8[%c0_14, %c128] : memref<280x1152xbf16, #tpu.memory_space<vmem>>, vector<280x128xbf16>
    tpu.vector_store %arg8[%c0_14, %c128], %28 {strides = array<i32>} : memref<280x1152xbf16, #tpu.memory_space<vmem>>, vector<280x128xbf16>,
    %30 = vector.extract_strided_slice %25 {offsets = [2, 0], sizes = [280, 128], strides = [1, 1]} : vector<322x128xbf16> to vector<280x128xbf16>
    %c0_15 = arith.constant 0 : index
    %c256 = arith.constant 256 : index
    %31 = vector.load %arg8[%c0_15, %c256] : memref<280x1152xbf16, #tpu.memory_space<vmem>>, vector<280x128xbf16>
    tpu.vector_store %arg8[%c0_15, %c256], %30 {strides = array<i32>} : memref<280x1152xbf16, #tpu.memory_space<vmem>>, vector<280x128xbf16>,
    %32 = vector.extract_strided_slice %25 {offsets = [20, 0], sizes = [280, 128], strides = [1, 1]} : vector<322x128xbf16> to vector<280x128xbf16>
    %c0_16 = arith.constant 0 : index
    %c384 = arith.constant 384 : index
    %33 = vector.load %arg8[%c0_16, %c384] : memref<280x1152xbf16, #tpu.memory_space<vmem>>, vector<280x128xbf16>
    tpu.vector_store %arg8[%c0_16, %c384], %32 {strides = array<i32>} : memref<280x1152xbf16, #tpu.memory_space<vmem>>, vector<280x128xbf16>,
    %34 = vector.extract_strided_slice %25 {offsets = [21, 0], sizes = [280, 128], strides = [1, 1]} : vector<322x128xbf16> to vector<280x128xbf16>
    %c0_17 = arith.constant 0 : index
    %c512 = arith.constant 512 : index
    %35 = vector.load %arg8[%c0_17, %c512] : memref<280x1152xbf16, #tpu.memory_space<vmem>>, vector<280x128xbf16>
    tpu.vector_store %arg8[%c0_17, %c512], %34 {strides = array<i32>} : memref<280x1152xbf16, #tpu.memory_space<vmem>>, vector<280x128xbf16>,
    %36 = vector.extract_strided_slice %25 {offsets = [22, 0], sizes = [280, 128], strides = [1, 1]} : vector<322x128xbf16> to vector<280x128xbf16>
    %c0_18 = arith.constant 0 : index
    %c640 = arith.constant 640 : index
    %37 = vector.load %arg8[%c0_18, %c640] : memref<280x1152xbf16, #tpu.memory_space<vmem>>, vector<280x128xbf16>
    tpu.vector_store %arg8[%c0_18, %c640], %36 {strides = array<i32>} : memref<280x1152xbf16, #tpu.memory_space<vmem>>, vector<280x128xbf16>,
    %38 = vector.extract_strided_slice %25 {offsets = [40, 0], sizes = [280, 128], strides = [1, 1]} : vector<322x128xbf16> to vector<280x128xbf16>
    %c0_19 = arith.constant 0 : index
    %c768 = arith.constant 768 : index
    %39 = vector.load %arg8[%c0_19, %c768] : memref<280x1152xbf16, #tpu.memory_space<vmem>>, vector<280x128xbf16>
    tpu.vector_store %arg8[%c0_19, %c768], %38 {strides = array<i32>} : memref<280x1152xbf16, #tpu.memory_space<vmem>>, vector<280x128xbf16>,
    %40 = vector.extract_strided_slice %25 {offsets = [41, 0], sizes = [280, 128], strides = [1, 1]} : vector<322x128xbf16> to vector<280x128xbf16>
    %c0_20 = arith.constant 0 : index
    %c896 = arith.constant 896 : index
    %41 = vector.load %arg8[%c0_20, %c896] : memref<280x1152xbf16, #tpu.memory_space<vmem>>, vector<280x128xbf16>
    tpu.vector_store %arg8[%c0_20, %c896], %40 {strides = array<i32>} : memref<280x1152xbf16, #tpu.memory_space<vmem>>, vector<280x128xbf16>,
    %42 = vector.extract_strided_slice %25 {offsets = [42, 0], sizes = [280, 128], strides = [1, 1]} : vector<322x128xbf16> to vector<280x128xbf16>
    %c0_21 = arith.constant 0 : index
    %c1024 = arith.constant 1024 : index
    %43 = vector.load %arg8[%c0_21, %c1024] : memref<280x1152xbf16, #tpu.memory_space<vmem>>, vector<280x128xbf16>
    tpu.vector_store %arg8[%c0_21, %c1024], %42 {strides = array<i32>} : memref<280x1152xbf16, #tpu.memory_space<vmem>>, vector<280x128xbf16>,
    %c0_22 = arith.constant 0 : index
    %c0_23 = arith.constant 0 : index
    %44 = vector.load %arg8[%c0_22, %c0_23] : memref<280x1152xbf16, #tpu.memory_space<vmem>>, vector<280x1152xbf16>
    %c0_24 = arith.constant 0 : index
    %c0_25 = arith.constant 0 : index
    %45 = vector.load %arg4[%c0_24, %c0_25] : memref<1152x128xbf16, #tpu.memory_space<vmem>>, vector<1152x128xbf16>
    %cst_26 = arith.constant dense<0.000000e+00> : vector<280x128xf32>
    %46 = tpu.matmul %44, %45, %cst_26 {dimension_numbers = #tpu.dot_dimension_numbers<[1], [0], [0], [1], [0, 0, 1, 1], [], []>} : vector<280x1152xbf16>, vector<1152x128xbf16>, vector<280x128xf32> -> vector<280x128xf32>
    %c0_27 = arith.constant 0 : index
    %c0_28 = arith.constant 0 : index
    %47 = vector.load %arg5[%c0_27, %c0_28] : memref<280x1xf32, #tpu.memory_space<vmem>>, vector<280x1xf32>
    %48 = vector.broadcast %47 : vector<280x1xf32> to vector<280x128xf32>
    %49 = arith.mulf %46, %48 : vector<280x128xf32>
    %50 = arith.truncf %49 : vector<280x128xf32> to vector<280x128xbf16>
    %c0_29 = arith.constant 0 : index
    %c0_30 = arith.constant 0 : index
    %c0_31 = arith.constant 0 : index
    %51 = vector.load %arg6[%c0_29, %c0_30, %c0_31] : memref<1x280x128xbf16, #tpu.memory_space<vmem>>, vector<1x280x128xbf16>
    %52 = vector.shape_cast %51 : vector<1x280x128xbf16> to vector<280x128xbf16>
    %53 = vector.shape_cast %50 : vector<280x128xbf16> to vector<1x280x128xbf16>
    tpu.vector_store %arg6[%c0_29, %c0_30, %c0_31], %53 {strides = array<i32>} : memref<1x280x128xbf16, #tpu.memory_space<vmem>>, vector<1x280x128xbf16>,
    %cst_32 = arith.constant dense<0.000000e+00> : vector<128xf32>
    %54 = vector.multi_reduction <add>, %49, %cst_32 [0] : vector<280x128xf32> to vector<128xf32>
    %55 = vector.shape_cast %54 : vector<128xf32> to vector<1x128xf32>
    %c0_33 = arith.constant 0 : index
    %c0_34 = arith.constant 0 : index
    %c0_35 = arith.constant 0 : index
    %56 = vector.load %arg7[%c0_33, %c0_34, %c0_35] : memref<1x2x128xf32, #tpu.memory_space<vmem>>, vector<1x1x128xf32>
    %57 = vector.shape_cast %56 : vector<1x1x128xf32> to vector<1x128xf32>
    %58 = vector.shape_cast %55 : vector<1x128xf32> to vector<1x1x128xf32>
    tpu.vector_store %arg7[%c0_33, %c0_34, %c0_35], %58 {strides = array<i32>} : memref<1x2x128xf32, #tpu.memory_space<vmem>>, vector<1x1x128xf32>,
    %59 = arith.mulf %49, %49 : vector<280x128xf32>
    %cst_36 = arith.constant dense<0.000000e+00> : vector<128xf32>
    %60 = vector.multi_reduction <add>, %59, %cst_36 [0] : vector<280x128xf32> to vector<128xf32>
    %61 = vector.shape_cast %60 : vector<128xf32> to vector<1x128xf32>
    %c0_37 = arith.constant 0 : index
    %c1_38 = arith.constant 1 : index
    %c0_39 = arith.constant 0 : index
    %62 = vector.load %arg7[%c0_37, %c1_38, %c0_39] : memref<1x2x128xf32, #tpu.memory_space<vmem>>, vector<1x1x128xf32>
    %63 = vector.shape_cast %62 : vector<1x1x128xf32> to vector<1x128xf32>
    %64 = vector.shape_cast %61 : vector<1x128xf32> to vector<1x1x128xf32>
    tpu.vector_store %arg7[%c0_37, %c1_38, %c0_39], %64 {strides = array<i32>} : memref<1x2x128xf32, #tpu.memory_space<vmem>>, vector<1x1x128xf32>,
    return
  }
  func.func @transform_0(%arg0: i32) -> (i32, i32, i32) {
    %c0_i32 = arith.constant 0 : i32
    %c0_i32_0 = arith.constant 0 : i32
    %c0_i32_1 = arith.constant 0 : i32
    return %arg0, %c0_i32, %c0_i32_0 : i32, i32, i32
  }
  func.func @transform_1(%arg0: i32) -> (i32, i32) {
    %c0_i32 = arith.constant 0 : i32
    %c0_i32_0 = arith.constant 0 : i32
    %c0_i32_1 = arith.constant 0 : i32
    return %c0_i32, %c0_i32_0 : i32, i32
  }
  func.func @transform_2(%arg0: i32) -> (i32, i32) {
    %c0_i32 = arith.constant 0 : i32
    %c0_i32_0 = arith.constant 0 : i32
    %c0_i32_1 = arith.constant 0 : i32
    return %c0_i32, %c0_i32_0 : i32, i32
  }
  func.func @transform_3(%arg0: i32) -> (i32, i32) {
    %c0_i32 = arith.constant 0 : i32
    %c0_i32_0 = arith.constant 0 : i32
    %c0_i32_1 = arith.constant 0 : i32
    return %c0_i32, %c0_i32_0 : i32, i32
  }
  func.func @transform_4(%arg0: i32) -> (i32, i32) {
    %c0_i32 = arith.constant 0 : i32
    %c0_i32_0 = arith.constant 0 : i32
    %c0_i32_1 = arith.constant 0 : i32
    return %c0_i32, %c0_i32_0 : i32, i32
  }
  func.func @transform_5(%arg0: i32) -> (i32, i32, i32) {
    %c0_i32 = arith.constant 0 : i32
    %c0_i32_0 = arith.constant 0 : i32
    %c0_i32_1 = arith.constant 0 : i32
    return %arg0, %c0_i32, %c0_i32_0 : i32, i32, i32
  }
  func.func @transform_6(%arg0: i32) -> (i32, i32, i32) {
    %c0_i32 = arith.constant 0 : i32
    %c0_i32_0 = arith.constant 0 : i32
    %c0_i32_1 = arith.constant 0 : i32
    return %arg0, %c0_i32, %c0_i32_0 : i32, i32, i32
  }
}

module attributes {stable_mosaic.version = 11 : i64} {
  func.func @_bn2_pool_kernel(%arg0: i32, %arg1: i32, %arg2: memref<1x40x128xbf16, #tpu.memory_space<vmem>>, %arg3: memref<2x128xf32, #tpu.memory_space<vmem>>, %arg4: memref<2x128xf32, #tpu.memory_space<vmem>>, %arg5: memref<1x1x19x128xf32, #tpu.memory_space<vmem>>) attributes {dimension_semantics = [#tpu.dimension_semantics<parallel>, #tpu.dimension_semantics<parallel>], iteration_bounds = array<i64: 2, 7>, scalar_prefetch = 0 : i64, scratch_operands = 0 : i64, tpu.core_type = #tpu.core_type<tc>, window_params = [{transform_indices = @transform_0, window_bounds = array<i64: 1, 40, 128>}, {pipeline_mode = #tpu.pipeline_mode<synchronous>, transform_indices = @transform_1, window_bounds = array<i64: 2, 128>}, {pipeline_mode = #tpu.pipeline_mode<synchronous>, transform_indices = @transform_2, window_bounds = array<i64: 2, 128>}, {transform_indices = @transform_3, window_bounds = array<i64: 1, 1, 19, 128>}]} {
    %c0 = arith.constant 0 : index
    %c0_0 = arith.constant 0 : index
    %0 = vector.load %arg3[%c0, %c0_0] : memref<2x128xf32, #tpu.memory_space<vmem>>, vector<1x128xf32>
    %cst = arith.constant 0.00255102036 : f32
    %1 = vector.broadcast %cst : f32 to vector<1x128xf32>
    %2 = arith.mulf %0, %1 : vector<1x128xf32>
    %c1 = arith.constant 1 : index
    %c0_1 = arith.constant 0 : index
    %3 = vector.load %arg3[%c1, %c0_1] : memref<2x128xf32, #tpu.memory_space<vmem>>, vector<1x128xf32>
    %cst_2 = arith.constant 0.00255102036 : f32
    %4 = vector.broadcast %cst_2 : f32 to vector<1x128xf32>
    %5 = arith.mulf %3, %4 : vector<1x128xf32>
    %6 = arith.mulf %2, %2 : vector<1x128xf32>
    %7 = arith.subf %5, %6 : vector<1x128xf32>
    %c0_3 = arith.constant 0 : index
    %c0_4 = arith.constant 0 : index
    %8 = vector.load %arg4[%c0_3, %c0_4] : memref<2x128xf32, #tpu.memory_space<vmem>>, vector<1x128xf32>
    %cst_5 = arith.constant 9.99999974E-6 : f32
    %9 = vector.broadcast %cst_5 : f32 to vector<1x128xf32>
    %10 = arith.addf %7, %9 : vector<1x128xf32>
    %11 = math.rsqrt %10 : vector<1x128xf32>
    %12 = arith.mulf %8, %11 : vector<1x128xf32>
    %c1_6 = arith.constant 1 : index
    %c0_7 = arith.constant 0 : index
    %13 = vector.load %arg4[%c1_6, %c0_7] : memref<2x128xf32, #tpu.memory_space<vmem>>, vector<1x128xf32>
    %14 = arith.mulf %2, %12 : vector<1x128xf32>
    %15 = arith.subf %13, %14 : vector<1x128xf32>
    %c0_8 = arith.constant 0 : index
    %c0_9 = arith.constant 0 : index
    %c0_10 = arith.constant 0 : index
    %16 = vector.load %arg2[%c0_8, %c0_9, %c0_10] : memref<1x40x128xbf16, #tpu.memory_space<vmem>>, vector<1x40x128xbf16>
    %17 = vector.shape_cast %16 : vector<1x40x128xbf16> to vector<40x128xbf16>
    %18 = arith.extf %17 : vector<40x128xbf16> to vector<40x128xf32>
    %19 = vector.extract_strided_slice %18 {offsets = [0, 0], sizes = [39, 128], strides = [1, 1]} : vector<40x128xf32> to vector<39x128xf32>
    %20 = vector.extract_strided_slice %18 {offsets = [1, 0], sizes = [39, 128], strides = [1, 1]} : vector<40x128xf32> to vector<39x128xf32>
    %21 = arith.addf %19, %20 : vector<39x128xf32>
    %22 = vector.extract_strided_slice %21 {offsets = [0, 0], sizes = [19, 128], strides = [1, 1]} : vector<39x128xf32> to vector<19x128xf32>
    %23 = vector.extract_strided_slice %21 {offsets = [20, 0], sizes = [19, 128], strides = [1, 1]} : vector<39x128xf32> to vector<19x128xf32>
    %24 = arith.addf %22, %23 : vector<19x128xf32>
    %cst_11 = arith.constant 2.500000e-01 : f32
    %25 = vector.broadcast %cst_11 : f32 to vector<19x128xf32>
    %26 = arith.mulf %25, %24 : vector<19x128xf32>
    %27 = vector.broadcast %12 : vector<1x128xf32> to vector<19x128xf32>
    %28 = arith.mulf %26, %27 : vector<19x128xf32>
    %29 = vector.broadcast %15 : vector<1x128xf32> to vector<19x128xf32>
    %30 = arith.addf %28, %29 : vector<19x128xf32>
    %c0_12 = arith.constant 0 : index
    %c0_13 = arith.constant 0 : index
    %c0_14 = arith.constant 0 : index
    %c0_15 = arith.constant 0 : index
    %31 = vector.load %arg5[%c0_12, %c0_13, %c0_14, %c0_15] : memref<1x1x19x128xf32, #tpu.memory_space<vmem>>, vector<1x1x19x128xf32>
    %32 = vector.shape_cast %31 : vector<1x1x19x128xf32> to vector<19x128xf32>
    %33 = vector.shape_cast %30 : vector<19x128xf32> to vector<1x1x19x128xf32>
    tpu.vector_store %arg5[%c0_12, %c0_13, %c0_14, %c0_15], %33 {strides = array<i32>} : memref<1x1x19x128xf32, #tpu.memory_space<vmem>>, vector<1x1x19x128xf32>,
    return
  }
  func.func @transform_0(%arg0: i32, %arg1: i32) -> (i32, i32, i32) {
    %c0_i32 = arith.constant 0 : i32
    %c0_i32_0 = arith.constant 0 : i32
    return %arg0, %arg1, %c0_i32 : i32, i32, i32
  }
  func.func @transform_1(%arg0: i32, %arg1: i32) -> (i32, i32) {
    %c0_i32 = arith.constant 0 : i32
    %c0_i32_0 = arith.constant 0 : i32
    %c0_i32_1 = arith.constant 0 : i32
    return %c0_i32, %c0_i32_0 : i32, i32
  }
  func.func @transform_2(%arg0: i32, %arg1: i32) -> (i32, i32) {
    %c0_i32 = arith.constant 0 : i32
    %c0_i32_0 = arith.constant 0 : i32
    %c0_i32_1 = arith.constant 0 : i32
    return %c0_i32, %c0_i32_0 : i32, i32
  }
  func.func @transform_3(%arg0: i32, %arg1: i32) -> (i32, i32, i32, i32) {
    %c0_i32 = arith.constant 0 : i32
    %c0_i32_0 = arith.constant 0 : i32
    %c0_i32_1 = arith.constant 0 : i32
    return %arg0, %arg1, %c0_i32, %c0_i32_0 : i32, i32, i32, i32
  }
}

</mosaic_0001>

<bundles_post_ra>
// kernel: layer_type4_forward.3
= control target key start
LH: loop header
LB: loop body
LE: loop exit
PB: predicated region body
PF: predicated region fallthrough
CT: control target
= control target key end

     0   :  { %s1808_s15 = smov 0   ;;  %s2255_s0 = inlined_call_operand.vmem [shape: bf16[2,322,36], index: 0, kind: input, shape index: {}]   ;;  %s2256_s1 = inlined_call_operand.vmem [shape: bf16[36,128], index: 1, kind: input, shape index: {}]   ;;  %s2257_s2 = inlined_call_operand.vmem [shape: f32[322,1], index: 2, kind: input, shape index: {}]   ;;  %s2258_s3 = inlined_call_operand.vmem [shape: bf16[2,322,128], index: 3, kind: output, shape index: {0}]   ;;  %s2259_s4 = inlined_call_operand.vmem [shape: f32[2,2,128], index: 4, kind: output, shape index: {1}]  }
   0x1 LB: > { %s1358_s16 = sadd.s32 4294967295, %s1778_s15   ;;  %p1362_p0 = scmp.ge.s32.totalorder %s1778_s15, 1  ;;  %s1778_s15 = sphi %s1808_s15, %s15_s15  }
   0x2   : > { %p165_p1 = scmp.lt.s32.totalorder %s1778_s15, 3 }
   0x4   : > { %p166_p2 = pnand %p1362_p0, %p165_p1 }
   0x5   : > { %v1748_v0 = vld [vmem:[%s2256_s1] sm:$0xff] (!%p166_p2)   ;;  %v1780_v1 = vmov (!%p166_p2), 0.0   ;;  %v1749_v2 = vld [vmem:[%s2256_s1 + $0x8] sm:$0xff] (!%p166_p2)   ;;  %v1750_v3 = vld [vmem:[%s2256_s1 + $0x10] ss:$0 sps:$4 sm:$0x33] (!%p166_p2)  }
   0x6   : > { %169 = sbr.rel (%p166_p2) target bundleno = 369 (0x171), region = 32  ;;  %1638 = vmatprep.subr.bf16.mxu0 (!%p166_p2), %v1780_v1  ;;  %1728 = vmatprep.subr.bf16.mxu1 (!%p166_p2), %v1780_v1  ;;  %p195_p3 = scmp.lt.s32.totalorder (!%p166_p2), %s1358_s16, 1  ;;  %vm438_vm0 = vcmask (!%p166_p2), 1041408   ;;  %vm1781_vm1 = vmmov (!%p166_p2), 0   ;;  %v1782_v4 = vmov (!%p166_p2), 0   ;;  %v642_v5 = vld [vmem:[%s2257_s2] sm:$0xff] (!%p166_p2) }
   0x7   : > { %1639 = vmatpush3.bf16.msra.mxu0 (!%p166_p2), %v1748_v0  ;;  %1731 = vmatpush3.bf16.msra.mxu1 (!%p166_p2), %v1748_v0  ;;  %v644_v6 = vld [vmem:[%s2257_s2 + $0x10] sm:$0xff] (!%p166_p2)  ;;  %v440_v7 = vsel (!%p166_p2), %vm438_vm0, %v1750_v3, 0  ;;  %v643_v8 = vld [vmem:[%s2257_s2 + $0x8] sm:$0xff] (!%p166_p2)  ;;  %v645_v9 = vld [vmem:[%s2257_s2 + $0x18] sm:$0xff] (!%p166_p2)  ;;  %vm374_vm2 = vcmask (!%p166_p2), 293888  }
   0x8   : > { %1640 = vmatprep.subr.bf16.mxu0 (!%p166_p2), %v1780_v1  ;;  %1729 = vmatprep.subr.bf16.mxu1 (!%p166_p2), %v1780_v1  ;;  %v646_v12 = vld [vmem:[%s2257_s2 + $0x20] sm:$0xff] (!%p166_p2)  ;;  %v647_v13 = vld [vmem:[%s2257_s2 + $0x28] sm:$0xff] (!%p166_p2)  ;;  %v648_v14 = vld [vmem:[%s2257_s2 + $0x30] sm:$0xff] (!%p166_p2) }
   0x9   : > { %1644 = vmatprep.mubr.msk.bf16.mxu0 (!%p166_p2), %vm1781_vm1, %v1780_v1  ;;  %1688 = vmatprep.mubr.msk.bf16.mxu1 (!%p166_p2), %vm1781_vm1, %v1780_v1  ;;  %v649_v15 = vld [vmem:[%s2257_s2 + $0x38] sm:$0xff] (!%p166_p2)  ;;  %v650_v18 = vld [vmem:[%s2257_s2 + $0x40] sm:$0xff] (!%p166_p2)  ;;  %v651_v19 = vld [vmem:[%s2257_s2 + $0x48] sm:$0xff] (!%p166_p2) }
   0xa   : > { %1746 = vset.pattern.permute.xlu0 (!%p166_p2), %v1782_v4  ;;  %1747 = vset.pattern.permute.xlu1 (!%p166_p2), %v1782_v4  ;;  %v652_v20 = vld [vmem:[%s2257_s2 + $0x50] sm:$0xff] (!%p166_p2)  ;;  %v653_v21 = vld [vmem:[%s2257_s2 + $0x58] sm:$0xff] (!%p166_p2)  ;;  %v654_v24 = vld [vmem:[%s2257_s2 + $0x60] sm:$0xff] (!%p166_p2) }
   0xb   : > { %1641 = vmatpush3.bf16.msra.mxu0 (!%p166_p2), %v1749_v2  ;;  %1732 = vmatpush3.bf16.msra.mxu1 (!%p166_p2), %v1749_v2  ;;  %v655_v25 = vld [vmem:[%s2257_s2 + $0x68] sm:$0xff] (!%p166_p2)  ;;  %v656_v26 = vld [vmem:[%s2257_s2 + $0x70] sm:$0xff] (!%p166_p2)  ;;  %v657_v29 = vld [vmem:[%s2257_s2 + $0x78] sm:$0xff] (!%p166_p2) }
   0xc   : > { %1642 = vmatprep.subr.bf16.mxu0 (!%p166_p2), %v1780_v1  ;;  %1730 = vmatprep.subr.bf16.mxu1 (!%p166_p2), %v1780_v1  ;;  %v658_v30 = vld [vmem:[%s2257_s2 + $0x80] sm:$0xff] (!%p166_p2)  ;;  %v659_v31 = vld [vmem:[%s2257_s2 + $0x88] sm:$0xff] (!%p166_p2)  ;;  %v660_v32 = vld [vmem:[%s2257_s2 + $0x90] sm:$0xff] (!%p166_p2) }
   0xd   : > { %s2261_s16 = smov (!%p195_p3, %s1358_s16), 1  ;;  %685 = vperm.xlu0 %1746, %v642_v5   ;;  %695 = vperm.xlu1 %1747, %v644_v6   ;;  %v661_v35 = vld [vmem:[%s2257_s2 + $0x98] sm:$0xff]  ;;  %v662_v36 = vld [vmem:[%s2257_s2 + $0xa0] sm:$0xff]  ;;  %v663_v37 = vld [vmem:[%s2257_s2 + $0xa8] sm:$0xff] }
   0xe   : > { %s1734_s27 = smul.u32 164, %s2261_s16  ;;  %v664_v40 = vld [vmem:[%s2257_s2 + $0xb0] sm:$0xff]  ;;  %v665_v41 = vld [vmem:[%s2257_s2 + $0xb8] sm:$0xff]  ;;  %v666_v42 = vld [vmem:[%s2257_s2 + $0xc0] sm:$0xff] }
   0xf   : > { %1643 = vmatpush3.bf16.msra.mxu0 %v440_v7  ;;  %1733 = vmatpush3.bf16.msra.mxu1 %v440_v7  ;;  %v667_v43 = vld [vmem:[%s2257_s2 + $0xc8] sm:$0xff]  ;;  %v668_v46 = vld [vmem:[%s2257_s2 + $0xd0] sm:$0xff]  ;;  %v669_v47 = vld [vmem:[%s2257_s2 + $0xd8] sm:$0xff] }
  0x10   : > { %s1850_s30 = scalar_lea.vmem %s2255_s0, %s1734_s27  ;;  %v670_v48 = vld [vmem:[%s2257_s2 + $0xe0] sm:$0xff]  ;;  %v671_v49 = vld [vmem:[%s2257_s2 + $0xe8] sm:$0xff]  ;;  %v672_v52 = vld [vmem:[%s2257_s2 + $0xf0] sm:$0xff]  ;;  %s2094_s20 = scalar_lea.vmem %s2258_s3, %s1734_s27 }
  0x11   : > { %v1751_v10 = vld [vmem:[%s1850_s30] sm:$0xff]   ;;  %v1752_v11 = vld [vmem:[%s1850_s30 + $0x58] sm:$0xff]   ;;  %690 = vperm.xlu0 %1746, %v643_v8   ;;  %700 = vperm.xlu1 %1747, %v645_v9   ;;  %v1753_v16 = vld [vmem:[%s1850_s30 + $0x8] sm:$0xff]   ;;  %s1365_s27 = sshll.u32 %s2261_s16, 1 }
  0x12   : > { %1645 = vmatmul.mubr.msk.bf16.vlgmr.msra.gmra.mrb[0].mxu0 %vm374_vm2, %v1751_v10  ;;  %1689 = vmatmul.mubr.msk.bf16.vlgmr.msra.gmra.mrb[0].mxu1 %vm374_vm2, %v1752_v11  ;;  %v1754_v17 = vld [vmem:[%s1850_s30 + $0x60] sm:$0xff]   ;;  %v1755_v22 = vld [vmem:[%s1850_s30 + $0x10] sm:$0xff]   ;;  %v1756_v23 = vld [vmem:[%s1850_s30 + $0x68] sm:$0xff]   ;;  %s208_s23 = scalar_lea.vmem %s2259_s4, %s1365_s27 }
  0x13   : > { %1648 = vmatprep.mubr.msk.bf16.mxu0 %vm1781_vm1, %v1780_v1  ;;  %1692 = vmatprep.mubr.msk.bf16.mxu1 %vm1781_vm1, %v1780_v1  ;;  %v1757_v27 = vld [vmem:[%s1850_s30 + $0x18] sm:$0xff]   ;;  %v1758_v28 = vld [vmem:[%s1850_s30 + $0x70] sm:$0xff]   ;;  %v1759_v33 = vld [vmem:[%s1850_s30 + $0x20] sm:$0xff]  }
  0x14   : > { %v1760_v34 = vld [vmem:[%s1850_s30 + $0x78] sm:$0xff]   ;;  %v1761_v38 = vld [vmem:[%s1850_s30 + $0x28] sm:$0xff]   ;;  %v1762_v39 = vld [vmem:[%s1850_s30 + $0x80] sm:$0xff]  }
  0x15   : > { %705 = vperm.xlu0 %1746, %v646_v12   ;;  %710 = vperm.xlu1 %1747, %v647_v13   ;;  %v1763_v44 = vld [vmem:[%s1850_s30 + $0x30] sm:$0xff]   ;;  %v1764_v45 = vld [vmem:[%s1850_s30 + $0x88] sm:$0xff]   ;;  %v1765_v50 = vld [vmem:[%s1850_s30 + $0x38] sm:$0xff]  }
  0x16   : > { %v1766_v51 = vld [vmem:[%s1850_s30 + $0x90] sm:$0xff]   ;;  %v673_v53 = vld [vmem:[%s2257_s2 + $0xf8] sm:$0xff]  ;;  %v674_v54 = vld [vmem:[%s2257_s2 + $0x100] sm:$0xff] }
  0x17   : > { %v675_v55 = vld [vmem:[%s2257_s2 + $0x108] sm:$0xff]  ;;  %v1767_v56 = vld [vmem:[%s1850_s30 + $0x40] sm:$0xff]   ;;  %v1768_v57 = vld [vmem:[%s1850_s30 + $0x98] sm:$0xff]  }
  0x18   : > { %v676_v58 = vld [vmem:[%s2257_s2 + $0x110] sm:$0xff]  ;;  %v677_v59 = vld [vmem:[%s2257_s2 + $0x118] sm:$0xff]  ;;  %v678_v60 = vld [vmem:[%s2257_s2 + $0x120] sm:$0xff] }
  0x19   : > { %715 = vperm.xlu0 %1746, %v648_v14   ;;  %720 = vperm.xlu1 %1747, %v649_v15   ;;  %v679_v61 = vld [vmem:[%s2257_s2 + $0x128] sm:$0xff]  ;;  %v1770_v63 = vld [vmem:[%s1850_s30 + $0xa0] ss:$0 sps:$4 sm:$0x11]   ;;  %v680_v0 = vld [vmem:[%s2257_s2 + $0x130] sm:$0xff] }
  0x1a   : > { %1649 = vmatmul.mubr.msk.bf16.gmra.mrb[4].mxu0 %vm374_vm2, %v1753_v16  ;;  %1693 = vmatmul.mubr.msk.bf16.gmra.mrb[4].mxu1 %vm374_vm2, %v1754_v17  ;;  %v1769_v62 = vld [vmem:[%s1850_s30 + $0x48] sm:$0xff]   ;;  %v681_v2 = vld [vmem:[%s2257_s2 + $0x138] sm:$0xff]  ;;  %v682_v3 = vld [vmem:[%s2257_s2 + $0x140] sm:$0x3] }
  0x1b   : > { %1652 = vmatprep.mubr.msk.bf16.mxu0 %vm1781_vm1, %v1780_v1  ;;  %1696 = vmatprep.mubr.msk.bf16.mxu1 %vm1781_vm1, %v1780_v1  ;;  %v1771_v4 = vld [vmem:[%s1850_s30 + $0x50] sm:$0xff]  }
  0x1d   : > { %725 = vperm.xlu0 %1746, %v650_v18   ;;  %730 = vperm.xlu1 %1747, %v651_v19  }
  0x21   : > { %735 = vperm.xlu0 %1746, %v652_v20   ;;  %740 = vperm.xlu1 %1747, %v653_v21  }
  0x22   : > { %1653 = vmatmul.mubr.msk.bf16.gmra.mrb[8].mxu0 %vm374_vm2, %v1755_v22  ;;  %1697 = vmatmul.mubr.msk.bf16.gmra.mrb[8].mxu1 %vm374_vm2, %v1756_v23 }
  0x23   : > { %1656 = vmatprep.mubr.msk.bf16.mxu0 %vm1781_vm1, %v1780_v1  ;;  %1700 = vmatprep.mubr.msk.bf16.mxu1 %vm1781_vm1, %v1780_v1 }
  0x25   : > { %745 = vperm.xlu0 %1746, %v654_v24   ;;  %750 = vperm.xlu1 %1747, %v655_v25  }
  0x29   : > { %755 = vperm.xlu0 %1746, %v656_v26   ;;  %760 = vperm.xlu1 %1747, %v657_v29  }
  0x2a   : > { %1657 = vmatmul.mubr.msk.bf16.gmra.mrb[12].mxu0 %vm374_vm2, %v1757_v27  ;;  %1701 = vmatmul.mubr.msk.bf16.gmra.mrb[12].mxu1 %vm374_vm2, %v1758_v28 }
  0x2b   : > { %1660 = vmatprep.mubr.msk.bf16.mxu0 %vm1781_vm1, %v1780_v1  ;;  %1704 = vmatprep.mubr.msk.bf16.mxu1 %vm1781_vm1, %v1780_v1 }
  0x2d   : > { %765 = vperm.xlu0 %1746, %v658_v30   ;;  %770 = vperm.xlu1 %1747, %v659_v31  }
  0x31   : > { %775 = vperm.xlu0 %1746, %v660_v32   ;;  %780 = vperm.xlu1 %1747, %v661_v35  }
  0x32   : > { %1661 = vmatmul.mubr.msk.bf16.gmra.mrb[16].mxu0 %vm374_vm2, %v1759_v33  ;;  %1705 = vmatmul.mubr.msk.bf16.gmra.mrb[16].mxu1 %vm374_vm2, %v1760_v34 }
  0x33   : > { %1664 = vmatprep.mubr.msk.bf16.mxu0 %vm1781_vm1, %v1780_v1  ;;  %1708 = vmatprep.mubr.msk.bf16.mxu1 %vm1781_vm1, %v1780_v1 }
  0x35   : > { %785 = vperm.xlu0 %1746, %v662_v36   ;;  %790 = vperm.xlu1 %1747, %v663_v37  }
  0x39   : > { %795 = vperm.xlu0 %1746, %v664_v40   ;;  %800 = vperm.xlu1 %1747, %v665_v41  }
  0x3a   : > { %1665 = vmatmul.mubr.msk.bf16.gmra.mrb[20].mxu0 %vm374_vm2, %v1761_v38  ;;  %1709 = vmatmul.mubr.msk.bf16.gmra.mrb[20].mxu1 %vm374_vm2, %v1762_v39 }
  0x3b   : > { %1668 = vmatprep.mubr.msk.bf16.mxu0 %vm1781_vm1, %v1780_v1  ;;  %1712 = vmatprep.mubr.msk.bf16.mxu1 %vm1781_vm1, %v1780_v1 }
  0x3d   : > { %805 = vperm.xlu0 %1746, %v666_v42   ;;  %810 = vperm.xlu1 %1747, %v667_v43  }
  0x41   : > { %815 = vperm.xlu0 %1746, %v668_v46   ;;  %820 = vperm.xlu1 %1747, %v669_v47  }
  0x42   : > { %1669 = vmatmul.mubr.msk.bf16.gmra.mrb[24].mxu0 %vm374_vm2, %v1763_v44  ;;  %1713 = vmatmul.mubr.msk.bf16.gmra.mrb[24].mxu1 %vm374_vm2, %v1764_v45 }
  0x43   : > { %1672 = vmatprep.mubr.msk.bf16.mxu0 %vm1781_vm1, %v1780_v1  ;;  %1716 = vmatprep.mubr.msk.bf16.mxu1 %vm1781_vm1, %v1780_v1 }
  0x45   : > { %825 = vperm.xlu0 %1746, %v670_v48   ;;  %830 = vperm.xlu1 %1747, %v671_v49  }
  0x49   : > { %835 = vperm.xlu0 %1746, %v672_v52   ;;  %840 = vperm.xlu1 %1747, %v673_v53  }
  0x4a   : > { %1673 = vmatmul.mubr.msk.bf16.gmra.mrb[28].mxu0 %vm374_vm2, %v1765_v50  ;;  %1717 = vmatmul.mubr.msk.bf16.gmra.mrb[28].mxu1 %vm374_vm2, %v1766_v51 }
  0x4b   : > { %1676 = vmatprep.mubr.msk.bf16.mxu0 %vm1781_vm1, %v1780_v1  ;;  %1720 = vmatprep.mubr.msk.bf16.mxu1 %vm1781_vm1, %v1780_v1 }
  0x4d   : > { %845 = vperm.xlu0 %1746, %v674_v54   ;;  %850 = vperm.xlu1 %1747, %v675_v55  }
  0x51   : > { %855 = vperm.xlu0 %1746, %v676_v58   ;;  %860 = vperm.xlu1 %1747, %v677_v59  }
  0x52   : > { %1677 = vmatmul.mubr.msk.bf16.gmra.mrb[32].mxu0 %vm374_vm2, %v1767_v56  ;;  %1721 = vmatmul.mubr.msk.bf16.gmra.mrb[32].mxu1 %vm374_vm2, %v1768_v57 }
  0x53   : > { %1680 = vmatprep.mubr.msk.bf16.mxu0 %vm1781_vm1, %v1780_v1  ;;  %1724 = vmatprep.mubr.msk.bf16.mxu1 %vm1781_vm1, %v1780_v1 }
  0x55   : > { %865 = vperm.xlu0 %1746, %v678_v60   ;;  %870 = vperm.xlu1 %1747, %v679_v61  }
  0x59   : > { %875 = vperm.xlu0 %1746, %v680_v0   ;;  %880 = vperm.xlu1 %1747, %v681_v2  }
  0x5a   : > { %1681 = vmatmul.mubr.msk.bf16.gmra.mrb[36].mxu0 %vm374_vm2, %v1769_v62  ;;  %1725 = vmatmul.mubr.msk.bf16.gmra.mrb[36].mxu1 %vm374_vm2, %v1770_v63 }
  0x5b   : > { %1684 = vmatprep.mubr.msk.bf16.mxu0 %vm1781_vm1, %v1780_v1 }
  0x5d   : > { %885 = vperm.xlu0 %1746, %v682_v3  }
  0x62   : > { %1685 = vmatmul.mubr.msk.bf16.gmra.mrb[40].mxu0 %vm374_vm2, %v1771_v4 }
  0x8c   : > { %v686_v5 = vpop.permute.xlu0 %685  ;;  %v696_v6 = vpop.permute.xlu1 %695 }
  0x90   : > { %v691_v7 = vpop.permute.xlu0 %690  ;;  %v701_v8 = vpop.permute.xlu1 %700 }
  0x94   : > { %v2049_v9 = vpop.permute.xlu0 %705  ;;  %v2051_v10 = vpop.permute.xlu1 %710 }
  0x98   : > { %v2053_v11 = vpop.permute.xlu0 %715  ;;  %v2055_v12 = vpop.permute.xlu1 %720 }
  0x9c   : > { %v2057_v13 = vpop.permute.xlu0 %725  ;;  %v2059_v14 = vpop.permute.xlu1 %730 }
  0xa0   : > { %v2061_v1 = vpop.permute.xlu0 %735  ;;  %v2063_v15 = vpop.permute.xlu1 %740 }
  0xa4   : > { %v2065_v16 = vpop.permute.xlu0 %745  ;;  %v2067_v17 = vpop.permute.xlu1 %750 }
  0xa8   : > { %v2069_v18 = vpop.permute.xlu0 %755  ;;  %v2071_v19 = vpop.permute.xlu1 %760 }
  0xac   : > { %v2073_v20 = vpop.permute.xlu0 %765  ;;  %v2075_v21 = vpop.permute.xlu1 %770 }
  0xb0   : > { %v2077_v22 = vpop.permute.xlu0 %775  ;;  %v2079_v23 = vpop.permute.xlu1 %780 }
  0xb4   : > { %v2081_v24 = vpop.permute.xlu0 %785  ;;  %v2083_v25 = vpop.permute.xlu1 %790 }
  0xb8   : > { %v796_v26 = vpop.permute.xlu0 %795  ;;  %v801_v27 = vpop.permute.xlu1 %800 }
  0xbc   : > { %v806_v46 = vpop.permute.xlu0 %805  ;;  %v811_v47 = vpop.permute.xlu1 %810 }
  0xc0   : > { %v816_v4 = vpop.permute.xlu0 %815 }
  0xe5   : > { %v476_v28 = vpop.f32.mrb[0].mxu0  ;;  %v564_v29 = vpop.f32.mrb[0].mxu1 }
  0xe6   : > { %v888_v30 = vmul.f32 %v686_v5, %v476_v28  ;;  %v1646_v31 = vpop.f32.mrb[1].mxu0  ;;  %v2085_v32 = vmul.f32 %v796_v26, %v564_v29  ;;  %v1690_v33 = vpop.f32.mrb[1].mxu1 }
  0xe7   : > { %v479_v34 = vpop.f32.mrb[2].mxu0  ;;  %v567_v35 = vpop.f32.mrb[2].mxu1 }
  0xe8   : > { %v889_v36 = vmul.f32 %v691_v7, %v479_v34  ;;  %v1647_v37 = vpop.f32.mrb[3].mxu0  ;;  %v2087_v38 = vmul.f32 %v801_v27, %v567_v35  ;;  %v1691_v39 = vpop.f32.mrb[3].mxu1  ;;  %v1183_v40 = vmul.f32 %v888_v30, %v888_v30 }
  0xea   : > { %v1498_v41 = vpack.c.bf16 %v889_v36, %v888_v30  ;;  %v1135_v42 = vadd.f32 %v889_v36, %v888_v30  ;;  %v1184_v43 = vmul.f32 %v889_v36, %v889_v36  ;;  %v1553_v44 = vpack.c.bf16 %v2087_v38, %v2085_v32 }
  0xec   : > { %1499 = vst [vmem:[%s2094_s20] sm:$0xff] %v1498_v41   ;;  %v1224_v45 = vadd.f32 %v1184_v43, %v1183_v40  ;;  %1605 = vst [vmem:[%s2094_s20 + $0x58] sm:$0xff] %v1553_v44   ;;  %v826_v44 = vpop.permute.xlu0 %825 }
  0xed   : > { %v484_v48 = vpop.f32.mrb[4].mxu0  ;;  %v572_v49 = vpop.f32.mrb[4].mxu1 }
  0xee   : > { %v890_v50 = vmul.f32 %v696_v6, %v484_v48  ;;  %v1650_v51 = vpop.f32.mrb[5].mxu0  ;;  %v1694_v52 = vpop.f32.mrb[5].mxu1  ;;  %v2100_v54 = vmul.f32 %v806_v46, %v572_v49 }
  0xef   : > { %v487_v53 = vpop.f32.mrb[6].mxu0  ;;  %v575_v55 = vpop.f32.mrb[6].mxu1 }
  0xf0   : > { %v1136_v56 = vadd.f32 %v1135_v42, %v890_v50  ;;  %v1185_v57 = vmul.f32 %v890_v50, %v890_v50  ;;  %v891_v58 = vmul.f32 %v701_v8, %v487_v53  ;;  %v1651_v59 = vpop.f32.mrb[7].mxu0  ;;  %v1695_v60 = vpop.f32.mrb[7].mxu1  ;;  %v2102_v61 = vmul.f32 %v811_v47, %v575_v55 }
  0xf1   : > { %v821_v6 = vpop.permute.xlu1 %820 }
  0xf2   : > { %v1225_v62 = vadd.f32 %v1224_v45, %v1185_v57  ;;  %v1503_v63 = vpack.c.bf16 %v891_v58, %v890_v50  ;;  %v1137_v0 = vadd.f32 %v1136_v56, %v891_v58  ;;  %v1186_v2 = vmul.f32 %v891_v58, %v891_v58 }
  0xf3   : > { %v1558_v3 = vpack.c.bf16 %v2102_v61, %v2100_v54 }
  0xf4   : > { %1595 = vst [vmem:[%s2094_s20 + $0x8] sm:$0xff] %v1503_v63   ;;  %v1226_v5 = vadd.f32 %v1225_v62, %v1186_v2 }
  0xf5   : > { %v492_v7 = vpop.f32.mrb[8].mxu0  ;;  %1606 = vst [vmem:[%s2094_s20 + $0x60] sm:$0xff] %v1558_v3   ;;  %v580_v26 = vpop.f32.mrb[8].mxu1 }
  0xf6   : > { %v892_v8 = vmul.f32 %v2049_v9, %v492_v7  ;;  %v1654_v27 = vpop.f32.mrb[9].mxu0  ;;  %v1698_v28 = vpop.f32.mrb[9].mxu1  ;;  %v2109_v30 = vmul.f32 %v816_v4, %v580_v26 }
  0xf7   : > { %v495_v29 = vpop.f32.mrb[10].mxu0  ;;  %v583_v31 = vpop.f32.mrb[10].mxu1 }
  0xf8   : > { %v1138_v33 = vadd.f32 %v1137_v0, %v892_v8  ;;  %v1187_v34 = vmul.f32 %v892_v8, %v892_v8  ;;  %v893_v35 = vmul.f32 %v2051_v10, %v495_v29  ;;  %v1655_v36 = vpop.f32.mrb[11].mxu0  ;;  %v1699_v37 = vpop.f32.mrb[11].mxu1  ;;  %v2112_v39 = vmul.f32 %v821_v6, %v583_v31 }
  0xf9   : > { %v831_v46 = vpop.permute.xlu1 %830  ;;  %v836_v3 = vpop.permute.xlu0 %835 }
  0xfa   : > { %v1227_v40 = vadd.f32 %v1226_v5, %v1187_v34  ;;  %v1508_v41 = vpack.c.bf16 %v893_v35, %v892_v8  ;;  %v1139_v42 = vadd.f32 %v1138_v33, %v893_v35  ;;  %v1188_v9 = vmul.f32 %v893_v35, %v893_v35 }
  0xfb   : > { %v1563_v43 = vpack.c.bf16 %v2112_v39, %v2109_v30 }
  0xfc   : > { %1596 = vst [vmem:[%s2094_s20 + $0x10] sm:$0xff] %v1508_v41   ;;  %v1228_v45 = vadd.f32 %v1227_v40, %v1188_v9 }
  0xfd   : > { %v500_v47 = vpop.f32.mrb[12].mxu0  ;;  %1607 = vst [vmem:[%s2094_s20 + $0x68] sm:$0xff] %v1563_v43   ;;  %v588_v48 = vpop.f32.mrb[12].mxu1 }
  0xfe   : > { %v894_v10 = vmul.f32 %v2053_v11, %v500_v47  ;;  %v1658_v49 = vpop.f32.mrb[13].mxu0  ;;  %v1702_v50 = vpop.f32.mrb[13].mxu1  ;;  %v2119_v52 = vmul.f32 %v826_v44, %v588_v48 }
  0xff   : > { %v503_v51 = vpop.f32.mrb[14].mxu0  ;;  %v591_v53 = vpop.f32.mrb[14].mxu1 }
 0x100   : > { %v1140_v55 = vadd.f32 %v1139_v42, %v894_v10  ;;  %v1189_v56 = vmul.f32 %v894_v10, %v894_v10  ;;  %v895_v57 = vmul.f32 %v2055_v12, %v503_v51  ;;  %v1659_v58 = vpop.f32.mrb[15].mxu0  ;;  %v1703_v59 = vpop.f32.mrb[15].mxu1  ;;  %v2122_v60 = vmul.f32 %v831_v46, %v591_v53 }
 0x101   : > { %v841_v4 = vpop.permute.xlu1 %840  ;;  %v846_v43 = vpop.permute.xlu0 %845 }
 0x102   : > { %v1229_v62 = vadd.f32 %v1228_v45, %v1189_v56  ;;  %v1513_v63 = vpack.c.bf16 %v895_v57, %v894_v10  ;;  %v1141_v0 = vadd.f32 %v1140_v55, %v895_v57  ;;  %v1190_v11 = vmul.f32 %v895_v57, %v895_v57 }
 0x103   : > { %v1568_v2 = vpack.c.bf16 %v2122_v60, %v2119_v52 }
 0x104   : > { %1597 = vst [vmem:[%s2094_s20 + $0x18] sm:$0xff] %v1513_v63   ;;  %v1230_v5 = vadd.f32 %v1229_v62, %v1190_v11 }
 0x105   : > { %v508_v6 = vpop.f32.mrb[16].mxu0  ;;  %1608 = vst [vmem:[%s2094_s20 + $0x70] sm:$0xff] %v1568_v2   ;;  %v596_v7 = vpop.f32.mrb[16].mxu1 }
 0x106   : > { %v896_v12 = vmul.f32 %v2057_v13, %v508_v6  ;;  %v1662_v26 = vpop.f32.mrb[17].mxu0  ;;  %v1706_v8 = vpop.f32.mrb[17].mxu1  ;;  %v2129_v28 = vmul.f32 %v836_v3, %v596_v7 }
 0x107   : > { %v511_v27 = vpop.f32.mrb[18].mxu0  ;;  %v599_v29 = vpop.f32.mrb[18].mxu1 }
 0x108   : > { %v1142_v31 = vadd.f32 %v1141_v0, %v896_v12  ;;  %v1191_v33 = vmul.f32 %v896_v12, %v896_v12  ;;  %v897_v34 = vmul.f32 %v2059_v14, %v511_v27  ;;  %v1663_v35 = vpop.f32.mrb[19].mxu0  ;;  %v1707_v36 = vpop.f32.mrb[19].mxu1  ;;  %v2132_v37 = vmul.f32 %v841_v4, %v599_v29 }
 0x109   : > { %v851_v44 = vpop.permute.xlu1 %850  ;;  %v856_v2 = vpop.permute.xlu0 %855 }
 0x10a   : > { %v1231_v40 = vadd.f32 %v1230_v5, %v1191_v33  ;;  %v1518_v41 = vpack.c.bf16 %v897_v34, %v896_v12  ;;  %v1143_v42 = vadd.f32 %v1142_v31, %v897_v34  ;;  %v1192_v13 = vmul.f32 %v897_v34, %v897_v34 }
 0x10b   : > { %v1573_v9 = vpack.c.bf16 %v2132_v37, %v2129_v28 }
 0x10c   : > { %1598 = vst [vmem:[%s2094_s20 + $0x20] sm:$0xff] %v1518_v41   ;;  %v1232_v45 = vadd.f32 %v1231_v40, %v1192_v13 }
 0x10d   : > { %1609 = vst [vmem:[%s2094_s20 + $0x78] sm:$0xff] %v1573_v9   ;;  %v516_v46 = vpop.f32.mrb[20].mxu0  ;;  %v604_v47 = vpop.f32.mrb[20].mxu1 }
 0x10e   : > { %v898_v14 = vmul.f32 %v2061_v1, %v516_v46  ;;  %v1666_v48 = vpop.f32.mrb[21].mxu0  ;;  %v1710_v10 = vpop.f32.mrb[21].mxu1  ;;  %v2140_v58 = vmul.f32 %v846_v43, %v604_v47 }
 0x10f   : > { %v519_v49 = vpop.f32.mrb[22].mxu0  ;;  %v607_v50 = vpop.f32.mrb[22].mxu1 }
 0x110   : > { %v1144_v51 = vadd.f32 %v1143_v42, %v898_v14  ;;  %v1193_v53 = vmul.f32 %v898_v14, %v898_v14  ;;  %v899_v55 = vmul.f32 %v2063_v15, %v519_v49  ;;  %v1667_v56 = vpop.f32.mrb[23].mxu0  ;;  %v1711_v57 = vpop.f32.mrb[23].mxu1  ;;  %v2142_v59 = vmul.f32 %v851_v44, %v607_v50 }
 0x111   : > { %v861_v3 = vpop.permute.xlu1 %860  ;;  %v866_v9 = vpop.permute.xlu0 %865 }
 0x112   : > { %v1233_v62 = vadd.f32 %v1232_v45, %v1193_v53  ;;  %v1523_v63 = vpack.c.bf16 %v899_v55, %v898_v14  ;;  %v1145_v0 = vadd.f32 %v1144_v51, %v899_v55  ;;  %v1194_v1 = vmul.f32 %v899_v55, %v899_v55 }
 0x113   : > { %v1578_v11 = vpack.c.bf16 %v2142_v59, %v2140_v58 }
 0x114   : > { %1599 = vst [vmem:[%s2094_s20 + $0x28] sm:$0xff] %v1523_v63   ;;  %v1234_v4 = vadd.f32 %v1233_v62, %v1194_v1 }
 0x115   : > { %1610 = vst [vmem:[%s2094_s20 + $0x80] sm:$0xff] %v1578_v11   ;;  %v524_v5 = vpop.f32.mrb[24].mxu0  ;;  %v612_v15 = vpop.f32.mrb[24].mxu1 }
 0x116   : > { %v900_v6 = vmul.f32 %v2065_v16, %v524_v5  ;;  %v1670_v7 = vpop.f32.mrb[25].mxu0  ;;  %v1714_v12 = vpop.f32.mrb[25].mxu1  ;;  %v2150_v35 = vmul.f32 %v856_v2, %v612_v15 }
 0x117   : > { %v527_v26 = vpop.f32.mrb[26].mxu0  ;;  %v615_v8 = vpop.f32.mrb[26].mxu1 }
 0x118   : > { %v1146_v27 = vadd.f32 %v1145_v0, %v900_v6  ;;  %v1195_v29 = vmul.f32 %v900_v6, %v900_v6  ;;  %v901_v31 = vmul.f32 %v2067_v17, %v527_v26  ;;  %v1671_v33 = vpop.f32.mrb[27].mxu0  ;;  %v1715_v34 = vpop.f32.mrb[27].mxu1  ;;  %v2152_v36 = vmul.f32 %v861_v3, %v615_v8 }
 0x119   : > { %v871_v43 = vpop.permute.xlu1 %870  ;;  %v876_v11 = vpop.permute.xlu0 %875 }
 0x11a   : > { %v1235_v40 = vadd.f32 %v1234_v4, %v1195_v29  ;;  %v1528_v41 = vpack.c.bf16 %v901_v31, %v900_v6  ;;  %v1147_v42 = vadd.f32 %v1146_v27, %v901_v31  ;;  %v1196_v16 = vmul.f32 %v901_v31, %v901_v31 }
 0x11b   : > { %v1583_v13 = vpack.c.bf16 %v2152_v36, %v2150_v35 }
 0x11c   : > { %1600 = vst [vmem:[%s2094_s20 + $0x30] sm:$0xff] %v1528_v41   ;;  %v1236_v44 = vadd.f32 %v1235_v40, %v1196_v16 }
 0x11d   : > { %1611 = vst [vmem:[%s2094_s20 + $0x88] sm:$0xff] %v1583_v13   ;;  %v532_v45 = vpop.f32.mrb[28].mxu0  ;;  %v620_v17 = vpop.f32.mrb[28].mxu1 }
 0x11e   : > { %v902_v46 = vmul.f32 %v2069_v18, %v532_v45  ;;  %v1674_v47 = vpop.f32.mrb[29].mxu0  ;;  %v1718_v14 = vpop.f32.mrb[29].mxu1  ;;  %v2160_v56 = vmul.f32 %v866_v9, %v620_v17 }
 0x11f   : > { %v535_v48 = vpop.f32.mrb[30].mxu0  ;;  %v623_v10 = vpop.f32.mrb[30].mxu1 }
 0x120   : > { %v1148_v49 = vadd.f32 %v1147_v42, %v902_v46  ;;  %v1197_v50 = vmul.f32 %v902_v46, %v902_v46  ;;  %v903_v51 = vmul.f32 %v2071_v19, %v535_v48  ;;  %v1675_v53 = vpop.f32.mrb[31].mxu0  ;;  %v1719_v55 = vpop.f32.mrb[31].mxu1  ;;  %v2162_v57 = vmul.f32 %v871_v43, %v623_v10 }
 0x121   : > { %v881_v2 = vpop.permute.xlu1 %880  ;;  %v886_v13 = vpop.permute.xlu0 %885 }
 0x122   : > { %v1237_v62 = vadd.f32 %v1236_v44, %v1197_v50  ;;  %v1533_v63 = vpack.c.bf16 %v903_v51, %v902_v46  ;;  %v1149_v0 = vadd.f32 %v1148_v49, %v903_v51  ;;  %v1198_v18 = vmul.f32 %v903_v51, %v903_v51 }
 0x123   : > { %v1588_v1 = vpack.c.bf16 %v2162_v57, %v2160_v56 }
 0x124   : > { %1601 = vst [vmem:[%s2094_s20 + $0x38] sm:$0xff] %v1533_v63   ;;  %v1238_v3 = vadd.f32 %v1237_v62, %v1198_v18 }
 0x125   : > { %1612 = vst [vmem:[%s2094_s20 + $0x90] sm:$0xff] %v1588_v1   ;;  %v540_v4 = vpop.f32.mrb[32].mxu0  ;;  %v628_v19 = vpop.f32.mrb[32].mxu1 }
 0x126   : > { %v904_v5 = vmul.f32 %v2073_v20, %v540_v4  ;;  %v1678_v15 = vpop.f32.mrb[33].mxu0  ;;  %v1722_v6 = vpop.f32.mrb[33].mxu1  ;;  %v2170_v33 = vmul.f32 %v876_v11, %v628_v19 }
 0x127   : > { %v543_v7 = vpop.f32.mrb[34].mxu0  ;;  %v631_v12 = vpop.f32.mrb[34].mxu1 }
 0x128   : > { %v1150_v26 = vadd.f32 %v1149_v0, %v904_v5  ;;  %v1199_v8 = vmul.f32 %v904_v5, %v904_v5  ;;  %v905_v27 = vmul.f32 %v2075_v21, %v543_v7  ;;  %v1679_v29 = vpop.f32.mrb[35].mxu0  ;;  %v1723_v31 = vpop.f32.mrb[35].mxu1  ;;  %v2172_v34 = vmul.f32 %v881_v2, %v631_v12 }
 0x129   : > { %v1205_v12 = vmul.f32 %v2085_v32, %v2085_v32 }
 0x12a   : > { %v1239_v40 = vadd.f32 %v1238_v3, %v1199_v8  ;;  %v1538_v41 = vpack.c.bf16 %v905_v27, %v904_v5  ;;  %v1151_v42 = vadd.f32 %v1150_v26, %v905_v27  ;;  %v1200_v20 = vmul.f32 %v905_v27, %v905_v27 }
 0x12b   : > { %v1593_v16 = vpack.c.bf16 %v2172_v34, %v2170_v33 }
 0x12c   : > { %1602 = vst [vmem:[%s2094_s20 + $0x40] sm:$0xff] %v1538_v41   ;;  %v1240_v9 = vadd.f32 %v1239_v40, %v1200_v20  ;;  %v1208_v41 = vmul.f32 %v2102_v61, %v2102_v61 }
 0x12d   : > { %1613 = vst [vmem:[%s2094_s20 + $0x98] sm:$0xff] %v1593_v16   ;;  %v548_v43 = vpop.f32.mrb[36].mxu0  ;;  %v636_v21 = vpop.f32.mrb[36].mxu1 }
 0x12e   : > { %v906_v44 = vmul.f32 %v2077_v22, %v548_v43  ;;  %v2179_v45 = vmul.f32 %v886_v13, %v636_v21  ;;  %v1682_v17 = vpop.f32.mrb[37].mxu0  ;;  %v1726_v46 = vpop.f32.mrb[37].mxu1 }
 0x12f   : > { %v551_v47 = vpop.f32.mrb[38].mxu0  ;;  %v639_v14 = vpop.f32.mrb[38].mxu1 }
 0x130   : > { %v1152_v48 = vadd.f32 %v1151_v42, %v906_v44  ;;  %v1201_v10 = vmul.f32 %v906_v44, %v906_v44  ;;  %v1494_v49 = vpack.c.bf16 %v2179_v45, %v2179_v45  ;;  %v1683_v50 = vpop.f32.mrb[39].mxu0  ;;  %v1727_v51 = vpop.f32.mrb[39].mxu1  ;;  %v907_v53 = vmul.f32 %v2079_v23, %v551_v47 }
 0x132   : > { %v1241_v55 = vadd.f32 %v1240_v9, %v1201_v10  ;;  %1134 = vst [vmem:[%s2094_s20 + $0xa0] sm:$0x1] %v1494_v49  ;;  %v1543_v62 = vpack.c.bf16 %v907_v53, %v906_v44  ;;  %v1153_v22 = vadd.f32 %v1152_v48, %v907_v53  ;;  %v1202_v63 = vmul.f32 %v907_v53, %v907_v53 }
 0x134   : > { %1603 = vst [vmem:[%s2094_s20 + $0x48] sm:$0xff] %v1543_v62   ;;  %v1242_v0 = vadd.f32 %v1241_v55, %v1202_v63 }
 0x135   : > { %v556_v18 = vpop.f32.mrb[40].mxu0 }
 0x136   : > { %v908_v1 = vmul.f32 %v2081_v24, %v556_v18  ;;  %v1686_v11 = vpop.f32.mrb[41].mxu0  ;;  %v1206_v24 = vmul.f32 %v2087_v38, %v2087_v38 }
 0x137   : > { %v559_v2 = vpop.f32.mrb[42].mxu0 }
 0x138   : > { %v1154_v3 = vadd.f32 %v1153_v22, %v908_v1  ;;  %v1203_v4 = vmul.f32 %v908_v1, %v908_v1  ;;  %v909_v19 = vmul.f32 %v2083_v25, %v559_v2  ;;  %v1687_v5 = vpop.f32.mrb[43].mxu0  ;;  %v1207_v25 = vmul.f32 %v2100_v54, %v2100_v54 }
 0x13a   : > { %v1243_v15 = vadd.f32 %v1242_v0, %v1203_v4  ;;  %v1548_v23 = vpack.c.bf16 %v909_v19, %v908_v1  ;;  %v1155_v6 = vadd.f32 %v1154_v3, %v909_v19  ;;  %v1204_v7 = vmul.f32 %v909_v19, %v909_v19 }
 0x13b   : > { %v1223_v3 = vmul.f32 %v2179_v45, %v2179_v45 }
 0x13c   : > { %1604 = vst [vmem:[%s2094_s20 + $0x50] sm:$0xff] %v1548_v23   ;;  %v1156_v26 = vadd.f32 %v1155_v6, %v2085_v32  ;;  %v1244_v8 = vadd.f32 %v1243_v15, %v1204_v7  ;;  %v1209_v32 = vmul.f32 %v2109_v30, %v2109_v30 }
 0x13d   : > { %v1263_v23 = vsel %vm438_vm0, %v1223_v3, 0.0 }
 0x13e   : > { %v1157_v27 = vadd.f32 %v1156_v26, %v2087_v38  ;;  %v1245_v29 = vadd.f32 %v1244_v8, %v1205_v12  ;;  %v1210_v38 = vmul.f32 %v2112_v39, %v2112_v39 }
 0x140   : > { %v1158_v31 = vadd.f32 %v1157_v27, %v2100_v54  ;;  %v1246_v40 = vadd.f32 %v1245_v29, %v1206_v24  ;;  %v1211_v54 = vmul.f32 %v2119_v52, %v2119_v52 }
 0x142   : > { %v1159_v42 = vadd.f32 %v1158_v31, %v2102_v61  ;;  %v1247_v20 = vadd.f32 %v1246_v40, %v1207_v25  ;;  %v1212_v61 = vmul.f32 %v2122_v60, %v2122_v60 }
 0x144   : > { %v1160_v16 = vadd.f32 %v1159_v42, %v2109_v30  ;;  %v1248_v13 = vadd.f32 %v1247_v20, %v1208_v41  ;;  %v1213_v30 = vmul.f32 %v2129_v28, %v2129_v28 }
 0x146   : > { %v1161_v9 = vadd.f32 %v1160_v16, %v2112_v39  ;;  %v1249_v43 = vadd.f32 %v1248_v13, %v1209_v32  ;;  %v1214_v39 = vmul.f32 %v2132_v37, %v2132_v37 }
 0x148   : > { %v1162_v21 = vadd.f32 %v1161_v9, %v2119_v52  ;;  %v1250_v44 = vadd.f32 %v1249_v43, %v1210_v38  ;;  %v1215_v52 = vmul.f32 %v2140_v58, %v2140_v58 }
 0x14a   : > { %v1163_v17 = vadd.f32 %v1162_v21, %v2122_v60  ;;  %v1251_v46 = vadd.f32 %v1250_v44, %v1211_v54  ;;  %v1216_v60 = vmul.f32 %v2142_v59, %v2142_v59 }
 0x14c   : > { %v1164_v47 = vadd.f32 %v1163_v17, %v2129_v28  ;;  %v1252_v14 = vadd.f32 %v1251_v46, %v1212_v61  ;;  %v1217_v28 = vmul.f32 %v2150_v35, %v2150_v35 }
 0x14e   : > { %v1165_v48 = vadd.f32 %v1164_v47, %v2132_v37  ;;  %v1253_v10 = vadd.f32 %v1252_v14, %v1213_v30  ;;  %v1218_v37 = vmul.f32 %v2152_v36, %v2152_v36 }
 0x150   : > { %v1166_v49 = vadd.f32 %v1165_v48, %v2140_v58  ;;  %v1254_v50 = vadd.f32 %v1253_v10, %v1214_v39  ;;  %v1219_v58 = vmul.f32 %v2160_v56, %v2160_v56 }
 0x152   : > { %v1167_v51 = vadd.f32 %v1166_v49, %v2142_v59  ;;  %v1255_v53 = vadd.f32 %v1254_v50, %v1215_v52  ;;  %v1220_v59 = vmul.f32 %v2162_v57, %v2162_v57 }
 0x154   : > { %v1168_v55 = vadd.f32 %v1167_v51, %v2150_v35  ;;  %v1256_v62 = vadd.f32 %v1255_v53, %v1216_v60  ;;  %v1221_v35 = vmul.f32 %v2170_v33, %v2170_v33 }
 0x156   : > { %v1169_v22 = vadd.f32 %v1168_v55, %v2152_v36  ;;  %v1257_v63 = vadd.f32 %v1256_v62, %v1217_v28 }
 0x158   : > { %v1170_v0 = vadd.f32 %v1169_v22, %v2160_v56  ;;  %v1258_v18 = vadd.f32 %v1257_v63, %v1218_v37  ;;  %v1222_v56 = vmul.f32 %v2172_v34, %v2172_v34 }
 0x15a   : > { %v1171_v1 = vadd.f32 %v1170_v0, %v2162_v57  ;;  %v1259_v11 = vadd.f32 %v1258_v18, %v1219_v58  ;;  %v1174_v57 = vsel %vm438_vm0, %v2179_v45, 0.0 }
 0x15c   : > { %v1172_v2 = vadd.f32 %v1171_v1, %v2170_v33  ;;  %v1260_v36 = vadd.f32 %v1259_v11, %v1220_v59 }
 0x15e   : > { %v1173_v4 = vadd.f32 %v1172_v2, %v2172_v34  ;;  %v1261_v19 = vadd.f32 %v1260_v36, %v1221_v35 }
 0x160   : > { %v1175_v5 = vadd.f32 %v1174_v57, %v1173_v4  ;;  %v1262_v15 = vadd.f32 %v1261_v19, %v1222_v56 }
 0x162   : > { %v1176_v6 = vrot.slane %v1175_v5, 4  ;;  %v1264_v33 = vadd.f32 %v1263_v23, %v1262_v15 }
 0x164   : > { %v1177_v7 = vadd.f32 %v1176_v6, %v1175_v5  ;;  %v1265_v12 = vrot.slane %v1264_v33, 4 }
 0x166   : > { %v1178_v26 = vrot.slane %v1177_v7, 2  ;;  %v1266_v8 = vadd.f32 %v1265_v12, %v1264_v33 }
 0x168   : > { %v1179_v24 = vadd.f32 %v1178_v26, %v1177_v7  ;;  %v1267_v27 = vrot.slane %v1266_v8, 2 }
 0x16a   : > { %v1180_v29 = vrot.slane %v1179_v24, 1  ;;  %v1268_v25 = vadd.f32 %v1267_v27, %v1266_v8 }
 0x16c   : > { %v1181_v34 = vadd.f32 %v1180_v29, %v1179_v24  ;;  %v1269_v45 = vrot.slane %v1268_v25, 1 }
 0x16e   : > { %1182 = vst [vmem:[%s208_s23] sm:$0x1] %v1181_v34  ;;  %v1270_v31 = vadd.f32 %v1269_v45, %v1268_v25 }
 0x170   : > { %1271 = vst [vmem:[%s208_s23 + $0x1] sm:$0x1] %v1270_v31 }
 0x171 PF: > { %s15_s15 = sadd.s32 1, %s1778_s15  }
 0x172   : > { %p12_p4 = scmp.ge.s32.totalorder %s15_s15, 4  }
 0x174   :  { %14 = sbr.rel (!%p12_p4) target bundleno = 1 (0x1), region = 74 }

// kernel: layer_type4_forward.5
= control target key start
LH: loop header
LB: loop body
LE: loop exit
PB: predicated region body
PF: predicated region fallthrough
CT: control target
= control target key end

     0   :  { %s507_s12 = smov 0   ;;  %s509_s13 = smov 0   ;;  %s579_s0 = inlined_call_operand.vmem [shape: bf16[2,280,128], index: 0, kind: input, shape index: {}]   ;;  %s580_s1 = inlined_call_operand.vmem [shape: f32[2,128], index: 1, kind: input, shape index: {}]   ;;  %s581_s2 = inlined_call_operand.vmem [shape: f32[2,128], index: 2, kind: input, shape index: {}]   ;;  %s582_s3 = inlined_call_operand.vmem [shape: f32[2,7,19,128], index: 3, kind: output, shape index: {}]  }
   0x1   :  { %s511_s14 = smov 0   ;;  %s513_s15 = smov 0  }
   0x2   :  { %s515_s16 = smov 0  }
   0x3 LB: > { %s22_s17 = sadd.s32 1, %s477_s14  ;;  %s25_s18 = sadd.s32 1, %s481_s15  ;;  %s485_s16 = sphi %s515_s16, %s13_s16   ;;  %s481_s15 = sphi %s513_s15, %s586_s15   ;;  %s477_s14 = sphi %s511_s14, %s585_s14   ;;  %s473_s13 = sphi %s509_s13, %s584_s13   ;;  %s469_s12 = sphi %s507_s12, %s583_s12  }
   0x4   : > { %p23_p0 = scmp.ge.s32.totalorder %s22_s17, 7  ;;  %p388_p1 = scmp.ge.s32.totalorder %s485_s16, 1 }
   0x5   : > { %p158_p2 = scmp.lt.s32.totalorder %s485_s16, 15 }
   0x6   : > { %s588_s17 = smov (%p23_p0, %s22_s17), 0  ;;  %s590_s18 = smov (!%p23_p0, %s25_s18), %s481_s15 }
   0x7   : > { %p159_p3 = pnand %p388_p1, %p158_p2  ;;  %p27_p4 = scmp.ge.s32.totalorder %s590_s18, 2 }
   0x8   : > { %s190_s19 = smul.u32 (!%p159_p3), 5, %s469_s12  ;;  %p191_p5 = scmp.lt.s32.totalorder (!%p159_p3), %s473_s13, 1  ;;  %v209_v0 = vld [vmem:[%s580_s1] sm:$0x1] (!%p159_p3)  ;;  %v211_v1 = vld [vmem:[%s580_s1 + $0x1] sm:$0x1] (!%p159_p3)  ;;  %v275_v10 = vlaneseq (!%p159_p3) }
   0x9   : > { %s592_s18 = smov (%p27_p4, %s590_s18), 0  ;;  %162 = sbr.rel (%p159_p3) target bundleno = 43 (0x2b), region = 32 }
   0xa   : > { %v210_v2 = vmul.f32 (!%p159_p3), 0.0025510204, %v209_v0  ;;  %v212_v3 = vmul.f32 (!%p159_p3), 0.0025510204, %v211_v1  ;;  %p193_p6 = scmp.lt.s32.totalorder (!%p159_p3), %s190_s19, 34  ;;  %p202_p7 = scmp.lt.s32.totalorder (!%p159_p3), %s469_s12, 6 }
   0xb   : > { %vm237_vm0 = vcmask (!%p159_p3), 1046528   ;;  %v276_v21 = vshrl.u32 (!%p159_p3), %v275_v10, 7  ;;  %v215_v27 = vld [vmem:[%s581_s2] sm:$0x1] (!%p159_p3)  ;;  %vm260_vm1 = vcmask (!%p159_p3), 1043456  }
   0xc   : > { %v213_v4 = vmul.f32 (!%p159_p3), %v210_v2, %v210_v2  ;;  %v219_v38 = vld [vmem:[%s581_s2 + $0x1] sm:$0x1] (!%p159_p3) }
   0xd   : > { %v277_v32 = vsub.s32 (!%p159_p3), 0, %v276_v21 }
   0xe   : > { %v214_v5 = vsub.f32 (!%p159_p3), %v212_v3, %v213_v4 }
  0x10   : > { %s594_s13 = smov (!%p191_p5, %s473_s13), 1  ;;  %s596_s19 = smov (!%p193_p6, %s190_s19), 34  ;;  %v216_v6 = vadd.f32 1e-05, %v214_v5 }
  0x11   : > { %s402_s24 = smul.u32 35, %s594_s13  ;;  %s598_s12 = smov (!%p202_p7, %s469_s12), 6 }
  0x12   : > { %445 = vrsqrt.f32 %v216_v6  ;;  %s404_s30 = smul.u32 21, %s594_s13 }
  0x13   : > { %s196_s25 = sadd.s32 %s402_s24, %s596_s19  ;;  %s403_s4 = smul.u32 3, %s598_s12 }
  0x14   : > { %s389_s26 = sshll.u32 %s196_s25, 2 }
  0x15   : > { %s198_s29 = scalar_lea.vmem %s579_s0, %s389_s26  ;;  %s206_s7 = sadd.s32 %s404_s30, %s403_s4 }
  0x16   : > { %v394_v7 = vld [vmem:[%s198_s29] sm:$0xff]   ;;  %v401_v8 = vld [vmem:[%s198_s29 + $0x8] sm:$0xff]   ;;  %v226_v9 = vld [vmem:[%s198_s29 + $0x10] sm:$0xf]  ;;  %s390_s10 = sshll.u32 %s206_s7, 3 }
  0x17   : > { %v395_v11 = vunpack.c.l.bf16 %v394_v7  ;;  %v396_v12 = vunpack.c.h.bf16 %v394_v7  ;;  %v399_v13 = vunpack.c.l.bf16 %v401_v8  ;;  %v400_v14 = vunpack.c.h.bf16 %v401_v8  ;;  %s208_s13 = scalar_lea.vmem %s582_s3, %s390_s10 }
  0x18   : > { %v231_v15 = vunpack.c.l.bf16 %v226_v9 }
  0x19   : > { %v238_v16 = vrot.slane %v395_v11, 1  ;;  %v239_v17 = vrot.slane %v396_v12, 1  ;;  %v241_v18 = vrot.slane %v399_v13, 1  ;;  %v243_v19 = vrot.slane %v400_v14, 1 }
  0x1a   : > { %v245_v20 = vrot.slane %v231_v15, 1 }
  0x1b   : > { %v240_v22 = vsel %vm237_vm0, %v238_v16, %v239_v17  ;;  %v244_v23 = vsel %vm237_vm0, %v241_v18, %v243_v19  ;;  %v242_v24 = vsel %vm237_vm0, %v239_v17, %v241_v18 }
  0x1c   : > { %v246_v25 = vsel %vm237_vm0, %v243_v19, %v245_v20  ;;  %v254_v26 = vadd.f32 %v399_v13, %v244_v23  ;;  %v256_v29 = vadd.f32 %v245_v20, %v231_v15  ;;  %v252_v30 = vadd.f32 %v395_v11, %v240_v22  ;;  %v446_v34 = vpop.eup %445 }
  0x1d   : > { %v255_v28 = vadd.f32 %v400_v14, %v246_v25  ;;  %v253_v33 = vadd.f32 %v396_v12, %v242_v24  ;;  %v218_v37 = vmul.f32 %v446_v34, %v215_v27 }
  0x1e   : > { %v261_v31 = vrot.slane %v254_v26, 4  ;;  %v264_v36 = vrot.slane %v256_v29, 4 }
  0x1f   : > { %v262_v35 = vrot.slane %v255_v28, 4  ;;  %v220_v42 = vmul.f32 %v218_v37, %v210_v2  ;;  %v278_v44 = vrot.slane %v218_v37, %v277_v32 }
  0x20   : > { %v271_v41 = vadd.f32 %v264_v36, %v254_v26 }
  0x21   : > { %v263_v39 = vsel %vm260_vm1, %v261_v31, %v262_v35  ;;  %v265_v40 = vsel %vm260_vm1, %v262_v35, %v264_v36  ;;  %v221_v47 = vsub.f32 %v219_v38, %v220_v42 }
  0x22   : > { %v269_v43 = vadd.f32 %v263_v39, %v252_v30  ;;  %v270_v45 = vadd.f32 %v265_v40, %v253_v33  ;;  %v274_v46 = vmul.f32 0.25, %v271_v41 }
  0x23   : > { %v285_v52 = vrot.slane %v221_v47, %v277_v32 }
  0x24   : > { %v272_v48 = vmul.f32 0.25, %v269_v43  ;;  %v273_v49 = vmul.f32 0.25, %v270_v45  ;;  %v281_v50 = vmul.f32 %v278_v44, %v274_v46 }
  0x26   : > { %v279_v51 = vmul.f32 %v278_v44, %v272_v48  ;;  %v280_v53 = vmul.f32 %v278_v44, %v273_v49  ;;  %v288_v56 = vadd.f32 %v285_v52, %v281_v50 }
  0x28   : > { %v286_v54 = vadd.f32 %v285_v52, %v279_v51  ;;  %v287_v55 = vadd.f32 %v285_v52, %v280_v53  ;;  %291 = vst [vmem:[%s208_s13 + $0x10] sm:$0x7] %v288_v56 }
  0x2a   : > { %289 = vst [vmem:[%s208_s13] sm:$0xff] %v286_v54  ;;  %290 = vst [vmem:[%s208_s13 + $0x8] sm:$0xff] %v287_v55 }
  0x2b PF: > { %s13_s16 = sadd.s32 1, %s485_s16   ;;  %s583_s12 = smov %s477_s14 }
  0x2c   : > { %p10_p8 = scmp.ge.s32.totalorder %s13_s16, 16   ;;  %s584_s13 = smov %s481_s15 }
  0x2d   : > { %s585_s14 = smov %s588_s17  ;;  %s586_s15 = smov %s592_s18 }
  0x2e   :  { %12 = sbr.rel (!%p10_p8) target bundleno = 3 (0x3), region = 62 }

// kernel: layer_type4_forward.4
= control target key start
LH: loop header
LB: loop body
LE: loop exit
PB: predicated region body
PF: predicated region fallthrough
CT: control target
= control target key end

     0   :  { %s6370_s21 = smov 0   ;;  %s8708_s0 = inlined_call_operand.vmem [shape: bf16[2,322,128], index: 0, kind: input, shape index: {}]   ;;  %s8709_s1 = inlined_call_operand.vmem [shape: f32[2,128], index: 1, kind: input, shape index: {}]   ;;  %s8710_s2 = inlined_call_operand.vmem [shape: f32[2,128], index: 2, kind: input, shape index: {}]   ;;  %s8711_s3 = inlined_call_operand.vmem [shape: bf16[1152,128], index: 3, kind: input, shape index: {}]   ;;  %s8712_s4 = inlined_call_operand.vmem [shape: f32[280,1], index: 4, kind: input, shape index: {}]   ;;  %s8713_s5 = inlined_call_operand.vmem [shape: bf16[2,280,128], index: 5, kind: output, shape index: {0}]   ;;  %s8714_s6 = inlined_call_operand.vmem [shape: f32[2,2,128], index: 6, kind: output, shape index: {1}]  }
   0x1 LB: > { %s5153_s22 = sadd.s32 4294967295, %s6332_s21   ;;  %p5157_p0 = scmp.ge.s32.totalorder %s6332_s21, 1  ;;  %s6332_s21 = sphi %s6370_s21, %s17_s21  }
   0x2   : > { %p215_p1 = scmp.lt.s32.totalorder %s6332_s21, 3 }
   0x4   : > { %p216_p2 = pnand %p5157_p0, %p215_p1 }
   0x6   : > { %219 = sbr.rel (%p216_p2) target bundleno = 747 (0x2eb), region = 40 }
   0xd   : > { %v6021_v0 = vld [vmem:[%s8711_s3] sm:$0xff]   ;;  %v8763_v1 = vmov 0   ;;  %v6023_v3 = vld [vmem:[%s8711_s3 + $0x8] sm:$0xff]   ;;  %v6025_v5 = vld [vmem:[%s8711_s3 + $0x10] sm:$0xff]   ;;  %p249_p3 = scmp.lt.s32.totalorder %s5153_s22, 1  ;;  %v359_v30 = vlaneseq  ;;  %vm1098_vm0 = vcmask 1042432  }
   0xe   : > { %3649 = vmatprep.subr.bf16.mxu1 %v8763_v1  ;;  %3825 = vmatprep.subr.bf16.mxu0 %v8763_v1  ;;  %v6022_v2 = vld [vmem:[%s8711_s3 + $0x80] sm:$0xff]   ;;  %v6024_v4 = vld [vmem:[%s8711_s3 + $0x88] sm:$0xff]   ;;  %v6026_v6 = vld [vmem:[%s8711_s3 + $0x90] sm:$0xff]   ;;  %vm1099_vm1 = vcmask 1046532   ;;  %vm1282_vm2 = vcmask 1041408   ;;  %vm1283_vm3 = vcmask 1045508  }
   0xf   : > { %3650 = vmatpush1.bf16.msra.mxu1 %v6021_v0  ;;  %6019 = vset.pattern.permute.xlu0 %v8763_v1  ;;  %v6027_v7 = vld [vmem:[%s8711_s3 + $0x18] sm:$0xff]   ;;  %v6029_v9 = vld [vmem:[%s8711_s3 + $0x20] sm:$0xff]   ;;  %v6031_v11 = vld [vmem:[%s8711_s3 + $0x28] sm:$0xff]   ;;  %s8903_s22 = smov (!%p249_p3, %s5153_s22), 1  ;;  %v6507_v36 = vshrl.u32 %v359_v30, 7  ;;  %vm1724_vm11 = vcmask 1040384  }
  0x10   : > { %3826 = vmatpush1.bf16.msra.mxu0 %v6022_v2  ;;  %3651 = vmatprep.subr.bf16.mxu1 %v8763_v1  ;;  %v6028_v8 = vld [vmem:[%s8711_s3 + $0x98] sm:$0xff]   ;;  %v6030_v10 = vld [vmem:[%s8711_s3 + $0xa0] sm:$0xff]   ;;  %v6032_v12 = vld [vmem:[%s8711_s3 + $0xa8] sm:$0xff]   ;;  %s6008_s23 = smul.u32 164, %s8903_s22  ;;  %vm671_vm4 = vsmask.f32 3328 }
  0x11   : > { %3827 = vmatprep.subr.bf16.mxu0 %v8763_v1  ;;  %6020 = vset.pattern.permute.xlu1 %v8763_v1  ;;  %v6033_v13 = vld [vmem:[%s8711_s3 + $0x30] sm:$0xff]   ;;  %v6035_v15 = vld [vmem:[%s8711_s3 + $0x38] sm:$0xff]   ;;  %v6037_v17 = vld [vmem:[%s8711_s3 + $0x40] sm:$0xff]   ;;  %v361_v48 = vsub.s32 0, %v6507_v36  ;;  %vm672_vm5 = vsmask.f32 7440 }
  0x12   : > { %v6034_v14 = vld [vmem:[%s8711_s3 + $0xb0] sm:$0xff]   ;;  %v6036_v16 = vld [vmem:[%s8711_s3 + $0xb8] sm:$0xff]   ;;  %v6038_v18 = vld [vmem:[%s8711_s3 + $0xc0] sm:$0xff]   ;;  %s6488_s30 = scalar_lea.vmem %s8708_s0, %s6008_s23  ;;  %vm1461_vm9 = vsmask.f32 1280  ;;  %vm1725_vm13 = vcmask 1044484  }
  0x13   : > { %3652 = vmatpush1.bf16.msra.mxu1 %v6023_v3  ;;  %v264_v19 = vld [vmem:[%s8709_s1] sm:$0x1]  ;;  %v266_v20 = vld [vmem:[%s8709_s1 + $0x1] sm:$0x1]  ;;  %v6039_v23 = vld [vmem:[%s8711_s3 + $0x48] sm:$0xff]   ;;  %s5160_s25 = sshll.u32 %s8903_s22, 1 }
  0x14   : > { %3828 = vmatpush1.bf16.msra.mxu0 %v6024_v4  ;;  %3653 = vmatprep.subr.bf16.mxu1 %v8763_v1  ;;  %v6464_v21 = vmul.f32 0.001953125, %v264_v19  ;;  %v267_v22 = vmul.f32 0.001953125, %v266_v20  ;;  %v6040_v24 = vld [vmem:[%s8711_s3 + $0xc8] sm:$0xff]   ;;  %v6041_v27 = vld [vmem:[%s8711_s3 + $0x50] sm:$0xff]   ;;  %v6043_v31 = vld [vmem:[%s8711_s3 + $0x58] sm:$0xff]   ;;  %s262_s28 = scalar_lea.vmem %s8714_s6, %s5160_s25 }
  0x15   : > { %3829 = vmatprep.subr.bf16.mxu0 %v8763_v1  ;;  %v6042_v28 = vld [vmem:[%s8711_s3 + $0xd0] sm:$0xff]   ;;  %v6044_v32 = vld [vmem:[%s8711_s3 + $0xd8] sm:$0xff]   ;;  %v6498_v33 = vld [vmem:[%s6488_s30] sm:$0xff]   ;;  %vm1462_vm10 = vsmask.f32 5392 }
  0x16   : > { %v268_v25 = vmul.f32 %v6464_v21, %v6464_v21  ;;  %v6501_v34 = vld [vmem:[%s6488_s30 + $0x8] sm:$0xff]   ;;  %v6045_v35 = vld [vmem:[%s8711_s3 + $0x60] sm:$0xff]   ;;  %v6510_v37 = vld [vmem:[%s6488_s30 + $0x10] sm:$0xff]   ;;  %v5554_v45 = vunpack.c.l.bf16 %v6498_v33  ;;  %v5555_v46 = vunpack.c.h.bf16 %v6498_v33 }
  0x17   : > { %3654 = vmatpush1.bf16.msra.mxu1 %v6025_v5  ;;  %v6046_v38 = vld [vmem:[%s8711_s3 + $0xe0] sm:$0xff]   ;;  %v6516_v39 = vld [vmem:[%s6488_s30 + $0x18] sm:$0xff]   ;;  %v6522_v41 = vld [vmem:[%s6488_s30 + $0x28] sm:$0xff]   ;;  %v5558_v47 = vunpack.c.l.bf16 %v6501_v34  ;;  %v5559_v51 = vunpack.c.h.bf16 %v6501_v34  ;;  %v5562_v52 = vunpack.c.l.bf16 %v6510_v37  ;;  %v5563_v53 = vunpack.c.h.bf16 %v6510_v37 }
  0x18   : > { %3830 = vmatpush1.bf16.msra.mxu0 %v6026_v6  ;;  %3655 = vmatprep.subr.bf16.mxu1 %v8763_v1  ;;  %v269_v26 = vsub.f32 %v267_v22, %v268_v25  ;;  %v6519_v40 = vld [vmem:[%s6488_s30 + $0x20] sm:$0xff]   ;;  %v6529_v43 = vld [vmem:[%s6488_s30 + $0x30] sm:$0xff]   ;;  %v6047_v44 = vld [vmem:[%s8711_s3 + $0x68] sm:$0xff]   ;;  %v5566_v54 = vunpack.c.l.bf16 %v6516_v39  ;;  %v5567_v56 = vunpack.c.h.bf16 %v6516_v39  ;;  %v5574_v59 = vunpack.c.l.bf16 %v6522_v41 }
  0x19   : > { %3831 = vmatprep.subr.bf16.mxu0 %v8763_v1  ;;  %v270_v42 = vld [vmem:[%s8710_s2] sm:$0x1]  ;;  %v6540_v49 = vld [vmem:[%s6488_s30 + $0x38] sm:$0xff]   ;;  %v6048_v50 = vld [vmem:[%s8711_s3 + $0xe8] sm:$0xff]   ;;  %v5570_v57 = vunpack.c.l.bf16 %v6519_v40  ;;  %v5571_v58 = vunpack.c.h.bf16 %v6519_v40  ;;  %v5575_v63 = vunpack.c.h.bf16 %v6522_v41  ;;  %v5578_v0 = vunpack.c.l.bf16 %v6529_v43 }
  0x1a   : > { %v271_v29 = vadd.f32 1e-05, %v269_v26  ;;  %v6550_v55 = vld [vmem:[%s6488_s30 + $0x40] sm:$0xff]   ;;  %v6557_v60 = vld [vmem:[%s6488_s30 + $0x48] sm:$0xff]   ;;  %v6560_v61 = vld [vmem:[%s6488_s30 + $0x50] sm:$0xff]   ;;  %v5579_v2 = vunpack.c.h.bf16 %v6529_v43  ;;  %v5582_v3 = vunpack.c.l.bf16 %v6540_v49  ;;  %v5583_v6 = vunpack.c.h.bf16 %v6540_v49 }
  0x1b   : > { %3656 = vmatpush1.bf16.msra.mxu1 %v6027_v7  ;;  %v6568_v4 = vld [vmem:[%s6488_s30 + $0x58] sm:$0xff]   ;;  %v5586_v7 = vunpack.c.l.bf16 %v6550_v55  ;;  %v6050_v22 = vld [vmem:[%s8711_s3 + $0xf0] sm:$0xff]   ;;  %vm6668_vm6 = vmor %vm1098_vm0, %vm1099_vm1 }
  0x1c   : > { %3832 = vmatpush1.bf16.msra.mxu0 %v6028_v8  ;;  %3657 = vmatprep.subr.bf16.mxu1 %v8763_v1  ;;  %6307 = vrsqrt.f32 %v271_v29  ;;  %v5587_v8 = vunpack.c.h.bf16 %v6550_v55  ;;  %v5598_v19 = vunpack.c.l.bf16 %v6568_v4  ;;  %v5599_v20 = vunpack.c.h.bf16 %v6568_v4  ;;  %v6051_v26 = vld [vmem:[%s8711_s3 + $0x78] sm:$0xff]   ;;  %vm6689_vm7 = vmor %vm1282_vm2, %vm1283_vm3  ;;  %v6151_v55 = vld [vmem:[%s8711_s3 + $0x1c8] sm:$0xff]  }
  0x1d   : > { %3833 = vmatprep.subr.bf16.mxu0 %v8763_v1  ;;  %v6052_v40 = vld [vmem:[%s8711_s3 + $0xf8] sm:$0xff]   ;;  %vm6695_vm8 = vmor %vm671_vm4, %vm672_vm5 }
  0x1e   : > { %vm7631_vm12 = vmor %vm1461_vm9, %vm1462_vm10 }
  0x1f   : > { %3658 = vmatpush1.bf16.msra.mxu1 %v6029_v9  ;;  %v6575_v9 = vld [vmem:[%s6488_s30 + $0x60] sm:$0xff]   ;;  %vm7638_vm14 = vmor %vm1724_vm11, %vm1725_vm13 }
  0x20   : > { %3834 = vmatpush1.bf16.msra.mxu0 %v6030_v10  ;;  %3659 = vmatprep.subr.bf16.mxu1 %v8763_v1  ;;  %v6578_v10 = vld [vmem:[%s6488_s30 + $0x68] sm:$0xff]  }
  0x21   : > { %3835 = vmatprep.subr.bf16.mxu0 %v8763_v1 }
  0x23   : > { %3660 = vmatpush1.bf16.msra.mxu1 %v6031_v11  ;;  %v274_v11 = vld [vmem:[%s8710_s2 + $0x1] sm:$0x1] }
  0x24   : > { %3836 = vmatpush1.bf16.msra.mxu0 %v6032_v12  ;;  %3661 = vmatprep.subr.bf16.mxu1 %v8763_v1  ;;  %v5590_v12 = vunpack.c.l.bf16 %v6557_v60 }
  0x25   : > { %3837 = vmatprep.subr.bf16.mxu0 %v8763_v1 }
  0x26   : > { %v6308_v62 = vpop.eup %6307 }
  0x27   : > { %3662 = vmatpush1.bf16.msra.mxu1 %v6033_v13  ;;  %v273_v5 = vmul.f32 %v6308_v62, %v270_v42  ;;  %v5591_v13 = vunpack.c.h.bf16 %v6557_v60 }
  0x28   : > { %3838 = vmatpush1.bf16.msra.mxu0 %v6034_v14  ;;  %3663 = vmatprep.subr.bf16.mxu1 %v8763_v1  ;;  %v5594_v14 = vunpack.c.l.bf16 %v6560_v61 }
  0x29   : > { %3839 = vmatprep.subr.bf16.mxu0 %v8763_v1 }
  0x2b   : > { %3664 = vmatpush1.bf16.msra.mxu1 %v6035_v15  ;;  %v5595_v15 = vunpack.c.h.bf16 %v6560_v61 }
  0x2c   : > { %3840 = vmatpush1.bf16.msra.mxu0 %v6036_v16  ;;  %3665 = vmatprep.subr.bf16.mxu1 %v8763_v1  ;;  %v6049_v16 = vld [vmem:[%s8711_s3 + $0x70] sm:$0xff]  }
  0x2d   : > { %3841 = vmatprep.subr.bf16.mxu0 %v8763_v1 }
  0x2f   : > { %3666 = vmatpush1.bf16.msra.mxu1 %v6037_v17  ;;  %v275_v17 = vmul.f32 %v273_v5, %v6464_v21  ;;  %v5603_v21 = vunpack.c.h.bf16 %v6575_v9 }
  0x30   : > { %3842 = vmatpush1.bf16.msra.mxu0 %v6038_v18  ;;  %3667 = vmatprep.subr.bf16.mxu1 %v8763_v1  ;;  %v6591_v18 = vrot.slane %v273_v5, %v361_v48 }
  0x31   : > { %3843 = vmatprep.subr.bf16.mxu0 %v8763_v1 }
  0x32   : > { %v364_v29 = vmul.f32 %v5555_v46, %v6591_v18  ;;  %v365_v30 = vmul.f32 %v5558_v47, %v6591_v18  ;;  %v367_v33 = vmul.f32 %v5562_v52, %v6591_v18  ;;  %v368_v34 = vmul.f32 %v5563_v53, %v6591_v18 }
  0x33   : > { %3668 = vmatpush1.bf16.msra.mxu1 %v6039_v23  ;;  %v5602_v23 = vunpack.c.l.bf16 %v6575_v9  ;;  %v370_v37 = vmul.f32 %v5567_v56, %v6591_v18  ;;  %v6622_v39 = vmul.f32 %v5571_v58, %v6591_v18  ;;  %v6629_v41 = vmul.f32 %v5574_v59, %v6591_v18 }
  0x34   : > { %3844 = vmatpush1.bf16.msra.mxu0 %v6040_v24  ;;  %3669 = vmatprep.subr.bf16.mxu1 %v8763_v1  ;;  %v5606_v24 = vunpack.c.l.bf16 %v6578_v10  ;;  %v6632_v42 = vmul.f32 %v5575_v63, %v6591_v18  ;;  %v7077_v60 = vmul.f32 %v5595_v15, %v6591_v18 }
  0x35   : > { %3845 = vmatprep.subr.bf16.mxu0 %v8763_v1 }
  0x37   : > { %3670 = vmatpush1.bf16.msra.mxu1 %v6041_v27  ;;  %v276_v27 = vsub.f32 %v274_v11, %v275_v17 }
  0x38   : > { %3846 = vmatpush1.bf16.msra.mxu0 %v6042_v28  ;;  %3671 = vmatprep.subr.bf16.mxu1 %v8763_v1  ;;  %v363_v28 = vmul.f32 %v5554_v45, %v6591_v18 }
  0x39   : > { %3847 = vmatprep.subr.bf16.mxu0 %v8763_v1  ;;  %v6617_v36 = vrot.slane %v276_v27, %v361_v48 }
  0x3b   : > { %3672 = vmatpush1.bf16.msra.mxu1 %v6043_v31  ;;  %v6611_v31 = vld [vmem:[%s6488_s30 + $0x70] sm:$0xff]   ;;  %v408_v46 = vadd.f32 %v6617_v36, %v363_v28  ;;  %v409_v47 = vadd.f32 %v6617_v36, %v364_v29  ;;  %v410_v48 = vadd.f32 %v6617_v36, %v365_v30  ;;  %v413_v52 = vadd.f32 %v6617_v36, %v368_v34 }
  0x3c   : > { %3848 = vmatpush1.bf16.msra.mxu0 %v6044_v32  ;;  %3673 = vmatprep.subr.bf16.mxu1 %v8763_v1  ;;  %v366_v32 = vmul.f32 %v5559_v51, %v6591_v18  ;;  %v412_v51 = vadd.f32 %v6617_v36, %v367_v33 }
  0x3d   : > { %3849 = vmatprep.subr.bf16.mxu0 %v8763_v1  ;;  %v449_v56 = vmax.f32 %v408_v46, 0.0  ;;  %v451_v58 = vmax.f32 %v410_v48, 0.0  ;;  %v454_v63 = vmax.f32 %v413_v52, 0.0 }
  0x3e   : > { %v453_v62 = vmax.f32 %v412_v51, 0.0 }
  0x3f   : > { %3674 = vmatpush1.bf16.msra.mxu1 %v6045_v35  ;;  %v369_v35 = vmul.f32 %v5566_v54, %v6591_v18  ;;  %v6647_v54 = vadd.f32 %v6617_v36, %v370_v37  ;;  %v5476_v11 = vpack.c.bf16 %v449_v56, %v449_v56  ;;  %v6653_v17 = vpack.c.bf16 %v451_v58, %v451_v58 }
  0x40   : > { %3850 = vmatpush1.bf16.msra.mxu0 %v6046_v38  ;;  %3675 = vmatprep.subr.bf16.mxu1 %v8763_v1  ;;  %v371_v38 = vmul.f32 %v5570_v57, %v6591_v18  ;;  %v450_v57 = vmax.f32 %v409_v47, 0.0  ;;  %v6660_v27 = vpack.c.bf16 %v454_v63, %v454_v63 }
  0x41   : > { %3851 = vmatprep.subr.bf16.mxu0 %v8763_v1  ;;  %v414_v53 = vadd.f32 %v6617_v36, %v369_v35  ;;  %v456_v29 = vmax.f32 %v6647_v54, 0.0  ;;  %634 = vst [vmem:[#allocation2] sm:$0xf] %v5476_v11  ;;  %v675_v30 = vshrl.u32 %v5476_v11, 16  ;;  %636 = vst [vmem:[#allocation2 + $0x48] sm:$0xf] %v6653_v17 }
  0x42   : > { %v6650_v5 = vadd.f32 %v6617_v36, %v371_v38  ;;  %v8788_v35 = vmov 0  ;;  %v694_v37 = vshll.u32 %v6653_v17, 16  ;;  %v8715_v38 = vshrl.u32 %v6653_v17, 16  ;;  %639 = vst [vmem:[#allocation2 + $0xb4] sm:$0xf] %v6660_v27 }
  0x43   : > { %3676 = vmatpush1.bf16.msra.mxu1 %v6047_v44  ;;  %v6635_v44 = vmul.f32 %v5578_v0, %v6591_v18  ;;  %v455_v0 = vmax.f32 %v414_v53, 0.0  ;;  %v8789_v35 = vsel %vm6668_vm6, 4294967295, %v8788_v35  ;;  %1913 = vst [vmem:[#allocation2 + $0x18] sm:$0xf] %v6660_v27  ;;  %v677_v47 = vrot.slane %v675_v30, 4 }
  0x44   : > { %3852 = vmatpush1.bf16.msra.mxu0 %v6048_v50  ;;  %3677 = vmatprep.subr.bf16.mxu1 %v8763_v1  ;;  %v411_v50 = vadd.f32 %v6617_v36, %v366_v32  ;;  %v678_v32 = vshll.u32 %v5476_v11, 16  ;;  %8790 = vst [vmem:[#allocation3_spill] sm:$0xff] %v8789_v35  ;;  %v696_v52 = vrot.slane %v694_v37, 5  ;;  %v700_v53 = vrot.slane %v8715_v38, 4 }
  0x45   : > { %3853 = vmatprep.subr.bf16.mxu0 %v8763_v1  ;;  %v6662_v28 = vpack.c.bf16 %v455_v0, %v455_v0  ;;  %v6682_v56 = vrot.slane %v694_v37, 7  ;;  %v1106_v63 = vrot.slane %v6653_v17, 5  ;;  %v5200_v30 = vrot.slane %v6653_v17, 10 }
  0x46   : > { %v452_v59 = vmax.f32 %v411_v50, 0.0  ;;  %v680_v48 = vrot.slane %v678_v32, 5 }
  0x47   : > { %3678 = vmatpush1.bf16.msra.mxu1 %v6049_v16  ;;  %v5477_v16 = vpack.c.bf16 %v450_v57, %v450_v57  ;;  %640 = vst [vmem:[#allocation2 + $0xd8] sm:$0xf] %v6662_v28  ;;  %1914 = vst [vmem:[#allocation2 + $0x3c] sm:$0xf] %v6662_v28 }
  0x48   : > { %3854 = vmatpush1.bf16.msra.mxu0 %v6050_v22  ;;  %3679 = vmatprep.subr.bf16.mxu1 %v8763_v1  ;;  %v6655_v22 = vpack.c.bf16 %v452_v59, %v452_v59  ;;  %v681_v58 = vor.u32 %v680_v48, %v677_v47 }
  0x49   : > { %3855 = vmatprep.subr.bf16.mxu0 %v8763_v1  ;;  %635 = vst [vmem:[#allocation2 + $0x24] sm:$0xf] %v5477_v16  ;;  %v684_v33 = vshll.u32 %v5477_v16, 16  ;;  %v688_v34 = vshrl.u32 %v5477_v16, 16  ;;  %v1103_v46 = vrot.slane %v5477_v16, 5  ;;  %v701_v16 = vor.u32 %v700_v53, %v696_v52 }
  0x4a   : > { %637 = vst [vmem:[#allocation2 + $0x6c] sm:$0xf] %v6655_v22  ;;  %v1287_v32 = vrot.slane %v6655_v22, 6 }
  0x4b   : > { %3680 = vmatpush1.bf16.msra.mxu1 %v6051_v26  ;;  %v6658_v26 = vpack.c.bf16 %v453_v62, %v453_v62  ;;  %v686_v50 = vrot.slane %v684_v33, 5  ;;  %v690_v51 = vrot.slane %v688_v34, 4  ;;  %v1105_v62 = vrot.slane %v1103_v46, 4 }
  0x4c   : > { %3856 = vmatpush1.bf16.msra.mxu0 %v6052_v40  ;;  %5830 = vmatprep.subr.bf16.mxu1 %v8763_v1  ;;  %v5197_v40 = vrot.slane %v5476_v11, 9  ;;  %v682_v34 = vrot.slane %v681_v58, 4  ;;  %v702_v47 = vrot.slane %v701_v16, 4  ;;  %v1288_v48 = vsel %vm6689_vm7, %v5200_v30, %v1287_v32  ;;  %v4530_v11 = vld [vmem:[%s8712_s4 + $0x8] sm:$0xff] }
  0x4d   : > { %4001 = vmatprep.subr.bf16.mxu0 %v8763_v1  ;;  %638 = vst [vmem:[#allocation2 + $0x90] sm:$0xf] %v6658_v26  ;;  %v691_v59 = vor.u32 %v690_v51, %v686_v50  ;;  %v1290_v33 = vrot.slane %v6658_v26, 6  ;;  %v1289_v51 = vrot.slane %v1287_v32, 4  ;;  %1426 = vst [vmem:[#allocation2 + $0xc] sm:$0xf] %v1288_v48 }
  0x4e   : > { %v1104_v57 = vsel %vm6668_vm6, %v5197_v40, %v1103_v46  ;;  %v1107_v40 = vsel %vm6668_vm6, %v1105_v62, %v1106_v63  ;;  %v1108_v46 = vrot.slane %v1106_v63, 4  ;;  %v687_v53 = vsel %vm6695_vm8, %v682_v34, %v686_v50 }
  0x4f   : > { %1242 = vst [vmem:[#allocation2 + $0x8] sm:$0xf] %v1104_v57  ;;  %v692_v37 = vrot.slane %v691_v59, 4  ;;  %1243 = vst [vmem:[#allocation2 + $0x2c] sm:$0xf] %v1107_v40  ;;  %v1292_v57 = vrot.slane %v1290_v33, 4  ;;  %v1291_v62 = vsel %vm6689_vm7, %v1289_v51, %v1290_v33 }
  0x50   : > { %v8716_v58 = vshll.u32 %v6655_v22, 16  ;;  %v8718_v59 = vshrl.u32 %v6655_v22, 16  ;;  %1063 = vst [vmem:[#allocation2 + $0x4] sm:$0xf] %v687_v53  ;;  %v8717_v63 = vshll.u32 %v6658_v26, 16  ;;  %v1109_v16 = vrot.slane %v6655_v22, 5 }
  0x51   : > { %v697_v38 = vsel %vm6695_vm8, %v692_v37, %v696_v52  ;;  %v1112_v30 = vrot.slane %v6658_v26, 5  ;;  %1427 = vst [vmem:[#allocation2 + $0x30] sm:$0xf] %v1291_v62  ;;  %v1293_v32 = vrot.slane %v6660_v27, 6  ;;  %v8722_v40 = vshrl.u32 %v6658_v26, 16 }
  0x52   : > { %1064 = vst [vmem:[#allocation2 + $0x28] sm:$0xf] %v697_v38  ;;  %v706_v50 = vrot.slane %v8716_v58, 5  ;;  %v710_v52 = vrot.slane %v8718_v59, 4  ;;  %v1296_v38 = vrot.slane %v6662_v28, 6  ;;  %v716_v33 = vrot.slane %v8717_v63, 5 }
  0x53   : > { %v1110_v34 = vsel %vm6668_vm6, %v1108_v46, %v1109_v16  ;;  %v1111_v37 = vrot.slane %v1109_v16, 4  ;;  %v1294_v53 = vsel %vm6689_vm7, %v1292_v57, %v1293_v32  ;;  %v1295_v62 = vrot.slane %v1293_v32, 4 }
  0x54   : > { %v707_v48 = vsel %vm6695_vm8, %v702_v47, %v706_v50  ;;  %v711_v51 = vor.u32 %v710_v52, %v706_v50  ;;  %1244 = vst [vmem:[#allocation2 + $0x50] sm:$0xf] %v1110_v34  ;;  %1428 = vst [vmem:[#allocation2 + $0x54] sm:$0xf] %v1294_v53  ;;  %v720_v46 = vrot.slane %v8722_v40, 4  ;;  %v8719_v16 = vshll.u32 %v6660_v27, 16 }
  0x55   : > { %1065 = vst [vmem:[#allocation2 + $0x4c] sm:$0xf] %v707_v48  ;;  %v1113_v58 = vsel %vm6668_vm6, %v1111_v37, %v1112_v30  ;;  %v8720_v63 = vshrl.u32 %v6660_v27, 16  ;;  %v1297_v47 = vsel %vm6689_vm7, %v1295_v62, %v1296_v38  ;;  %v8721_v57 = vshll.u32 %v6662_v28, 16  ;;  %v6053_v48 = vld [vmem:[#allocation2] ss:$36 sps:$4 sm:$0xff]  }
  0x56   : > { %v712_v59 = vrot.slane %v711_v51, 4  ;;  %1245 = vst [vmem:[#allocation2 + $0x74] sm:$0xf] %v1113_v58  ;;  %v457_v50 = vmax.f32 %v6650_v5, 0.0  ;;  %1429 = vst [vmem:[#allocation2 + $0x78] sm:$0xf] %v1297_v47  ;;  %v721_v52 = vor.u32 %v720_v46, %v716_v33  ;;  %v6749_v37 = vpack.c.bf16 %v456_v29, %v456_v29 }
  0x57   : > { %v726_v32 = vrot.slane %v8719_v16, 5  ;;  %v730_v34 = vrot.slane %v8720_v63, 4  ;;  %v6101_v58 = vld [vmem:[%s8711_s3 + $0x180] sm:$0xff]   ;;  %v6761_v53 = vrot.slane %v8721_v57, 5  ;;  %v1114_v29 = vrot.slane %v1112_v30, 4 }
  0x58   : > { %v6059_v5 = vld [vmem:[%s8711_s3 + $0x100] sm:$0xff]   ;;  %v717_v51 = vsel %vm6695_vm8, %v712_v59, %v716_v33  ;;  %v6763_v54 = vpack.c.bf16 %v457_v50, %v457_v50  ;;  %v6056_v46 = vld [vmem:[#allocation2 + $0x8] ss:$36 sps:$4 sm:$0xff]   ;;  %v722_v47 = vrot.slane %v721_v52, 4  ;;  %641 = vst [vmem:[#allocation2 + $0xfc] sm:$0xf] %v6749_v37  ;;  %v417_v63 = vadd.f32 %v6617_v36, %v6622_v39 }
  0x59   : > { %v6055_v62 = vld [vmem:[#allocation2 + $0x4] ss:$36 sps:$4 sm:$0xff]   ;;  %1066 = vst [vmem:[#allocation2 + $0x70] sm:$0xf] %v717_v51  ;;  %v731_v16 = vor.u32 %v730_v34, %v726_v32  ;;  %1915 = vst [vmem:[#allocation2 + $0x60] sm:$0xf] %v6749_v37  ;;  %v6771_v59 = vadd.f32 %v6617_v36, %v6629_v41 }
  0x5a   : > { %v6058_v33 = vld [vmem:[#allocation2 + $0xc] ss:$36 sps:$4 sm:$0xff]   ;;  %v1115_v50 = vrot.slane %v6660_v27, 5  ;;  %v1118_v30 = vrot.slane %v6662_v28, 5  ;;  %v1298_v57 = vrot.slane %v1296_v38, 4  ;;  %v1299_v52 = vrot.slane %v6749_v37, 6  ;;  %3681 = vmatprep.mubr.bf16.mxu1 %v6055_v62 }
  0x5b   : > { %642 = vst [vmem:[#allocation2 + $0x120] sm:$0xf] %v6763_v54  ;;  %1916 = vst [vmem:[#allocation2 + $0x84] sm:$0xf] %v6763_v54  ;;  %v727_v39 = vsel %vm6695_vm8, %v722_v47, %v726_v32  ;;  %v732_v34 = vrot.slane %v731_v16, 4  ;;  %v1302_v41 = vrot.slane %v6763_v54, 6  ;;  %3857 = vmatprep.mubr.bf16.mxu0 %v6058_v33  ;;  %3682 = vmatmul.mubr.bf16.vlgmr.msra.gmra.mrb[0].mxu1 %v6053_v48 }
  0x5c   : > { %v8723_v51 = vshrl.u32 %v6662_v28, 16  ;;  %v6065_v38 = vld [vmem:[%s8711_s3 + $0x108] sm:$0xff]   ;;  %1067 = vst [vmem:[#allocation2 + $0x94] sm:$0xf] %v727_v39  ;;  %v1116_v40 = vsel %vm6668_vm6, %v1114_v29, %v1115_v50  ;;  %v1117_v45 = vrot.slane %v1115_v50, 4  ;;  %v1300_v62 = vsel %vm6689_vm7, %v1298_v57, %v1299_v52  ;;  %3858 = vmatmul.mubr.bf16.vlgmr.msra.gmra.mrb[0].mxu0 %v6056_v46  ;;  %5846 = vmatpush1.bf16.msra.mxu1 %v6101_v58 }
  0x5d   : > { %v1301_v32 = vrot.slane %v1299_v52, 4  ;;  %v737_v16 = vsel %vm6695_vm8, %v732_v34, %v6761_v53  ;;  %1246 = vst [vmem:[#allocation2 + $0x98] sm:$0xf] %v1116_v40  ;;  %1430 = vst [vmem:[#allocation2 + $0x9c] sm:$0xf] %v1300_v62  ;;  %v8724_v47 = vshll.u32 %v6749_v37, 16  ;;  %4002 = vmatpush1.bf16.msra.mxu0 %v6059_v5  ;;  %v6806_v58 = vadd.f32 %v6617_v36, %v6632_v42 }
  0x5e   : > { %v740_v48 = vrot.slane %v8723_v51, 4  ;;  %v8776_v33 = vshrl.u32 %v6749_v37, 16  ;;  %v6108_v57 = vld [vmem:[%s8711_s3 + $0x188] sm:$0xff]   ;;  %v6062_v46 = vld [vmem:[#allocation2 + $0x54] ss:$36 sps:$4 sm:$0xff]   ;;  %v1119_v40 = vsel %vm6668_vm6, %v1117_v45, %v1118_v30  ;;  %v8725_v52 = vshll.u32 %v6763_v54, 16  ;;  %5831 = vmatprep.subr.bf16.mxu1 %v8763_v1  ;;  %4003 = vmatprep.subr.bf16.mxu0 %v8763_v1 }
  0x5f   : > { %v2094_v29 = vld [vmem:[#allocation2 + $0x48] sm:$0xff]  ;;  %1068 = vst [vmem:[#allocation2 + $0xb8] sm:$0xf] %v737_v16  ;;  %1994 = vst [vmem:[#allocation2 + $0x1c] sm:$0xf] %v737_v16  ;;  %v1303_v50 = vsel %vm6689_vm7, %v1301_v32, %v1302_v41  ;;  %v746_v45 = vrot.slane %v8724_v47, 5  ;;  %3865 = vmatprep.mubr.bf16.mxu0 %v6062_v46 }
  0x60   : > { %v6064_v39 = vld [vmem:[#allocation2 + $0x50] ss:$36 sps:$4 sm:$0xff]   ;;  %1247 = vst [vmem:[#allocation2 + $0xbc] sm:$0xf] %v1119_v40  ;;  %1431 = vst [vmem:[#allocation2 + $0xc0] sm:$0xf] %v1303_v50  ;;  %v741_v5 = vor.u32 %v740_v48, %v6761_v53  ;;  %v6822_v53 = vadd.f32 %v6617_v36, %v6635_v44  ;;  %5847 = vmatpush1.bf16.msra.mxu1 %v6108_v57 }
  0x61   : > { %2049 = vst [vmem:[#allocation2 + $0x20] sm:$0xf] %v1119_v40  ;;  %v750_v34 = vrot.slane %v8776_v33, 4  ;;  %v458_v62 = vmax.f32 %v417_v63, 0.0  ;;  %v2099_v32 = vld [vmem:[#allocation2 + $0x6c] sm:$0xff]  ;;  %v6817_v16 = vrot.slane %v8725_v52, 5  ;;  %4004 = vmatpush1.bf16.msra.mxu0 %v6065_v38  ;;  %5832 = vmatprep.subr.bf16.mxu1 %v8763_v1 }
  0x62   : > { %v6060_v42 = vld [vmem:[#allocation2 + $0x4c] ss:$36 sps:$4 sm:$0xff]   ;;  %v459_v51 = vmax.f32 %v6771_v59, 0.0  ;;  %v1120_v50 = vrot.slane %v1118_v30, 4  ;;  %v5214_v48 = vcombine.low %v2094_v29, %v2099_v32  ;;  %v742_v40 = vrot.slane %v741_v5, 4  ;;  %4005 = vmatprep.subr.bf16.mxu0 %v8763_v1 }
  0x63   : > { %v751_v47 = vor.u32 %v750_v34, %v746_v45  ;;  %v6824_v25 = vpack.c.bf16 %v458_v62, %v458_v62  ;;  %v6115_v63 = vld [vmem:[%s8711_s3 + $0x190] sm:$0xff]   ;;  %3689 = vmatprep.mubr.bf16.mxu1 %v6060_v42  ;;  %v1121_v44 = vrot.slane %v6749_v37, 5  ;;  %v1124_v29 = vrot.slane %v6763_v54, 5 }
  0x64   : > { %v6071_v59 = vld [vmem:[%s8711_s3 + $0x110] sm:$0xff]   ;;  %v6832_v30 = vpack.c.bf16 %v459_v51, %v459_v51  ;;  %v1304_v46 = vrot.slane %v1302_v41, 4  ;;  %v747_v57 = vsel %vm6695_vm8, %v742_v40, %v746_v45  ;;  %v8768_v51 = vshrl.u32 %v6763_v54, 16  ;;  %3690 = vmatmul.mubr.bf16.gmra.mrb[4].mxu1 %v5214_v48  ;;  %3866 = vmatmul.mubr.bf16.gmra.mrb[4].mxu0 %v6064_v39  ;;  %v6122_v39 = vld [vmem:[%s8711_s3 + $0x198] sm:$0xff]  }
  0x65   : > { %v6836_v5 = vld [vmem:[#allocation2 + $0x90] sm:$0xff]  ;;  %v752_v34 = vrot.slane %v751_v47, 4  ;;  %v1305_v38 = vrot.slane %v6824_v25, 6  ;;  %643 = vst [vmem:[#allocation2 + $0x144] sm:$0xf] %v6824_v25  ;;  %v1122_v41 = vsel %vm6668_vm6, %v1120_v50, %v1121_v44  ;;  %v1123_v62 = vrot.slane %v1121_v44, 4  ;;  %5848 = vmatpush1.bf16.msra.mxu1 %v6115_v63  ;;  %4006 = vmatpush1.bf16.msra.mxu0 %v6071_v59 }
  0x66   : > { %1917 = vst [vmem:[#allocation2 + $0xa8] sm:$0xf] %v6824_v25  ;;  %1069 = vst [vmem:[#allocation2 + $0xdc] sm:$0xf] %v747_v57  ;;  %v1308_v45 = vrot.slane %v6832_v30, 6  ;;  %v8727_v47 = vshll.u32 %v6824_v25, 16  ;;  %5833 = vmatprep.subr.bf16.mxu1 %v8763_v1  ;;  %4007 = vmatprep.subr.bf16.mxu0 %v8763_v1 }
  0x67   : > { %1995 = vst [vmem:[#allocation2 + $0x40] sm:$0xf] %v747_v57  ;;  %644 = vst [vmem:[#allocation2 + $0x168] sm:$0xf] %v6832_v30  ;;  %v2109_v32 = vld [vmem:[#allocation2 + $0xb4] sm:$0xff]  ;;  %v757_v48 = vsel %vm6695_vm8, %v752_v34, %v6817_v16  ;;  %v1306_v50 = vsel %vm6689_vm7, %v1304_v46, %v1305_v38  ;;  %v1307_v40 = vrot.slane %v1305_v38, 4  ;;  %v1125_v34 = vsel %vm6668_vm6, %v1123_v62, %v1124_v29 }
  0x68   : > { %1918 = vst [vmem:[#allocation2 + $0xcc] sm:$0xf] %v6832_v30  ;;  %v6066_v42 = vld [vmem:[#allocation2 + $0x94] ss:$36 sps:$4 sm:$0xff]   ;;  %1248 = vst [vmem:[#allocation2 + $0xe0] sm:$0xf] %v1122_v41  ;;  %v5223_v52 = vcombine.low %v6836_v5, %v2109_v32  ;;  %v376_v38 = vmul.f32 %v5579_v2, %v6591_v18 }
  0x69   : > { %2050 = vst [vmem:[#allocation2 + $0x44] sm:$0xf] %v1122_v41  ;;  %v760_v44 = vrot.slane %v8768_v51, 4  ;;  %v6068_v57 = vld [vmem:[#allocation2 + $0x9c] ss:$36 sps:$4 sm:$0xff]   ;;  %v766_v63 = vrot.slane %v8727_v47, 5  ;;  %3697 = vmatprep.mubr.bf16.mxu1 %v6066_v42  ;;  %v1309_v5 = vsel %vm6689_vm7, %v1307_v40, %v1308_v45  ;;  %5849 = vmatpush1.bf16.msra.mxu1 %v6122_v39 }
  0x6a   : > { %1070 = vst [vmem:[#allocation2 + $0x100] sm:$0xf] %v757_v48  ;;  %1996 = vst [vmem:[#allocation2 + $0x64] sm:$0xf] %v757_v48  ;;  %v6077_v46 = vld [vmem:[%s8711_s3 + $0x118] sm:$0xff]   ;;  %v8728_v62 = vshrl.u32 %v6824_v25, 16  ;;  %3873 = vmatprep.mubr.bf16.mxu0 %v6068_v57  ;;  %5834 = vmatprep.subr.bf16.mxu1 %v8763_v1 }
  0x6b   : > { %1432 = vst [vmem:[#allocation2 + $0xe4] sm:$0xf] %v1306_v50  ;;  %v6070_v59 = vld [vmem:[#allocation2 + $0x98] ss:$36 sps:$4 sm:$0xff]   ;;  %1249 = vst [vmem:[#allocation2 + $0x104] sm:$0xf] %v1125_v34  ;;  %v761_v41 = vor.u32 %v760_v44, %v6817_v16  ;;  %4008 = vmatpush1.bf16.msra.mxu0 %v6077_v46 }
  0x6c   : > { %2051 = vst [vmem:[#allocation2 + $0x68] sm:$0xf] %v1125_v34  ;;  %v8726_v32 = vshll.u32 %v6832_v30, 16  ;;  %1433 = vst [vmem:[#allocation2 + $0x108] sm:$0xf] %v1309_v5  ;;  %v460_v43 = vmax.f32 %v6806_v58, 0.0  ;;  %4009 = vmatprep.subr.bf16.mxu0 %v8763_v1  ;;  %3698 = vmatmul.mubr.bf16.gmra.mrb[8].mxu1 %v5223_v52 }
  0x6d   : > { %v461_v2 = vmax.f32 %v6822_v53, 0.0  ;;  %v1126_v42 = vrot.slane %v1124_v29, 4  ;;  %v1127_v48 = vrot.slane %v6824_v25, 5  ;;  %v762_v50 = vrot.slane %v761_v41, 4  ;;  %v6129_v58 = vld [vmem:[%s8711_s3 + $0x1a0] sm:$0xff]   ;;  %v6903_v39 = vld [vmem:[#allocation2 + $0xd8] sm:$0xff]  ;;  %3874 = vmatmul.mubr.bf16.gmra.mrb[8].mxu0 %v6070_v59 }
  0x6e   : > { %v770_v40 = vrot.slane %v8728_v62, 4  ;;  %v6887_v16 = vrot.slane %v8726_v32, 5  ;;  %v1130_v44 = vrot.slane %v6832_v30, 5  ;;  %v6893_v53 = vpack.c.bf16 %v460_v43, %v460_v43  ;;  %v6083_v5 = vld [vmem:[%s8711_s3 + $0x120] sm:$0xff]   ;;  %v6136_v52 = vld [vmem:[%s8711_s3 + $0x1a8] sm:$0xff]   ;;  %5850 = vmatpush1.bf16.msra.mxu1 %v6129_v58 }
  0x6f   : > { %v6895_v29 = vpack.c.bf16 %v461_v2, %v461_v2  ;;  %v1128_v57 = vsel %vm6668_vm6, %v1126_v42, %v1127_v48  ;;  %v1129_v34 = vrot.slane %v1127_v48, 4  ;;  %v767_v41 = vsel %vm6695_vm8, %v762_v50, %v766_v63  ;;  %4010 = vmatpush1.bf16.msra.mxu0 %v6083_v5  ;;  %5835 = vmatprep.subr.bf16.mxu1 %v8763_v1 }
  0x70   : > { %v771_v46 = vor.u32 %v770_v40, %v766_v63  ;;  %1250 = vst [vmem:[#allocation2 + $0x128] sm:$0xf] %v1128_v57  ;;  %v1310_v43 = vrot.slane %v1308_v45, 4  ;;  %2052 = vst [vmem:[#allocation2 + $0x8c] sm:$0xf] %v1128_v57  ;;  %v8733_v2 = vshrl.u32 %v6832_v30, 16  ;;  %4011 = vmatprep.subr.bf16.mxu0 %v8763_v1 }
  0x71   : > { %1071 = vst [vmem:[#allocation2 + $0x124] sm:$0xf] %v767_v41  ;;  %1997 = vst [vmem:[#allocation2 + $0x88] sm:$0xf] %v767_v41  ;;  %v1131_v42 = vsel %vm6668_vm6, %v1129_v34, %v1130_v44  ;;  %v1311_v48 = vrot.slane %v6893_v53, 6  ;;  %v1314_v32 = vrot.slane %v6895_v29, 6  ;;  %v377_v34 = vmul.f32 %v5582_v3, %v6591_v18 }
  0x72   : > { %645 = vst [vmem:[#allocation2 + $0x18c] sm:$0xf] %v6893_v53  ;;  %646 = vst [vmem:[#allocation2 + $0x1b0] sm:$0xf] %v6895_v29  ;;  %v8729_v45 = vshll.u32 %v6893_v53, 16  ;;  %v2119_v63 = vld [vmem:[#allocation2 + $0xfc] sm:$0xff]  ;;  %v421_v41 = vadd.f32 %v6617_v36, %v376_v38  ;;  %5851 = vmatpush1.bf16.msra.mxu1 %v6136_v52 }
  0x73   : > { %1919 = vst [vmem:[#allocation2 + $0xf0] sm:$0xf] %v6893_v53  ;;  %1920 = vst [vmem:[#allocation2 + $0x114] sm:$0xf] %v6895_v29  ;;  %v6072_v50 = vld [vmem:[#allocation2 + $0xdc] ss:$36 sps:$4 sm:$0xff]   ;;  %v5232_v47 = vcombine.low %v6903_v39, %v2119_v63  ;;  %v1312_v59 = vsel %vm6689_vm7, %v1310_v43, %v1311_v48  ;;  %v422_v39 = vadd.f32 %v6617_v36, %v377_v34  ;;  %5836 = vmatprep.subr.bf16.mxu1 %v8763_v1 }
  0x74   : > { %v772_v40 = vrot.slane %v771_v46, 4  ;;  %1251 = vst [vmem:[#allocation2 + $0x14c] sm:$0xf] %v1131_v42  ;;  %2053 = vst [vmem:[#allocation2 + $0xb0] sm:$0xf] %v1131_v42  ;;  %v780_v57 = vrot.slane %v8733_v2, 4  ;;  %3705 = vmatprep.mubr.bf16.mxu1 %v6072_v50 }
  0x75   : > { %v1313_v62 = vrot.slane %v1311_v48, 4  ;;  %v786_v46 = vrot.slane %v8729_v45, 5  ;;  %v6089_v42 = vld [vmem:[%s8711_s3 + $0x128] sm:$0xff]   ;;  %1434 = vst [vmem:[#allocation2 + $0x12c] sm:$0xf] %v1312_v59  ;;  %v8731_v5 = vshrl.u32 %v6893_v53, 16  ;;  %3706 = vmatmul.mubr.bf16.gmra.mrb[12].mxu1 %v5232_v47 }
  0x76   : > { %v6074_v3 = vld [vmem:[#allocation2 + $0xe4] ss:$36 sps:$4 sm:$0xff]   ;;  %v777_v38 = vsel %vm6695_vm8, %v772_v40, %v6887_v16  ;;  %v781_v58 = vor.u32 %v780_v57, %v6887_v16  ;;  %v8730_v48 = vshll.u32 %v6895_v29, 16  ;;  %v462_v63 = vmax.f32 %v421_v41, 0.0  ;;  %v6142_v40 = vld [vmem:[%s8711_s3 + $0x1b0] sm:$0xff]   ;;  %4012 = vmatpush1.bf16.msra.mxu0 %v6089_v42 }
  0x77   : > { %1072 = vst [vmem:[#allocation2 + $0x148] sm:$0xf] %v777_v38  ;;  %1998 = vst [vmem:[#allocation2 + $0xac] sm:$0xf] %v777_v38  ;;  %v1315_v43 = vsel %vm6689_vm7, %v1313_v62, %v1314_v32  ;;  %v1132_v50 = vrot.slane %v1130_v44, 4  ;;  %3881 = vmatprep.mubr.bf16.mxu0 %v6074_v3  ;;  %v790_v34 = vrot.slane %v8731_v5, 4  ;;  %4013 = vmatprep.subr.bf16.mxu0 %v8763_v1 }
  0x78   : > { %v6076_v16 = vld [vmem:[#allocation2 + $0xe0] ss:$36 sps:$4 sm:$0xff]   ;;  %1435 = vst [vmem:[#allocation2 + $0x150] sm:$0xf] %v1315_v43  ;;  %v782_v57 = vrot.slane %v781_v58, 4  ;;  %v463_v59 = vmax.f32 %v422_v39, 0.0  ;;  %v6956_v44 = vpack.c.bf16 %v462_v63, %v462_v63  ;;  %5852 = vmatpush1.bf16.msra.mxu1 %v6142_v40 }
  0x79   : > { %v1133_v38 = vrot.slane %v6893_v53, 5  ;;  %v6954_v62 = vrot.slane %v8730_v48, 5  ;;  %v1136_v41 = vrot.slane %v6895_v29, 5  ;;  %v1316_v45 = vrot.slane %v1314_v32, 4  ;;  %v6099_v3 = vld [vmem:[%s8711_s3 + $0x130] sm:$0xff]   ;;  %3882 = vmatmul.mubr.bf16.gmra.mrb[12].mxu0 %v6076_v16  ;;  %v6107_v48 = vld [vmem:[%s8711_s3 + $0x138] sm:$0xff]   ;;  %5837 = vmatprep.subr.bf16.mxu1 %v8763_v1 }
  0x7a   : > { %v787_v58 = vsel %vm6695_vm8, %v782_v57, %v786_v46  ;;  %v791_v52 = vor.u32 %v790_v34, %v786_v46  ;;  %v6965_v39 = vpack.c.bf16 %v463_v59, %v463_v59  ;;  %v1317_v42 = vrot.slane %v6956_v44, 6  ;;  %647 = vst [vmem:[#allocation2 + $0x1d4] sm:$0xf] %v6956_v44  ;;  %1921 = vst [vmem:[#allocation2 + $0x138] sm:$0xf] %v6956_v44 }
  0x7b   : > { %v1134_v43 = vsel %vm6668_vm6, %v1132_v50, %v1133_v38  ;;  %1073 = vst [vmem:[#allocation2 + $0x16c] sm:$0xf] %v787_v58  ;;  %1999 = vst [vmem:[#allocation2 + $0xd0] sm:$0xf] %v787_v58  ;;  %v1135_v32 = vrot.slane %v1133_v38, 4  ;;  %v8732_v46 = vshrl.u32 %v6895_v29, 16  ;;  %4014 = vmatpush1.bf16.msra.mxu0 %v6099_v3 }
  0x7c   : > { %1252 = vst [vmem:[#allocation2 + $0x170] sm:$0xf] %v1134_v43  ;;  %2054 = vst [vmem:[#allocation2 + $0xd4] sm:$0xf] %v1134_v43  ;;  %v8734_v63 = vshll.u32 %v6956_v44, 16  ;;  %v2124_v50 = vld [vmem:[#allocation2 + $0x120] sm:$0xff]  ;;  %v1318_v58 = vsel %vm6689_vm7, %v1316_v45, %v1317_v42  ;;  %4015 = vmatprep.subr.bf16.mxu0 %v8763_v1 }
  0x7d   : > { %v792_v57 = vrot.slane %v791_v52, 4  ;;  %v1320_v47 = vrot.slane %v6965_v39, 6  ;;  %648 = vst [vmem:[#allocation2 + $0x1f8] sm:$0xf] %v6965_v39  ;;  %1922 = vst [vmem:[#allocation2 + $0x15c] sm:$0xf] %v6965_v39  ;;  %v1137_v16 = vsel %vm6668_vm6, %v1135_v32, %v1136_v41 }
  0x7e   : > { %v8736_v34 = vshrl.u32 %v6956_v44, 16  ;;  %v8735_v59 = vshll.u32 %v6965_v39, 16  ;;  %v6144_v38 = vld [vmem:[%s8711_s3 + $0x1b8] sm:$0xff]   ;;  %v1319_v52 = vrot.slane %v1317_v42, 4  ;;  %v800_v43 = vrot.slane %v8732_v46, 4  ;;  %v2129_v40 = vld [vmem:[#allocation2 + $0x144] sm:$0xff] }
  0x7f   : > { %v6078_v5 = vld [vmem:[#allocation2 + $0x124] ss:$36 sps:$4 sm:$0xff]   ;;  %v797_v32 = vsel %vm6695_vm8, %v792_v57, %v6954_v62  ;;  %1253 = vst [vmem:[#allocation2 + $0x194] sm:$0xf] %v1137_v16  ;;  %1436 = vst [vmem:[#allocation2 + $0x174] sm:$0xf] %v1318_v58  ;;  %v5241_v2 = vcombine.low %v2124_v50, %v2129_v40  ;;  %v378_v58 = vmul.f32 %v5583_v6, %v6591_v18  ;;  %5853 = vmatpush1.bf16.msra.mxu1 %v6144_v38 }
  0x80   : > { %2055 = vst [vmem:[#allocation2 + $0xf8] sm:$0xf] %v1137_v16  ;;  %v806_v45 = vrot.slane %v8734_v63, 5  ;;  %v810_v3 = vrot.slane %v8736_v34, 4  ;;  %v7002_v42 = vrot.slane %v8735_v59, 5  ;;  %v1321_v57 = vsel %vm6689_vm7, %v1319_v52, %v1320_v47  ;;  %3713 = vmatprep.mubr.bf16.mxu1 %v6078_v5  ;;  %4016 = vmatpush1.bf16.msra.mxu0 %v6107_v48 }
  0x81   : > { %v6080_v46 = vld [vmem:[#allocation2 + $0x12c] ss:$36 sps:$4 sm:$0xff]   ;;  %1074 = vst [vmem:[#allocation2 + $0x190] sm:$0xf] %v797_v32  ;;  %2000 = vst [vmem:[#allocation2 + $0xf4] sm:$0xf] %v797_v32  ;;  %v801_v16 = vor.u32 %v800_v43, %v6954_v62  ;;  %v379_v34 = vmul.f32 %v5586_v7, %v6591_v18  ;;  %v423_v49 = vadd.f32 %v6617_v36, %v378_v58  ;;  %4017 = vmatprep.subr.bf16.mxu0 %v8763_v1 }
  0x82   : > { %v6082_v63 = vld [vmem:[#allocation2 + $0x128] ss:$36 sps:$4 sm:$0xff]   ;;  %1437 = vst [vmem:[#allocation2 + $0x198] sm:$0xf] %v1321_v57  ;;  %v811_v59 = vor.u32 %v810_v3, %v806_v45  ;;  %v1138_v50 = vrot.slane %v1136_v41, 4  ;;  %v1139_v40 = vrot.slane %v6956_v44, 5  ;;  %3889 = vmatprep.mubr.bf16.mxu0 %v6080_v46  ;;  %5838 = vmatprep.subr.bf16.mxu1 %v8763_v1  ;;  %v381_v57 = vmul.f32 %v5590_v12, %v6591_v18 }
  0x83   : > { %v6150_v62 = vld [vmem:[%s8711_s3 + $0x1c0] sm:$0xff]   ;;  %v802_v52 = vrot.slane %v801_v16, 4  ;;  %v1142_v6 = vrot.slane %v6965_v39, 5  ;;  %v7020_v5 = vrot.slane %v1320_v47, 4  ;;  %v424_v38 = vadd.f32 %v6617_v36, %v379_v34  ;;  %3714 = vmatmul.mubr.bf16.gmra.mrb[16].mxu1 %v5241_v2  ;;  %3890 = vmatmul.mubr.bf16.gmra.mrb[16].mxu0 %v6082_v63  ;;  %v6121_v12 = vld [vmem:[%s8711_s3 + $0x148] sm:$0xff]  }
  0x84   : > { %v6114_v7 = vld [vmem:[%s8711_s3 + $0x140] sm:$0xff]   ;;  %v812_v41 = vrot.slane %v811_v59, 4  ;;  %v1140_v43 = vsel %vm6668_vm6, %v1138_v50, %v1139_v40  ;;  %v1141_v32 = vrot.slane %v1139_v40, 4  ;;  %v464_v48 = vmax.f32 %v423_v49, 0.0  ;;  %v2134_v59 = vld [vmem:[#allocation2 + $0x168] sm:$0xff]  ;;  %5854 = vmatpush1.bf16.msra.mxu1 %v6150_v62 }
  0x85   : > { %v807_v46 = vsel %vm6695_vm8, %v802_v52, %v806_v45  ;;  %1254 = vst [vmem:[#allocation2 + $0x1b8] sm:$0xf] %v1140_v43  ;;  %2056 = vst [vmem:[#allocation2 + $0x11c] sm:$0xf] %v1140_v43  ;;  %v8767_v47 = vshrl.u32 %v6965_v39, 16  ;;  %v380_v34 = vmul.f32 %v5587_v8, %v6591_v18  ;;  %v465_v2 = vmax.f32 %v424_v38, 0.0  ;;  %4018 = vmatpush1.bf16.msra.mxu0 %v6114_v7 }
  0x86   : > { %v817_v3 = vsel %vm6695_vm8, %v812_v41, %v7002_v42  ;;  %1075 = vst [vmem:[#allocation2 + $0x1b4] sm:$0xf] %v807_v46  ;;  %2001 = vst [vmem:[#allocation2 + $0x118] sm:$0xf] %v807_v46  ;;  %v1143_v45 = vsel %vm6668_vm6, %v1141_v32, %v1142_v6  ;;  %v7047_v8 = vpack.c.bf16 %v464_v48, %v464_v48  ;;  %v1144_v58 = vrot.slane %v1142_v6, 4 }
  0x87   : > { %1076 = vst [vmem:[#allocation2 + $0x1d8] sm:$0xf] %v817_v3  ;;  %2002 = vst [vmem:[#allocation2 + $0x13c] sm:$0xf] %v817_v3  ;;  %v820_v63 = vrot.slane %v8767_v47, 4  ;;  %v425_v16 = vadd.f32 %v6617_v36, %v380_v34  ;;  %5839 = vmatprep.subr.bf16.mxu1 %v8763_v1  ;;  %v7056_v62 = vpack.c.bf16 %v465_v2, %v465_v2  ;;  %4019 = vmatprep.subr.bf16.mxu0 %v8763_v1  ;;  %v6128_v3 = vld [vmem:[%s8711_s3 + $0x150] sm:$0xff]  }
  0x88   : > { %1255 = vst [vmem:[#allocation2 + $0x1dc] sm:$0xf] %v1143_v45  ;;  %2057 = vst [vmem:[#allocation2 + $0x140] sm:$0xf] %v1143_v45  ;;  %v2139_v50 = vld [vmem:[#allocation2 + $0x18c] sm:$0xff]  ;;  %v426_v52 = vadd.f32 %v6617_v36, %v381_v57  ;;  %v7062_v49 = vmul.f32 %v5591_v13, %v6591_v18  ;;  %v7067_v6 = vmul.f32 %v5594_v14, %v6591_v18  ;;  %v1323_v38 = vrot.slane %v7047_v8, 6 }
  0x89   : > { %v6084_v40 = vld [vmem:[#allocation2 + $0x16c] ss:$36 sps:$4 sm:$0xff]   ;;  %v6086_v7 = vld [vmem:[#allocation2 + $0x174] ss:$36 sps:$4 sm:$0xff]   ;;  %v5250_v41 = vcombine.low %v2134_v59, %v2139_v50  ;;  %649 = vst [vmem:[#allocation2 + $0x21c] sm:$0xf] %v7047_v8  ;;  %v821_v43 = vor.u32 %v820_v63, %v7002_v42  ;;  %5855 = vmatpush1.bf16.msra.mxu1 %v6151_v55  ;;  %4020 = vmatpush1.bf16.msra.mxu0 %v6121_v12 }
  0x8a   : > { %1923 = vst [vmem:[#allocation2 + $0x180] sm:$0xf] %v7047_v8  ;;  %v6158_v13 = vld [vmem:[%s8711_s3 + $0x1d0] sm:$0xff]   ;;  %3721 = vmatprep.mubr.bf16.mxu1 %v6084_v40  ;;  %v1326_v32 = vrot.slane %v7056_v62, 6  ;;  %650 = vst [vmem:[#allocation2 + $0x240] sm:$0xf] %v7056_v62  ;;  %3897 = vmatprep.mubr.bf16.mxu0 %v6086_v7  ;;  %v1324_v15 = vsel %vm6689_vm7, %v7020_v5, %v1323_v38 }
  0x8b   : > { %v6088_v14 = vld [vmem:[#allocation2 + $0x170] ss:$36 sps:$4 sm:$0xff]   ;;  %1924 = vst [vmem:[#allocation2 + $0x1a4] sm:$0xf] %v7056_v62  ;;  %v8765_v46 = vshll.u32 %v7047_v8, 16  ;;  %v8766_v42 = vshrl.u32 %v7047_v8, 16  ;;  %4021 = vmatprep.subr.bf16.mxu0 %v8763_v1  ;;  %5840 = vmatprep.subr.bf16.mxu1 %v8763_v1 }
  0x8c   : > { %v8737_v61 = vshll.u32 %v7056_v62, 16  ;;  %v1325_v48 = vrot.slane %v1323_v38, 4  ;;  %v822_v34 = vrot.slane %v821_v43, 4  ;;  %v466_v59 = vmax.f32 %v425_v16, 0.0  ;;  %1438 = vst [vmem:[#allocation2 + $0x1bc] sm:$0xf] %v1324_v15  ;;  %3722 = vmatmul.mubr.bf16.gmra.mrb[20].mxu1 %v5250_v41  ;;  %3898 = vmatmul.mubr.bf16.gmra.mrb[20].mxu0 %v6088_v14 }
  0x8d   : > { %v826_v2 = vrot.slane %v8765_v46, 5  ;;  %v830_v45 = vrot.slane %v8766_v42, 4  ;;  %v467_v5 = vmax.f32 %v426_v52, 0.0  ;;  %v7104_v55 = vld [vmem:[#allocation2 + $0x1b0] sm:$0xff]  ;;  %v1145_v12 = vrot.slane %v7047_v8, 5  ;;  %v6159_v40 = vld [vmem:[%s8711_s3 + $0x1d8] sm:$0xff]   ;;  %5856 = vmatpush1.bf16.msra.mxu1 %v6158_v13  ;;  %4022 = vmatpush1.bf16.msra.mxu0 %v6128_v3 }
  0x8e   : > { %v7100_v57 = vrot.slane %v8737_v61, 5  ;;  %v1327_v63 = vsel %vm6689_vm7, %v1325_v48, %v1326_v32  ;;  %v7108_v16 = vpack.c.bf16 %v466_v59, %v466_v59  ;;  %v1148_v50 = vrot.slane %v7056_v62, 5  ;;  %v2149_v52 = vld [vmem:[#allocation2 + $0x1d4] sm:$0xff]  ;;  %5841 = vmatprep.subr.bf16.mxu1 %v8763_v1  ;;  %4023 = vmatprep.subr.bf16.mxu0 %v8763_v1 }
  0x8f   : > { %v6090_v7 = vld [vmem:[#allocation2 + $0x1b4] ss:$36 sps:$4 sm:$0xff]   ;;  %1439 = vst [vmem:[#allocation2 + $0x1e0] sm:$0xf] %v1327_v63  ;;  %v827_v41 = vsel %vm6695_vm8, %v822_v34, %v826_v2  ;;  %v831_v38 = vor.u32 %v830_v45, %v826_v2  ;;  %v7117_v43 = vpack.c.bf16 %v467_v5, %v467_v5  ;;  %v1328_v15 = vrot.slane %v1326_v32, 4 }
  0x90   : > { %v5259_v48 = vcombine.low %v7104_v55, %v2149_v52  ;;  %1077 = vst [vmem:[#allocation2 + $0x1fc] sm:$0xf] %v827_v41  ;;  %2003 = vst [vmem:[#allocation2 + $0x160] sm:$0xf] %v827_v41  ;;  %v1146_v59 = vsel %vm6668_vm6, %v1144_v58, %v1145_v12  ;;  %v1147_v61 = vrot.slane %v1145_v12, 4  ;;  %v1329_v14 = vrot.slane %v7108_v16, 6  ;;  %3729 = vmatprep.mubr.bf16.mxu1 %v6090_v7 }
  0x91   : > { %651 = vst [vmem:[#allocation2 + $0x264] sm:$0xf] %v7108_v16  ;;  %1925 = vst [vmem:[#allocation2 + $0x1c8] sm:$0xf] %v7108_v16  ;;  %v6135_v32 = vld [vmem:[%s8711_s3 + $0x158] sm:$0xff]   ;;  %v832_v13 = vrot.slane %v831_v38, 4  ;;  %5857 = vmatpush1.bf16.msra.mxu1 %v6159_v40 }
  0x92   : > { %1256 = vst [vmem:[#allocation2 + $0x200] sm:$0xf] %v1146_v59  ;;  %v1332_v34 = vrot.slane %v7117_v43, 6  ;;  %652 = vst [vmem:[#allocation2 + $0x288] sm:$0xf] %v7117_v43  ;;  %v8762_v58 = vshrl.u32 %v7056_v62, 16  ;;  %v1149_v2 = vsel %vm6668_vm6, %v1147_v61, %v1148_v50  ;;  %v1330_v45 = vsel %vm6689_vm7, %v1328_v15, %v1329_v14  ;;  %4024 = vmatpush1.bf16.msra.mxu0 %v6135_v32 }
  0x93   : > { %1926 = vst [vmem:[#allocation2 + $0x1ec] sm:$0xf] %v7117_v43  ;;  %2058 = vst [vmem:[#allocation2 + $0x164] sm:$0xf] %v1146_v59  ;;  %v8739_v3 = vshll.u32 %v7108_v16, 16  ;;  %v1331_v5 = vrot.slane %v1329_v14, 4  ;;  %v837_v63 = vsel %vm6695_vm8, %v832_v13, %v7100_v57  ;;  %v427_v15 = vadd.f32 %v6617_v36, %v7062_v49  ;;  %5842 = vmatprep.subr.bf16.mxu1 %v8763_v1 }
  0x94   : > { %v8760_v55 = vshrl.u32 %v7108_v16, 16  ;;  %1257 = vst [vmem:[#allocation2 + $0x224] sm:$0xf] %v1149_v2  ;;  %1440 = vst [vmem:[#allocation2 + $0x204] sm:$0xf] %v1330_v45  ;;  %v840_v12 = vrot.slane %v8762_v58, 4  ;;  %v428_v59 = vadd.f32 %v6617_v36, %v7067_v6  ;;  %4025 = vmatprep.subr.bf16.mxu0 %v8763_v1  ;;  %3730 = vmatmul.mubr.bf16.gmra.mrb[24].mxu1 %v5259_v48 }
  0x95   : > { %2059 = vst [vmem:[#allocation2 + $0x188] sm:$0xf] %v1149_v2  ;;  %v846_v52 = vrot.slane %v8739_v3, 5  ;;  %v8738_v61 = vshll.u32 %v7117_v43, 16  ;;  %v6166_v7 = vld [vmem:[%s8711_s3 + $0x1e0] sm:$0xff]   ;;  %v1333_v41 = vsel %vm6689_vm7, %v1331_v5, %v1332_v34  ;;  %v1150_v2 = vrot.slane %v1148_v50, 4 }
  0x96   : > { %1078 = vst [vmem:[#allocation2 + $0x220] sm:$0xf] %v837_v63  ;;  %2004 = vst [vmem:[#allocation2 + $0x184] sm:$0xf] %v837_v63  ;;  %v850_v38 = vrot.slane %v8760_v55, 4  ;;  %v6143_v40 = vld [vmem:[%s8711_s3 + $0x160] sm:$0xff]   ;;  %v841_v14 = vor.u32 %v840_v12, %v7100_v57  ;;  %v385_v63 = vmul.f32 %v5598_v19, %v6591_v18  ;;  %v7175_v57 = vadd.f32 %v6617_v36, %v7077_v60 }
  0x97   : > { %1441 = vst [vmem:[#allocation2 + $0x228] sm:$0xf] %v1333_v41  ;;  %v7166_v13 = vrot.slane %v8738_v61, 5  ;;  %v1151_v49 = vrot.slane %v7108_v16, 5  ;;  %v6092_v6 = vld [vmem:[#allocation2 + $0x1bc] ss:$36 sps:$4 sm:$0xff]   ;;  %5858 = vmatpush1.bf16.msra.mxu1 %v6166_v7  ;;  %4026 = vmatpush1.bf16.msra.mxu0 %v6143_v40 }
  0x98   : > { %v6094_v32 = vld [vmem:[#allocation2 + $0x1b8] ss:$36 sps:$4 sm:$0xff]   ;;  %v851_v45 = vor.u32 %v850_v38, %v846_v52  ;;  %v468_v5 = vmax.f32 %v427_v15, 0.0  ;;  %v842_v12 = vrot.slane %v841_v14, 4  ;;  %v469_v41 = vmax.f32 %v428_v59, 0.0  ;;  %v6167_v48 = vld [vmem:[%s8711_s3 + $0x1e8] sm:$0xff]   ;;  %3905 = vmatprep.mubr.bf16.mxu0 %v6092_v6  ;;  %4027 = vmatprep.subr.bf16.mxu0 %v8763_v1 }
  0x99   : > { %v1152_v50 = vsel %vm6668_vm6, %v1150_v2, %v1151_v49  ;;  %v1153_v61 = vrot.slane %v1151_v49, 4  ;;  %v1154_v19 = vrot.slane %v7117_v43, 5  ;;  %v1334_v60 = vrot.slane %v1332_v34, 4  ;;  %v6152_v59 = vld [vmem:[%s8711_s3 + $0x168] sm:$0xff]   ;;  %3906 = vmatmul.mubr.bf16.gmra.mrb[24].mxu0 %v6094_v32  ;;  %v2154_v7 = vld [vmem:[#allocation2 + $0x1f8] sm:$0xff]  ;;  %5843 = vmatprep.subr.bf16.mxu1 %v8763_v1 }
  0x9a   : > { %v852_v38 = vrot.slane %v851_v45, 4  ;;  %v7182_v15 = vpack.c.bf16 %v468_v5, %v468_v5  ;;  %1258 = vst [vmem:[#allocation2 + $0x248] sm:$0xf] %v1152_v50  ;;  %2060 = vst [vmem:[#allocation2 + $0x1ac] sm:$0xf] %v1152_v50  ;;  %v847_v14 = vsel %vm6695_vm8, %v842_v12, %v846_v52  ;;  %v7190_v2 = vpack.c.bf16 %v469_v41, %v469_v41  ;;  %v6173_v45 = vld [vmem:[%s8711_s3 + $0x1f0] sm:$0xff]  }
  0x9b   : > { %v8740_v49 = vshrl.u32 %v7117_v43, 16  ;;  %v430_v6 = vadd.f32 %v6617_v36, %v385_v63  ;;  %1079 = vst [vmem:[#allocation2 + $0x244] sm:$0xf] %v847_v14  ;;  %2005 = vst [vmem:[#allocation2 + $0x1a8] sm:$0xf] %v847_v14  ;;  %v1155_v40 = vsel %vm6668_vm6, %v1153_v61, %v1154_v19  ;;  %v386_v50 = vmul.f32 %v5599_v20, %v6591_v18  ;;  %v7446_v55 = vld [vmem:[%s6488_s30 + $0x88] sm:$0xff]  }
  0x9c   : > { %v857_v34 = vsel %vm6695_vm8, %v852_v38, %v7166_v13  ;;  %v1335_v32 = vrot.slane %v7182_v15, 6  ;;  %653 = vst [vmem:[#allocation2 + $0x2ac] sm:$0xf] %v7182_v15  ;;  %1927 = vst [vmem:[#allocation2 + $0x210] sm:$0xf] %v7182_v15  ;;  %v8754_v52 = vshll.u32 %v7182_v15, 16  ;;  %5859 = vmatpush1.bf16.msra.mxu1 %v6167_v48  ;;  %4028 = vmatpush1.bf16.msra.mxu0 %v6152_v59 }
  0x9d   : > { %v2159_v5 = vld [vmem:[#allocation2 + $0x21c] sm:$0xff]  ;;  %1080 = vst [vmem:[#allocation2 + $0x268] sm:$0xf] %v857_v34  ;;  %2006 = vst [vmem:[#allocation2 + $0x1cc] sm:$0xf] %v857_v34  ;;  %v1338_v61 = vrot.slane %v7190_v2, 6  ;;  %5844 = vmatprep.subr.bf16.mxu1 %v8763_v1  ;;  %4029 = vmatprep.subr.bf16.mxu0 %v8763_v1 }
  0x9e   : > { %v6095_v63 = vld [vmem:[#allocation2 + $0x1fc] ss:$36 sps:$4 sm:$0xff]   ;;  %1259 = vst [vmem:[#allocation2 + $0x26c] sm:$0xf] %v1155_v40  ;;  %654 = vst [vmem:[#allocation2 + $0x2d0] sm:$0xf] %v7190_v2  ;;  %v5268_v14 = vcombine.low %v2154_v7, %v2159_v5  ;;  %v1336_v34 = vsel %vm6689_vm7, %v1334_v60, %v1335_v32 }
  0x9f   : > { %1928 = vst [vmem:[#allocation2 + $0x234] sm:$0xf] %v7190_v2  ;;  %2061 = vst [vmem:[#allocation2 + $0x1d0] sm:$0xf] %v1155_v40  ;;  %v860_v12 = vrot.slane %v8740_v49, 4  ;;  %v8756_v41 = vshrl.u32 %v7182_v15, 16  ;;  %v7222_v40 = vmul.f32 %v5602_v23, %v6591_v18  ;;  %3737 = vmatprep.mubr.bf16.mxu1 %v6095_v63 }
  0xa0   : > { %v6097_v38 = vld [vmem:[#allocation2 + $0x204] ss:$36 sps:$4 sm:$0xff]   ;;  %v1337_v3 = vrot.slane %v1335_v32, 4  ;;  %v6164_v49 = vld [vmem:[%s8711_s3 + $0x170] sm:$0xff]   ;;  %1442 = vst [vmem:[#allocation2 + $0x24c] sm:$0xf] %v1336_v34  ;;  %3738 = vmatmul.mubr.bf16.gmra.mrb[28].mxu1 %v5268_v14 }
  0xa1   : > { %v6100_v4 = vld [vmem:[#allocation2 + $0x200] ss:$36 sps:$4 sm:$0xff]   ;;  %v861_v20 = vor.u32 %v860_v12, %v7166_v13  ;;  %v866_v48 = vrot.slane %v8754_v52, 5  ;;  %v870_v60 = vrot.slane %v8756_v41, 4  ;;  %v8741_v23 = vshll.u32 %v7190_v2, 16  ;;  %3913 = vmatprep.mubr.bf16.mxu0 %v6097_v38  ;;  %5860 = vmatpush1.bf16.msra.mxu1 %v6173_v45  ;;  %v6174_v38 = vld [vmem:[%s8711_s3 + $0x1f8] sm:$0xff]  }
  0xa2   : > { %v1339_v59 = vsel %vm6689_vm7, %v1337_v3, %v1338_v61  ;;  %v470_v7 = vmax.f32 %v7175_v57, 0.0  ;;  %v471_v32 = vmax.f32 %v430_v6, 0.0  ;;  %v1156_v5 = vrot.slane %v1154_v19, 4  ;;  %4030 = vmatpush1.bf16.msra.mxu0 %v6164_v49  ;;  %v6172_v6 = vld [vmem:[%s8711_s3 + $0x178] sm:$0xff]   ;;  %5845 = vmatprep.subr.bf16.mxu1 %v8763_v1  ;;  %v2164_v45 = vld [vmem:[#allocation2 + $0x240] sm:$0xff] }
  0xa3   : > { %1443 = vst [vmem:[#allocation2 + $0x270] sm:$0xf] %v1339_v59  ;;  %v862_v13 = vrot.slane %v861_v20, 4  ;;  %v871_v63 = vor.u32 %v870_v60, %v866_v48  ;;  %v7240_v12 = vrot.slane %v8741_v23, 5  ;;  %v1157_v34 = vrot.slane %v7182_v15, 5  ;;  %3914 = vmatmul.mubr.bf16.gmra.mrb[28].mxu0 %v6100_v4  ;;  %4031 = vmatprep.subr.bf16.mxu0 %v8763_v1 }
  0xa4   : > { %v7246_v14 = vpack.c.bf16 %v470_v7, %v470_v7  ;;  %v7248_v3 = vpack.c.bf16 %v471_v32, %v471_v32  ;;  %v1160_v57 = vrot.slane %v7190_v2, 5  ;;  %v1340_v19 = vrot.slane %v1338_v61, 4  ;;  %v2169_v61 = vld [vmem:[#allocation2 + $0x264] sm:$0xff] }
  0xa5   : > { %v867_v20 = vsel %vm6695_vm8, %v862_v13, %v866_v48  ;;  %v872_v60 = vrot.slane %v871_v63, 4  ;;  %v1158_v59 = vsel %vm6668_vm6, %v1156_v5, %v1157_v34  ;;  %v1159_v7 = vrot.slane %v1157_v34, 4  ;;  %v6102_v49 = vld [vmem:[#allocation2 + $0x244] ss:$36 sps:$4 sm:$0xff]   ;;  %5861 = vmatpush1.bf16.msra.mxu1 %v6174_v38 }
  0xa6   : > { %1081 = vst [vmem:[#allocation2 + $0x28c] sm:$0xf] %v867_v20  ;;  %2007 = vst [vmem:[#allocation2 + $0x1f0] sm:$0xf] %v867_v20  ;;  %v1341_v32 = vrot.slane %v7246_v14, 6  ;;  %v1344_v4 = vrot.slane %v7248_v3, 6  ;;  %v431_v5 = vadd.f32 %v6617_v36, %v386_v50  ;;  %v5277_v13 = vcombine.low %v2164_v45, %v2169_v61  ;;  %3745 = vmatprep.mubr.bf16.mxu1 %v6102_v49 }
  0xa7   : > { %1260 = vst [vmem:[#allocation2 + $0x290] sm:$0xf] %v1158_v59  ;;  %655 = vst [vmem:[#allocation2 + $0x2f4] sm:$0xf] %v7246_v14  ;;  %v8744_v48 = vshrl.u32 %v7190_v2, 16  ;;  %v877_v63 = vsel %vm6695_vm8, %v872_v60, %v7240_v12  ;;  %v1161_v34 = vsel %vm6668_vm6, %v1159_v7, %v1160_v57  ;;  %v8742_v20 = vshll.u32 %v7246_v14, 16  ;;  %4032 = vmatpush1.bf16.msra.mxu0 %v6172_v6 }
  0xa8   : > { %656 = vst [vmem:[#allocation2 + $0x318] sm:$0xf] %v7248_v3  ;;  %1929 = vst [vmem:[#allocation2 + $0x258] sm:$0xf] %v7246_v14  ;;  %v1343_v23 = vrot.slane %v1341_v32, 4  ;;  %v8743_v45 = vshrl.u32 %v7246_v14, 16  ;;  %v432_v7 = vadd.f32 %v6617_v36, %v7222_v40  ;;  %4177 = vmatprep.subr.bf16.mxu0 %v8763_v1  ;;  %3746 = vmatmul.mubr.bf16.gmra.mrb[32].mxu1 %v5277_v13 }
  0xa9   : > { %1930 = vst [vmem:[#allocation2 + $0x27c] sm:$0xf] %v7248_v3  ;;  %2062 = vst [vmem:[#allocation2 + $0x1f4] sm:$0xf] %v1158_v59  ;;  %v1342_v59 = vsel %vm6689_vm7, %v1340_v19, %v1341_v32  ;;  %v880_v50 = vrot.slane %v8744_v48, 4  ;;  %v886_v60 = vrot.slane %v8742_v20, 5 }
  0xaa   : > { %1082 = vst [vmem:[#allocation2 + $0x2b0] sm:$0xf] %v877_v63  ;;  %2008 = vst [vmem:[#allocation2 + $0x214] sm:$0xf] %v877_v63  ;;  %v8749_v38 = vshll.u32 %v7248_v3, 16  ;;  %v472_v61 = vmax.f32 %v431_v5, 0.0  ;;  %v1345_v32 = vsel %vm6689_vm7, %v1343_v23, %v1344_v4 }
  0xab   : > { %1261 = vst [vmem:[#allocation2 + $0x2b4] sm:$0xf] %v1161_v34  ;;  %2063 = vst [vmem:[#allocation2 + $0x218] sm:$0xf] %v1161_v34  ;;  %v6104_v19 = vld [vmem:[#allocation2 + $0x24c] ss:$36 sps:$4 sm:$0xff]   ;;  %v881_v6 = vor.u32 %v880_v50, %v7240_v12  ;;  %v388_v34 = vmul.f32 %v5603_v21, %v6591_v18 }
  0xac   : > { %1444 = vst [vmem:[#allocation2 + $0x294] sm:$0xf] %v1342_v59  ;;  %v6106_v49 = vld [vmem:[#allocation2 + $0x248] ss:$36 sps:$4 sm:$0xff]   ;;  %v890_v63 = vrot.slane %v8743_v45, 4  ;;  %v896_v40 = vrot.slane %v8749_v38, 5  ;;  %v7295_v59 = vpack.c.bf16 %v472_v61, %v472_v61  ;;  %3921 = vmatprep.mubr.bf16.mxu0 %v6104_v19 }
  0xad   : > { %1445 = vst [vmem:[#allocation2 + $0x2b8] sm:$0xf] %v1345_v32  ;;  %v473_v5 = vmax.f32 %v432_v7, 0.0  ;;  %v1162_v13 = vrot.slane %v1160_v57, 4  ;;  %v882_v20 = vrot.slane %v881_v6, 4  ;;  %v1163_v12 = vrot.slane %v7246_v14, 5  ;;  %3922 = vmatmul.mubr.bf16.gmra.mrb[32].mxu0 %v6106_v49 }
  0xae   : > { %v891_v23 = vor.u32 %v890_v63, %v886_v60  ;;  %v1166_v50 = vrot.slane %v7248_v3, 5  ;;  %v2174_v45 = vld [vmem:[#allocation2 + $0x288] sm:$0xff]  ;;  %v1346_v9 = vrot.slane %v1344_v4, 4  ;;  %v1347_v21 = vrot.slane %v7295_v59, 6  ;;  %657 = vst [vmem:[#allocation2 + $0x33c] sm:$0xf] %v7295_v59 }
  0xaf   : > { %v7299_v48 = vpack.c.bf16 %v473_v5, %v473_v5  ;;  %1931 = vst [vmem:[#allocation2 + $0x2a0] sm:$0xf] %v7295_v59  ;;  %v8753_v57 = vshrl.u32 %v7248_v3, 16  ;;  %v887_v7 = vsel %vm6695_vm8, %v882_v20, %v886_v60  ;;  %v1164_v19 = vsel %vm6668_vm6, %v1162_v13, %v1163_v12 }
  0xb0   : > { %v892_v61 = vrot.slane %v891_v23, 4  ;;  %v1165_v49 = vrot.slane %v1163_v12, 4  ;;  %1083 = vst [vmem:[#allocation2 + $0x2d4] sm:$0xf] %v887_v7  ;;  %2009 = vst [vmem:[#allocation2 + $0x238] sm:$0xf] %v887_v7  ;;  %v1348_v4 = vsel %vm6689_vm7, %v1346_v9, %v1347_v21 }
  0xb1   : > { %v2179_v32 = vld [vmem:[#allocation2 + $0x2ac] sm:$0xff]  ;;  %1262 = vst [vmem:[#allocation2 + $0x2d8] sm:$0xf] %v1164_v19  ;;  %v1349_v63 = vrot.slane %v1347_v21, 4  ;;  %v1350_v5 = vrot.slane %v7299_v48, 6  ;;  %v900_v20 = vrot.slane %v8753_v57, 4 }
  0xb2   : > { %v6109_v6 = vld [vmem:[#allocation2 + $0x28c] ss:$36 sps:$4 sm:$0xff]   ;;  %658 = vst [vmem:[#allocation2 + $0x360] sm:$0xf] %v7299_v48  ;;  %1932 = vst [vmem:[#allocation2 + $0x2c4] sm:$0xf] %v7299_v48  ;;  %v5286_v60 = vcombine.low %v2174_v45, %v2179_v32  ;;  %v897_v13 = vsel %vm6695_vm8, %v892_v61, %v896_v40  ;;  %v1167_v23 = vsel %vm6668_vm6, %v1165_v49, %v1166_v50 }
  0xb3   : > { %2064 = vst [vmem:[#allocation2 + $0x23c] sm:$0xf] %v1164_v19  ;;  %1446 = vst [vmem:[#allocation2 + $0x2dc] sm:$0xf] %v1348_v4  ;;  %v8745_v12 = vshll.u32 %v7295_v59, 16  ;;  %3753 = vmatprep.mubr.bf16.mxu1 %v6109_v6  ;;  %v1351_v9 = vsel %vm6689_vm7, %v1349_v63, %v1350_v5  ;;  %v901_v21 = vor.u32 %v900_v20, %v896_v40  ;;  %v8746_v45 = vshrl.u32 %v7295_v59, 16 }
  0xb4   : > { %1084 = vst [vmem:[#allocation2 + $0x2f8] sm:$0xf] %v897_v13  ;;  %2010 = vst [vmem:[#allocation2 + $0x25c] sm:$0xf] %v897_v13  ;;  %v8747_v7 = vshll.u32 %v7299_v48, 16  ;;  %3754 = vmatmul.mubr.bf16.gmra.mrb[36].mxu1 %v5286_v60  ;;  %v389_v32 = vmul.f32 %v5606_v24, %v6591_v18  ;;  %v433_v6 = vadd.f32 %v6617_v36, %v388_v34  ;;  %v8795_v40 = vunpack.c.h.bf16 %v6578_v10 }
  0xb5   : > { %1263 = vst [vmem:[#allocation2 + $0x2fc] sm:$0xf] %v1167_v23  ;;  %2065 = vst [vmem:[#allocation2 + $0x260] sm:$0xf] %v1167_v23  ;;  %v6111_v61 = vld [vmem:[#allocation2 + $0x294] ss:$36 sps:$4 sm:$0xff]  }
  0xb6   : > { %v6113_v19 = vld [vmem:[#allocation2 + $0x290] ss:$36 sps:$4 sm:$0xff]   ;;  %1447 = vst [vmem:[#allocation2 + $0x300] sm:$0xf] %v1351_v9  ;;  %v906_v49 = vrot.slane %v8745_v12, 5  ;;  %v390_v4 = vmul.f32 %v8795_v40, %v6591_v18  ;;  %v902_v63 = vrot.slane %v901_v21, 4  ;;  %3929 = vmatprep.mubr.bf16.mxu0 %v6111_v61  ;;  %v434_v23 = vadd.f32 %v6617_v36, %v389_v32 }
  0xb7   : > { %v910_v20 = vrot.slane %v8746_v45, 4  ;;  %v916_v60 = vrot.slane %v8747_v7, 5  ;;  %v1168_v13 = vrot.slane %v1166_v50, 4  ;;  %v474_v9 = vmax.f32 %v433_v6, 0.0  ;;  %3930 = vmatmul.mubr.bf16.gmra.mrb[36].mxu0 %v6113_v19  ;;  %v2184_v45 = vld [vmem:[#allocation2 + $0x2d0] sm:$0xff] }
  0xb8   : > { %v1169_v24 = vrot.slane %v7295_v59, 5  ;;  %v1172_v34 = vrot.slane %v7299_v48, 5  ;;  %v907_v10 = vsel %vm6695_vm8, %v902_v63, %v906_v49  ;;  %v1352_v40 = vrot.slane %v1350_v5, 4 }
  0xb9   : > { %v911_v21 = vor.u32 %v910_v20, %v906_v49  ;;  %v8748_v12 = vshrl.u32 %v7299_v48, 16  ;;  %1085 = vst [vmem:[#allocation2 + $0x31c] sm:$0xf] %v907_v10  ;;  %2011 = vst [vmem:[#allocation2 + $0x280] sm:$0xf] %v907_v10  ;;  %v475_v50 = vmax.f32 %v434_v23, 0.0  ;;  %v7344_v61 = vpack.c.bf16 %v474_v9, %v474_v9 }
  0xba   : > { %v1170_v32 = vsel %vm6668_vm6, %v1168_v13, %v1169_v24  ;;  %v1171_v6 = vrot.slane %v1169_v24, 4  ;;  %v8796_v5 = vunpack.c.l.bf16 %v6611_v31  ;;  %v435_v63 = vadd.f32 %v6617_v36, %v390_v4 }
  0xbb   : > { %v912_v7 = vrot.slane %v911_v21, 4  ;;  %1264 = vst [vmem:[#allocation2 + $0x320] sm:$0xf] %v1170_v32  ;;  %2066 = vst [vmem:[#allocation2 + $0x284] sm:$0xf] %v1170_v32  ;;  %v920_v19 = vrot.slane %v8748_v12, 4  ;;  %v7354_v9 = vpack.c.bf16 %v475_v50, %v475_v50 }
  0xbc   : > { %v391_v49 = vmul.f32 %v8796_v5, %v6591_v18  ;;  %v2189_v20 = vld [vmem:[#allocation2 + $0x2f4] sm:$0xff]  ;;  %v1173_v13 = vsel %vm6668_vm6, %v1171_v6, %v1172_v34  ;;  %v1353_v24 = vrot.slane %v7344_v61, 6  ;;  %659 = vst [vmem:[#allocation2 + $0x384] sm:$0xf] %v7344_v61  ;;  %1933 = vst [vmem:[#allocation2 + $0x2e8] sm:$0xf] %v7344_v61 }
  0xbd   : > { %v6116_v23 = vld [vmem:[#allocation2 + $0x2d4] ss:$36 sps:$4 sm:$0xff]   ;;  %v8751_v10 = vshll.u32 %v7344_v61, 16  ;;  %v6118_v21 = vld [vmem:[#allocation2 + $0x2dc] ss:$36 sps:$4 sm:$0xff]   ;;  %v5295_v31 = vcombine.low %v2184_v45, %v2189_v20  ;;  %v917_v4 = vsel %vm6695_vm8, %v912_v7, %v916_v60  ;;  %v921_v50 = vor.u32 %v920_v19, %v916_v60 }
  0xbe   : > { %v6120_v32 = vld [vmem:[#allocation2 + $0x2d8] ss:$36 sps:$4 sm:$0xff]   ;;  %1265 = vst [vmem:[#allocation2 + $0x344] sm:$0xf] %v1173_v13  ;;  %2067 = vst [vmem:[#allocation2 + $0x2a8] sm:$0xf] %v1173_v13  ;;  %3761 = vmatprep.mubr.bf16.mxu1 %v6116_v23  ;;  %v1354_v6 = vsel %vm6689_vm7, %v1352_v40, %v1353_v24  ;;  %3937 = vmatprep.mubr.bf16.mxu0 %v6118_v21  ;;  %v436_v40 = vadd.f32 %v6617_v36, %v391_v49 }
  0xbf   : > { %v8752_v5 = vshrl.u32 %v7344_v61, 16  ;;  %1086 = vst [vmem:[#allocation2 + $0x340] sm:$0xf] %v917_v4  ;;  %2012 = vst [vmem:[#allocation2 + $0x2a4] sm:$0xf] %v917_v4  ;;  %v1355_v12 = vrot.slane %v1353_v24, 4  ;;  %3762 = vmatmul.mubr.bf16.gmra.mrb[40].mxu1 %v5295_v31  ;;  %3938 = vmatmul.mubr.bf16.gmra.mrb[40].mxu0 %v6120_v32 }
  0xc0   : > { %v1356_v38 = vrot.slane %v7354_v9, 6  ;;  %660 = vst [vmem:[#allocation2 + $0x3a8] sm:$0xf] %v7354_v9  ;;  %1934 = vst [vmem:[#allocation2 + $0x30c] sm:$0xf] %v7354_v9  ;;  %v926_v45 = vrot.slane %v8751_v10, 5 }
  0xc1   : > { %1448 = vst [vmem:[#allocation2 + $0x324] sm:$0xf] %v1354_v6  ;;  %v922_v7 = vrot.slane %v921_v50, 4  ;;  %v930_v60 = vrot.slane %v8752_v5, 4  ;;  %v8750_v19 = vshll.u32 %v7354_v9, 16  ;;  %v476_v23 = vmax.f32 %v435_v63, 0.0 }
  0xc2   : > { %v1357_v20 = vsel %vm6689_vm7, %v1355_v12, %v1356_v38  ;;  %v1174_v13 = vrot.slane %v1172_v34, 4  ;;  %v1175_v24 = vrot.slane %v7344_v61, 5  ;;  %v477_v50 = vmax.f32 %v436_v40, 0.0  ;;  %v7391_v32 = vld [vmem:[%s8711_s3 + $0x200] sm:$0xff]   ;;  %v2194_v6 = vld [vmem:[#allocation2 + $0x318] sm:$0xff] }
  0xc3   : > { %1449 = vst [vmem:[#allocation2 + $0x348] sm:$0xf] %v1357_v20  ;;  %v927_v21 = vsel %vm6695_vm8, %v922_v7, %v926_v45  ;;  %v931_v31 = vor.u32 %v930_v60, %v926_v45  ;;  %v936_v4 = vrot.slane %v8750_v19, 5  ;;  %v7383_v49 = vpack.c.bf16 %v476_v23, %v476_v23  ;;  %5778 = vmatprep.subr.bf16.mxu1 %v7391_v32 }
  0xc4   : > { %1087 = vst [vmem:[#allocation2 + $0x364] sm:$0xf] %v927_v21  ;;  %2013 = vst [vmem:[#allocation2 + $0x2c8] sm:$0xf] %v927_v21  ;;  %v1176_v12 = vsel %vm6668_vm6, %v1174_v13, %v1175_v24  ;;  %v1177_v34 = vrot.slane %v1175_v24, 4  ;;  %v1178_v63 = vrot.slane %v7354_v9, 5  ;;  %v7393_v7 = vpack.c.bf16 %v477_v50, %v477_v50 }
  0xc5   : > { %v932_v45 = vrot.slane %v931_v31, 4  ;;  %1266 = vst [vmem:[#allocation2 + $0x368] sm:$0xf] %v1176_v12  ;;  %v1358_v60 = vrot.slane %v1356_v38, 4  ;;  %2068 = vst [vmem:[#allocation2 + $0x2cc] sm:$0xf] %v1176_v12 }
  0xc6   : > { %v8755_v40 = vshrl.u32 %v7354_v9, 16  ;;  %v1179_v20 = vsel %vm6668_vm6, %v1177_v34, %v1178_v63  ;;  %v1359_v23 = vrot.slane %v7383_v49, 6  ;;  %661 = vst [vmem:[#allocation2 + $0x3cc] sm:$0xf] %v7383_v49  ;;  %1935 = vst [vmem:[#allocation2 + $0x330] sm:$0xf] %v7383_v49 }
  0xc7   : > { %v8757_v13 = vshll.u32 %v7383_v49, 16  ;;  %v8759_v24 = vshrl.u32 %v7383_v49, 16  ;;  %v7404_v21 = vld [vmem:[%s6488_s30 + $0x78] sm:$0xff]   ;;  %v937_v50 = vsel %vm6695_vm8, %v932_v45, %v936_v4  ;;  %1267 = vst [vmem:[#allocation2 + $0x38c] sm:$0xf] %v1179_v20  ;;  %v1362_v12 = vrot.slane %v7393_v7, 6 }
  0xc8   : > { %v2199_v38 = vld [vmem:[#allocation2 + $0x33c] sm:$0xff]  ;;  %662 = vst [vmem:[#allocation2 + $0x3f0] sm:$0xf] %v7393_v7  ;;  %1936 = vst [vmem:[#allocation2 + $0x354] sm:$0xf] %v7393_v7  ;;  %v940_v34 = vrot.slane %v8755_v40, 4  ;;  %v1360_v45 = vsel %vm6689_vm7, %v1358_v60, %v1359_v23 }
  0xc9   : > { %v6123_v31 = vld [vmem:[#allocation2 + $0x31c] ss:$36 sps:$4 sm:$0xff]   ;;  %2069 = vst [vmem:[#allocation2 + $0x2f0] sm:$0xf] %v1179_v20  ;;  %v8758_v19 = vshll.u32 %v7393_v7, 16  ;;  %v5304_v10 = vcombine.low %v2194_v6, %v2199_v38  ;;  %v1361_v5 = vrot.slane %v1359_v23, 4  ;;  %v5614_v23 = vunpack.c.l.bf16 %v7404_v21 }
  0xca   : > { %1088 = vst [vmem:[#allocation2 + $0x388] sm:$0xf] %v937_v50  ;;  %2014 = vst [vmem:[#allocation2 + $0x2ec] sm:$0xf] %v937_v50  ;;  %v946_v57 = vrot.slane %v8757_v13, 5  ;;  %3769 = vmatprep.mubr.bf16.mxu1 %v6123_v31  ;;  %v941_v52 = vor.u32 %v940_v34, %v936_v4  ;;  %v950_v20 = vrot.slane %v8759_v24, 4  ;;  %v5615_v4 = vunpack.c.h.bf16 %v7404_v21 }
  0xcb   : > { %1450 = vst [vmem:[#allocation2 + $0x36c] sm:$0xf] %v1360_v45  ;;  %v956_v40 = vrot.slane %v8758_v19, 5  ;;  %v6309_v6 = vld [vmem:[%s6488_s30 + $0x70] sm:$0xff]   ;;  %v6125_v50 = vld [vmem:[#allocation2 + $0x324] ss:$36 sps:$4 sm:$0xff]   ;;  %3770 = vmatmul.mubr.bf16.gmra.mrb[44].mxu1 %v5304_v10  ;;  %v1363_v60 = vsel %vm6689_vm7, %v1361_v5, %v1362_v12  ;;  %v393_v10 = vmul.f32 %v5614_v23, %v6591_v18 }
  0xcc   : > { %v5611_v38 = vunpack.c.h.bf16 %v6309_v6  ;;  %v6127_v41 = vld [vmem:[#allocation2 + $0x320] ss:$36 sps:$4 sm:$0xff]   ;;  %v1180_v31 = vrot.slane %v1178_v63, 4  ;;  %1451 = vst [vmem:[#allocation2 + $0x390] sm:$0xf] %v1363_v60  ;;  %v942_v34 = vrot.slane %v941_v52, 4  ;;  %v951_v45 = vor.u32 %v950_v20, %v946_v57  ;;  %3945 = vmatprep.mubr.bf16.mxu0 %v6125_v50 }
  0xcd   : > { %v1181_v19 = vrot.slane %v7383_v49, 5  ;;  %v7431_v24 = vld [vmem:[%s6488_s30 + $0x80] sm:$0xff]   ;;  %v1184_v6 = vrot.slane %v7393_v7, 5  ;;  %v1364_v5 = vrot.slane %v1362_v12, 4  ;;  %v8761_v63 = vshrl.u32 %v7393_v7, 16  ;;  %3946 = vmatmul.mubr.bf16.gmra.mrb[44].mxu0 %v6127_v41 }
  0xce   : > { %v392_v13 = vmul.f32 %v5611_v38, %v6591_v18  ;;  %v2204_v21 = vld [vmem:[#allocation2 + $0x360] sm:$0xff]  ;;  %v947_v52 = vsel %vm6695_vm8, %v942_v34, %v946_v57  ;;  %v952_v20 = vrot.slane %v951_v45, 4  ;;  %v438_v50 = vadd.f32 %v6617_v36, %v393_v10 }
  0xcf   : > { %v1182_v60 = vsel %vm6668_vm6, %v1180_v31, %v1181_v19  ;;  %1089 = vst [vmem:[#allocation2 + $0x3ac] sm:$0xf] %v947_v52  ;;  %2015 = vst [vmem:[#allocation2 + $0x310] sm:$0xf] %v947_v52  ;;  %v1183_v23 = vrot.slane %v1181_v19, 4  ;;  %v960_v41 = vrot.slane %v8761_v63, 4  ;;  %v5618_v12 = vunpack.c.l.bf16 %v7431_v24 }
  0xd0   : > { %v437_v38 = vadd.f32 %v6617_v36, %v392_v13  ;;  %1268 = vst [vmem:[#allocation2 + $0x3b0] sm:$0xf] %v1182_v60  ;;  %2070 = vst [vmem:[#allocation2 + $0x314] sm:$0xf] %v1182_v60  ;;  %v957_v13 = vsel %vm6695_vm8, %v952_v20, %v956_v40  ;;  %v394_v45 = vmul.f32 %v5615_v4, %v6591_v18  ;;  %v1186_v52 = vrot.slane %v1184_v6, 4 }
  0xd1   : > { %v2209_v57 = vld [vmem:[#allocation2 + $0x384] sm:$0xff]  ;;  %1090 = vst [vmem:[#allocation2 + $0x3d0] sm:$0xf] %v957_v13  ;;  %2016 = vst [vmem:[#allocation2 + $0x334] sm:$0xf] %v957_v13  ;;  %v479_v19 = vmax.f32 %v438_v50, 0.0  ;;  %v1185_v60 = vsel %vm6668_vm6, %v1183_v23, %v1184_v6  ;;  %v961_v63 = vor.u32 %v960_v41, %v956_v40  ;;  %v395_v1 = vmul.f32 %v5618_v12, %v6591_v18 }
  0xd2   : > { %v6130_v34 = vld [vmem:[#allocation2 + $0x364] ss:$36 sps:$4 sm:$0xff]   ;;  %v478_v31 = vmax.f32 %v437_v38, 0.0  ;;  %v5313_v10 = vcombine.low %v2204_v21, %v2209_v57  ;;  %1269 = vst [vmem:[#allocation2 + $0x3d4] sm:$0xf] %v1185_v60  ;;  %v439_v20 = vadd.f32 %v6617_v36, %v394_v45  ;;  %v5619_v4 = vunpack.c.h.bf16 %v7431_v24 }
  0xd3   : > { %3777 = vmatprep.mubr.bf16.mxu1 %v6130_v34  ;;  %2071 = vst [vmem:[#allocation2 + $0x338] sm:$0xf] %v1185_v60  ;;  %v6132_v38 = vld [vmem:[#allocation2 + $0x36c] ss:$36 sps:$4 sm:$0xff]   ;;  %v7458_v57 = vpack.c.bf16 %v479_v19, %v479_v19  ;;  %v962_v50 = vrot.slane %v961_v63, 4  ;;  %v5622_v6 = vunpack.c.l.bf16 %v7446_v55  ;;  %v5623_v40 = vunpack.c.h.bf16 %v7446_v55 }
  0xd4   : > { %v7453_v58 = vpack.c.bf16 %v478_v31, %v478_v31  ;;  %3778 = vmatmul.mubr.bf16.gmra.mrb[48].mxu1 %v5313_v10  ;;  %v6134_v21 = vld [vmem:[#allocation2 + $0x368] ss:$36 sps:$4 sm:$0xff]   ;;  %v440_v34 = vadd.f32 %v6617_v36, %v395_v1  ;;  %3953 = vmatprep.mubr.bf16.mxu0 %v6132_v38  ;;  %v480_v31 = vmax.f32 %v439_v20, 0.0 }
  0xd5   : > { %v1368_v13 = vrot.slane %v7458_v57, 6  ;;  %664 = vst [vmem:[#allocation2 + $0x438] sm:$0xf] %v7458_v57  ;;  %1938 = vst [vmem:[#allocation2 + $0x39c] sm:$0xf] %v7458_v57  ;;  %v8774_v63 = vshll.u32 %v7458_v57, 16  ;;  %3954 = vmatmul.mubr.bf16.gmra.mrb[48].mxu0 %v6134_v21 }
  0xd6   : > { %v1365_v23 = vrot.slane %v7453_v58, 6  ;;  %663 = vst [vmem:[#allocation2 + $0x414] sm:$0xf] %v7453_v58  ;;  %1937 = vst [vmem:[#allocation2 + $0x378] sm:$0xf] %v7453_v58  ;;  %v8769_v41 = vshll.u32 %v7453_v58, 16  ;;  %v7481_v20 = vpack.c.bf16 %v480_v31, %v480_v31 }
  0xd7   : > { %v8770_v12 = vshrl.u32 %v7453_v58, 16  ;;  %v1187_v45 = vrot.slane %v7453_v58, 5  ;;  %v2214_v10 = vld [vmem:[#allocation2 + $0x3a8] sm:$0xff]  ;;  %v976_v46 = vrot.slane %v8774_v63, 5  ;;  %v481_v42 = vmax.f32 %v440_v34, 0.0 }
  0xd8   : > { %v1366_v19 = vsel %vm6689_vm7, %v1364_v5, %v1365_v23  ;;  %v1367_v60 = vrot.slane %v1365_v23, 4  ;;  %v966_v1 = vrot.slane %v8769_v41, 5  ;;  %v2219_v47 = vld [vmem:[#allocation2 + $0x3cc] sm:$0xff]  ;;  %v1370_v31 = vrot.slane %v1368_v13, 4  ;;  %665 = vst [vmem:[#allocation2 + $0x45c] sm:$0xf] %v7481_v20 }
  0xd9   : > { %v970_v38 = vrot.slane %v8770_v12, 4  ;;  %1452 = vst [vmem:[#allocation2 + $0x3b4] sm:$0xf] %v1366_v19  ;;  %v1188_v21 = vsel %vm6668_vm6, %v1186_v52, %v1187_v45  ;;  %v6137_v51 = vld [vmem:[#allocation2 + $0x3ac] ss:$36 sps:$4 sm:$0xff]   ;;  %v1189_v12 = vrot.slane %v1187_v45, 4  ;;  %v5322_v19 = vcombine.low %v2214_v10, %v2219_v47 }
  0xda   : > { %v1369_v5 = vsel %vm6689_vm7, %v1367_v60, %v1368_v13  ;;  %v967_v23 = vsel %vm6695_vm8, %v962_v50, %v966_v1  ;;  %1270 = vst [vmem:[#allocation2 + $0x3f8] sm:$0xf] %v1188_v21  ;;  %2072 = vst [vmem:[#allocation2 + $0x35c] sm:$0xf] %v1188_v21  ;;  %v7489_v34 = vpack.c.bf16 %v481_v42, %v481_v42  ;;  %v1190_v52 = vrot.slane %v7458_v57, 5 }
  0xdb   : > { %v971_v41 = vor.u32 %v970_v38, %v966_v1  ;;  %1453 = vst [vmem:[#allocation2 + $0x3d8] sm:$0xf] %v1369_v5  ;;  %1091 = vst [vmem:[#allocation2 + $0x3f4] sm:$0xf] %v967_v23  ;;  %3785 = vmatprep.mubr.bf16.mxu1 %v6137_v51  ;;  %v1371_v50 = vrot.slane %v7481_v20, 6  ;;  %v8775_v45 = vshrl.u32 %v7458_v57, 16 }
  0xdc   : > { %2017 = vst [vmem:[#allocation2 + $0x358] sm:$0xf] %v967_v23  ;;  %1939 = vst [vmem:[#allocation2 + $0x3c0] sm:$0xf] %v7481_v20  ;;  %v8772_v1 = vshll.u32 %v7481_v20, 16  ;;  %3786 = vmatmul.mubr.bf16.gmra.mrb[52].mxu1 %v5322_v19  ;;  %v1191_v47 = vsel %vm6668_vm6, %v1189_v12, %v1190_v52  ;;  %v1374_v42 = vrot.slane %v7489_v34, 6  ;;  %v396_v19 = vmul.f32 %v5619_v4, %v6591_v18 }
  0xdd   : > { %v972_v60 = vrot.slane %v971_v41, 4  ;;  %666 = vst [vmem:[#allocation2 + $0x480] sm:$0xf] %v7489_v34  ;;  %1940 = vst [vmem:[#allocation2 + $0x3e4] sm:$0xf] %v7489_v34  ;;  %v8773_v51 = vshrl.u32 %v7481_v20, 16  ;;  %v1372_v10 = vsel %vm6689_vm7, %v1370_v31, %v1371_v50 }
  0xde   : > { %v8771_v41 = vshll.u32 %v7489_v34, 16  ;;  %1271 = vst [vmem:[#allocation2 + $0x41c] sm:$0xf] %v1191_v47  ;;  %v1373_v38 = vrot.slane %v1371_v50, 4  ;;  %2073 = vst [vmem:[#allocation2 + $0x380] sm:$0xf] %v1191_v47  ;;  %v397_v47 = vmul.f32 %v5622_v6, %v6591_v18  ;;  %v398_v6 = vmul.f32 %v5623_v40, %v6591_v18 }
  0xdf   : > { %v977_v13 = vsel %vm6695_vm8, %v972_v60, %v976_v46  ;;  %v980_v12 = vrot.slane %v8775_v45, 4  ;;  %1454 = vst [vmem:[#allocation2 + $0x3fc] sm:$0xf] %v1372_v10  ;;  %v986_v21 = vrot.slane %v8772_v1, 5  ;;  %v990_v5 = vrot.slane %v8773_v51, 4  ;;  %v7522_v31 = vld [vmem:[%s6488_s30 + $0x90] sm:$0xff]  }
  0xe0   : > { %1092 = vst [vmem:[#allocation2 + $0x418] sm:$0xf] %v977_v13  ;;  %2018 = vst [vmem:[#allocation2 + $0x37c] sm:$0xf] %v977_v13  ;;  %v7516_v23 = vrot.slane %v8771_v41, 5  ;;  %v1375_v60 = vsel %vm6689_vm7, %v1373_v38, %v1374_v42  ;;  %v1192_v13 = vrot.slane %v1190_v52, 4  ;;  %v441_v41 = vadd.f32 %v6617_v36, %v396_v19 }
  0xe1   : > { %v981_v50 = vor.u32 %v980_v12, %v976_v46  ;;  %1455 = vst [vmem:[#allocation2 + $0x420] sm:$0xf] %v1375_v60  ;;  %v991_v10 = vor.u32 %v990_v5, %v986_v21  ;;  %v1193_v1 = vrot.slane %v7481_v20, 5  ;;  %v1196_v24 = vrot.slane %v7489_v34, 5  ;;  %v6141_v51 = vld [vmem:[#allocation2 + $0x3b0] ss:$36 sps:$4 sm:$0xff]  }
  0xe2   : > { %v6139_v4 = vld [vmem:[#allocation2 + $0x3b4] ss:$36 sps:$4 sm:$0xff]   ;;  %v442_v45 = vadd.f32 %v6617_v36, %v397_v47  ;;  %v5626_v46 = vunpack.c.l.bf16 %v7522_v31  ;;  %v482_v38 = vmax.f32 %v441_v41, 0.0  ;;  %v1376_v47 = vrot.slane %v1374_v42, 4 }
  0xe3   : > { %v982_v63 = vrot.slane %v981_v50, 4  ;;  %v992_v52 = vrot.slane %v991_v10, 4  ;;  %v1194_v12 = vsel %vm6668_vm6, %v1192_v13, %v1193_v1  ;;  %v1195_v5 = vrot.slane %v1193_v1, 4  ;;  %3961 = vmatprep.mubr.bf16.mxu0 %v6139_v4  ;;  %v2224_v19 = vld [vmem:[#allocation2 + $0x3f0] sm:$0xff] }
  0xe4   : > { %v483_v50 = vmax.f32 %v442_v45, 0.0  ;;  %1272 = vst [vmem:[#allocation2 + $0x440] sm:$0xf] %v1194_v12  ;;  %2074 = vst [vmem:[#allocation2 + $0x3a4] sm:$0xf] %v1194_v12  ;;  %v8779_v33 = vshrl.u32 %v7489_v34, 16  ;;  %3962 = vmatmul.mubr.bf16.gmra.mrb[52].mxu0 %v6141_v51  ;;  %v7545_v40 = vpack.c.bf16 %v482_v38, %v482_v38 }
  0xe5   : > { %v987_v60 = vsel %vm6695_vm8, %v982_v63, %v986_v21  ;;  %v997_v55 = vsel %vm6695_vm8, %v992_v52, %v7516_v23  ;;  %v1197_v1 = vsel %vm6668_vm6, %v1195_v5, %v1196_v24  ;;  %v399_v63 = vmul.f32 %v5626_v46, %v6591_v18 }
  0xe6   : > { %1093 = vst [vmem:[#allocation2 + $0x43c] sm:$0xf] %v987_v60  ;;  %2019 = vst [vmem:[#allocation2 + $0x3a0] sm:$0xf] %v987_v60  ;;  %v7550_v42 = vpack.c.bf16 %v483_v50, %v483_v50  ;;  %v1000_v51 = vrot.slane %v8779_v33, 4  ;;  %v443_v21 = vadd.f32 %v6617_v36, %v398_v6  ;;  %v1198_v13 = vrot.slane %v1196_v24, 4 }
  0xe7   : > { %v2229_v45 = vld [vmem:[#allocation2 + $0x414] sm:$0xff]  ;;  %1094 = vst [vmem:[#allocation2 + $0x460] sm:$0xf] %v997_v55  ;;  %2020 = vst [vmem:[#allocation2 + $0x3c4] sm:$0xf] %v997_v55  ;;  %v1377_v4 = vrot.slane %v7545_v40, 6  ;;  %v444_v6 = vadd.f32 %v6617_v36, %v399_v63  ;;  %v5627_v5 = vunpack.c.h.bf16 %v7522_v31 }
  0xe8   : > { %v6145_v41 = vld [vmem:[#allocation2 + $0x3f4] ss:$36 sps:$4 sm:$0xff]   ;;  %1273 = vst [vmem:[#allocation2 + $0x464] sm:$0xf] %v1197_v1  ;;  %2075 = vst [vmem:[#allocation2 + $0x3c8] sm:$0xf] %v1197_v1  ;;  %v5331_v10 = vcombine.low %v2224_v19, %v2229_v45  ;;  %v1001_v24 = vor.u32 %v1000_v51, %v7516_v23 }
  0xe9   : > { %667 = vst [vmem:[#allocation2 + $0x4a4] sm:$0xf] %v7545_v40  ;;  %1941 = vst [vmem:[#allocation2 + $0x408] sm:$0xf] %v7545_v40  ;;  %v8777_v46 = vshll.u32 %v7545_v40, 16  ;;  %v8778_v52 = vshrl.u32 %v7545_v40, 16  ;;  %3793 = vmatprep.mubr.bf16.mxu1 %v6145_v41  ;;  %v1378_v60 = vsel %vm6689_vm7, %v1376_v47, %v1377_v4 }
  0xea   : > { %v6147_v38 = vld [vmem:[#allocation2 + $0x3fc] ss:$36 sps:$4 sm:$0xff]   ;;  %v1380_v12 = vrot.slane %v7550_v42, 6  ;;  %668 = vst [vmem:[#allocation2 + $0x4c8] sm:$0xf] %v7550_v42  ;;  %3794 = vmatmul.mubr.bf16.gmra.mrb[56].mxu1 %v5331_v10  ;;  %v1379_v50 = vrot.slane %v1377_v4, 4 }
  0xeb   : > { %1942 = vst [vmem:[#allocation2 + $0x42c] sm:$0xf] %v7550_v42  ;;  %v6149_v19 = vld [vmem:[#allocation2 + $0x3f8] ss:$36 sps:$4 sm:$0xff]   ;;  %v1006_v55 = vrot.slane %v8777_v46, 5  ;;  %v1010_v1 = vrot.slane %v8778_v52, 4  ;;  %3969 = vmatprep.mubr.bf16.mxu0 %v6147_v38 }
  0xec   : > { %1456 = vst [vmem:[#allocation2 + $0x444] sm:$0xf] %v1378_v60  ;;  %v1002_v45 = vrot.slane %v1001_v24, 4  ;;  %v8782_v23 = vshll.u32 %v7550_v42, 16  ;;  %v484_v63 = vmax.f32 %v443_v21, 0.0  ;;  %v485_v41 = vmax.f32 %v444_v6, 0.0  ;;  %3970 = vmatmul.mubr.bf16.gmra.mrb[56].mxu0 %v6149_v19 }
  0xed   : > { %v1381_v31 = vsel %vm6689_vm7, %v1379_v50, %v1380_v12  ;;  %v1011_v51 = vor.u32 %v1010_v1, %v1006_v55  ;;  %v1199_v47 = vrot.slane %v7545_v40, 5  ;;  %v1202_v10 = vrot.slane %v7550_v42, 5  ;;  %v2234_v4 = vld [vmem:[#allocation2 + $0x438] sm:$0xff] }
  0xee   : > { %1457 = vst [vmem:[#allocation2 + $0x468] sm:$0xf] %v1381_v31  ;;  %v1007_v46 = vsel %vm6695_vm8, %v1002_v45, %v1006_v55  ;;  %v1016_v38 = vrot.slane %v8782_v23, 5  ;;  %v7581_v24 = vpack.c.bf16 %v484_v63, %v484_v63  ;;  %v7583_v21 = vpack.c.bf16 %v485_v41, %v485_v41  ;;  %v2239_v6 = vld [vmem:[#allocation2 + $0x45c] sm:$0xff] }
  0xef   : > { %v6153_v60 = vld [vmem:[#allocation2 + $0x43c] ss:$36 sps:$4 sm:$0xff]   ;;  %v1012_v50 = vrot.slane %v1011_v51, 4  ;;  %1095 = vst [vmem:[#allocation2 + $0x484] sm:$0xf] %v1007_v46  ;;  %v1200_v1 = vsel %vm6668_vm6, %v1198_v13, %v1199_v47  ;;  %v1201_v31 = vrot.slane %v1199_v47, 4  ;;  %v5340_v33 = vcombine.low %v2234_v4, %v2239_v6 }
  0xf0   : > { %2021 = vst [vmem:[#allocation2 + $0x3e8] sm:$0xf] %v1007_v46  ;;  %v1382_v52 = vrot.slane %v1380_v12, 4  ;;  %1274 = vst [vmem:[#allocation2 + $0x488] sm:$0xf] %v1200_v1  ;;  %v1383_v55 = vrot.slane %v7581_v24, 6  ;;  %3801 = vmatprep.mubr.bf16.mxu1 %v6153_v60  ;;  %v400_v63 = vmul.f32 %v5627_v5, %v6591_v18 }
  0xf1   : > { %v1386_v45 = vrot.slane %v7583_v21, 6  ;;  %1943 = vst [vmem:[#allocation2 + $0x450] sm:$0xf] %v7581_v24  ;;  %1944 = vst [vmem:[#allocation2 + $0x474] sm:$0xf] %v7583_v21  ;;  %v8783_v19 = vshrl.u32 %v7550_v42, 16  ;;  %v1017_v46 = vsel %vm6695_vm8, %v1012_v50, %v1016_v38  ;;  %v1203_v13 = vsel %vm6668_vm6, %v1201_v31, %v1202_v10 }
  0xf2   : > { %2076 = vst [vmem:[#allocation2 + $0x3ec] sm:$0xf] %v1200_v1  ;;  %v8780_v12 = vshll.u32 %v7581_v24, 16  ;;  %1096 = vst [vmem:[#allocation2 + $0x4a8] sm:$0xf] %v1017_v46  ;;  %v1384_v41 = vsel %vm6689_vm7, %v1382_v52, %v1383_v55  ;;  %v1385_v51 = vrot.slane %v1383_v55, 4  ;;  %3802 = vmatmul.mubr.bf16.gmra.mrb[60].mxu1 %v5340_v33  ;;  %v445_v5 = vadd.f32 %v6617_v36, %v400_v63 }
  0xf3   : > { %2022 = vst [vmem:[#allocation2 + $0x40c] sm:$0xf] %v1017_v46  ;;  %1275 = vst [vmem:[#allocation2 + $0x4ac] sm:$0xf] %v1203_v13  ;;  %v1020_v47 = vrot.slane %v8783_v19, 4  ;;  %v1204_v4 = vrot.slane %v1202_v10, 4 }
  0xf4   : > { %2077 = vst [vmem:[#allocation2 + $0x410] sm:$0xf] %v1203_v13  ;;  %1458 = vst [vmem:[#allocation2 + $0x48c] sm:$0xf] %v1384_v41  ;;  %v7604_v6 = vrot.slane %v8780_v12, 5  ;;  %v8781_v60 = vrot.slane %v7581_v24, 5  ;;  %v1387_v52 = vsel %vm6689_vm7, %v1385_v51, %v1386_v45 }
  0xf5   : > { %v1388_v50 = vrot.slane %v1386_v45, 4  ;;  %v1021_v1 = vor.u32 %v1020_v47, %v1016_v38  ;;  %v6155_v31 = vld [vmem:[#allocation2 + $0x444] ss:$36 sps:$4 sm:$0xff]   ;;  %1459 = vst [vmem:[#allocation2 + $0x4b0] sm:$0xf] %v1387_v52  ;;  %v486_v33 = vmax.f32 %v445_v5, 0.0 }
  0xf6   : > { %v6157_v55 = vld [vmem:[#allocation2 + $0x440] ss:$36 sps:$4 sm:$0xff]   ;;  %v1206_v10 = vsel %vm6668_vm6, %v1204_v4, %v8781_v60  ;;  %v8797_v13 = vshrl.u32 %v6653_v17, 16  ;;  %v8798_v45 = vshrl.u32 %v6655_v22, 16  ;;  %v8799_v41 = vshll.u32 %v6655_v22, 16  ;;  %3977 = vmatprep.mubr.bf16.mxu0 %v6155_v31 }
  0xf7   : > { %v1022_v46 = vrot.slane %v1021_v1, 4  ;;  %1276 = vst [vmem:[#allocation2 + $0x4d0] sm:$0xf] %v1206_v10  ;;  %2078 = vst [vmem:[#allocation2 + $0x434] sm:$0xf] %v1206_v10  ;;  %v2244_v47 = vld [vmem:[#allocation2 + $0x480] sm:$0xff]  ;;  %v7620_v5 = vpack.c.bf16 %v486_v33, %v486_v33  ;;  %3978 = vmatmul.mubr.bf16.gmra.mrb[60].mxu0 %v6157_v55 }
  0xf8   : > { %v1464_v63 = vrot.slane %v8797_v13, 6  ;;  %v1468_v38 = vrot.slane %v8798_v45, 6  ;;  %v1469_v51 = vrot.slane %v8799_v41, 7  ;;  %v8800_v52 = vshrl.u32 %v6658_v26, 16 }
  0xf9   : > { %v8801_v4 = vshll.u32 %v6658_v26, 16  ;;  %v1027_v10 = vsel %vm6695_vm8, %v1022_v46, %v7604_v6  ;;  %v2249_v45 = vld [vmem:[#allocation2 + $0x4a4] sm:$0xff]  ;;  %v1389_v55 = vrot.slane %v7620_v5, 6  ;;  %1945 = vst [vmem:[#allocation2 + $0x498] sm:$0xf] %v7620_v5  ;;  %v1729_v60 = vrot.slane %v6655_v22, 7 }
  0xfa   : > { %v1473_v12 = vrot.slane %v8800_v52, 6  ;;  %v1466_v31 = vor.u32 %v6682_v56, %v1464_v63  ;;  %v1470_v33 = vor.u32 %v1469_v51, %v1468_v38  ;;  %v6160_v41 = vld [vmem:[#allocation2 + $0x484] ss:$36 sps:$4 sm:$0xff]   ;;  %1097 = vst [vmem:[#allocation2 + $0x4cc] sm:$0xf] %v1027_v10  ;;  %v5349_v56 = vcombine.low %v2244_v47, %v2249_v45 }
  0xfb   : > { %v1474_v1 = vrot.slane %v8801_v4, 7  ;;  %2023 = vst [vmem:[#allocation2 + $0x430] sm:$0xf] %v1027_v10  ;;  %v5201_v4 = vrot.slane %v6653_v17, 11  ;;  %v1732_v51 = vrot.slane %v6658_v26, 7  ;;  %3809 = vmatprep.mubr.bf16.mxu1 %v6160_v41  ;;  %v1390_v10 = vsel %vm6689_vm7, %v1388_v50, %v1389_v55 }
  0xfc   : > { %v1467_v63 = vrot.slane %v1466_v31, 4  ;;  %v1472_v38 = vrot.slane %v1470_v33, 4  ;;  %v6162_v19 = vld [vmem:[#allocation2 + $0x48c] ss:$36 sps:$4 sm:$0xff]   ;;  %3810 = vmatmul.mubr.bf16.gmra.mrb[64].mxu1 %v5349_v56  ;;  %1460 = vst [vmem:[#allocation2 + $0x4d4] sm:$0xf] %v1390_v10 }
  0xfd   : > { %v1475_v52 = vor.u32 %v1474_v1, %v1473_v12  ;;  %v1730_v12 = vsel %vm7638_vm14, %v5201_v4, %v1729_v60  ;;  %v1731_v1 = vrot.slane %v1729_v60, 4  ;;  %v6165_v35 = vld [vmem:[#allocation2 + $0x488] ss:$36 sps:$4 sm:$0xff]   ;;  %v8806_v26 = vshrl.u32 %v6660_v27, 16  ;;  %3985 = vmatprep.mubr.bf16.mxu0 %v6162_v19 }
  0xfe   : > { %v1471_v17 = vsel %vm7631_vm12, %v1467_v63, %v1470_v33  ;;  %1868 = vst [vmem:[#allocation2 + $0x14] sm:$0xf] %v1730_v12  ;;  %v8807_v50 = vshll.u32 %v6660_v27, 16  ;;  %v8808_v31 = vshrl.u32 %v6662_v28, 16  ;;  %v8809_v33 = vshll.u32 %v6662_v28, 16 }
  0xff   : > { %v1477_v23 = vrot.slane %v1475_v52, 4  ;;  %v1476_v22 = vsel %vm7631_vm12, %v1472_v38, %v1475_v52  ;;  %v1478_v0 = vrot.slane %v8806_v26, 6  ;;  %1689 = vst [vmem:[#allocation2 + $0x10] sm:$0xf] %v1471_v17  ;;  %v1733_v60 = vsel %vm7638_vm14, %v1731_v1, %v1732_v51  ;;  %3986 = vmatmul.mubr.bf16.gmra.mrb[64].mxu0 %v6165_v35 }
 0x100   : > { %1690 = vst [vmem:[#allocation2 + $0x34] sm:$0xf] %v1476_v22  ;;  %v1479_v47 = vrot.slane %v8807_v50, 7  ;;  %v1483_v45 = vrot.slane %v8808_v31, 6  ;;  %v1484_v41 = vrot.slane %v8809_v33, 7  ;;  %v1734_v55 = vrot.slane %v1732_v51, 4 }
 0x101   : > { %1869 = vst [vmem:[#allocation2 + $0x38] sm:$0xf] %v1733_v60  ;;  %v1735_v52 = vrot.slane %v6660_v27, 7  ;;  %v1738_v4 = vrot.slane %v6662_v28, 7  ;;  %v8810_v56 = vshrl.u32 %v6749_v37, 16  ;;  %v8811_v12 = vshll.u32 %v6749_v37, 16 }
 0x102   : > { %v1480_v38 = vor.u32 %v1479_v47, %v1478_v0  ;;  %v1485_v10 = vor.u32 %v1484_v41, %v1483_v45  ;;  %v8812_v17 = vshrl.u32 %v6763_v54, 16  ;;  %v2254_v26 = vld [vmem:[#allocation2 + $0x4c8] sm:$0xff]  ;;  %v8813_v27 = vshll.u32 %v6763_v54, 16 }
 0x103   : > { %v1488_v63 = vrot.slane %v8810_v56, 6  ;;  %v1489_v1 = vrot.slane %v8811_v12, 7  ;;  %v1736_v19 = vsel %vm7638_vm14, %v1734_v55, %v1735_v52  ;;  %v1737_v51 = vrot.slane %v1735_v52, 4  ;;  %v6180_v0 = vld [vmem:[#allocation2 + $0x184] ss:$36 sps:$4 sm:$0xff]   ;;  %v2255_v52 = vld [vmem:[#allocation2 + $0x4d0] sm:$0xff] }
 0x104   : > { %v1493_v22 = vrot.slane %v8812_v17, 6  ;;  %v1494_v28 = vrot.slane %v8813_v27, 7  ;;  %v1740_v60 = vrot.slane %v1738_v4, 4  ;;  %v5359_v50 = vcombine.high %v2254_v26, %v2254_v26  ;;  %1870 = vst [vmem:[#allocation2 + $0x5c] sm:$0xf] %v1736_v19 }
 0x105   : > { %v5358_v31 = vcombine.low %v2254_v26, %v2254_v26  ;;  %v1481_v47 = vsel %vm7631_vm12, %v1477_v23, %v1480_v38  ;;  %v1482_v45 = vrot.slane %v1480_v38, 4  ;;  %v1739_v35 = vsel %vm7638_vm14, %v1737_v51, %v1738_v4 }
 0x106   : > { %1691 = vst [vmem:[#allocation2 + $0x58] sm:$0xf] %v1481_v47  ;;  %v1487_v33 = vrot.slane %v1485_v10, 4  ;;  %v1490_v41 = vor.u32 %v1489_v1, %v1488_v63  ;;  %v1495_v55 = vor.u32 %v1494_v28, %v1493_v22  ;;  %3817 = vmatprep.mubr.bf16.mxu1 %v5359_v50  ;;  %1871 = vst [vmem:[#allocation2 + $0x80] sm:$0xf] %v1739_v35  ;;  %v1741_v12 = vrot.slane %v6749_v37, 7 }
 0x107   : > { %v1486_v56 = vsel %vm7631_vm12, %v1482_v45, %v1485_v10  ;;  %v1744_v17 = vrot.slane %v6763_v54, 7  ;;  %v8814_v23 = vshrl.u32 %v6824_v25, 16  ;;  %v5361_v26 = vcombine.high %v2255_v52, %v2255_v52  ;;  %3818 = vmatmul.mubr.bf16.gmra.mrb[68].mxu1 %v5358_v31  ;;  %v6178_v35 = vld [vmem:[#allocation2 + $0x180] ss:$36 sps:$4 sm:$0xff]  }
 0x108   : > { %v5360_v19 = vcombine.low %v2255_v52, %v2255_v52  ;;  %1692 = vst [vmem:[#allocation2 + $0x7c] sm:$0xf] %v1486_v56  ;;  %v1491_v4 = vsel %vm7631_vm12, %v1487_v33, %v1490_v41  ;;  %v1492_v63 = vrot.slane %v1490_v41, 4  ;;  %v6177_v1 = vld [vmem:[#allocation2 + $0x14] ss:$36 sps:$4 sm:$0xff]   ;;  %4249 = vmatprep.mubr.bf16.mxu1 %v6180_v0  ;;  %v1742_v10 = vsel %vm7638_vm14, %v1740_v60, %v1741_v12 }
 0x109   : > { %v1498_v38 = vrot.slane %v8814_v23, 6  ;;  %1693 = vst [vmem:[#allocation2 + $0xa0] sm:$0xf] %v1491_v4  ;;  %v1743_v37 = vrot.slane %v1741_v12, 4  ;;  %3993 = vmatprep.mubr.bf16.mxu0 %v5361_v26  ;;  %1872 = vst [vmem:[#allocation2 + $0xa4] sm:$0xf] %v1742_v10 }
 0x10a   : > { %v1496_v54 = vsel %vm7631_vm12, %v1492_v63, %v1495_v55  ;;  %v1497_v22 = vrot.slane %v1495_v55, 4  ;;  %v8815_v51 = vshll.u32 %v6824_v25, 16  ;;  %v8816_v28 = vshrl.u32 %v6832_v30, 16  ;;  %3994 = vmatmul.mubr.bf16.gmra.mrb[68].mxu0 %v5360_v19  ;;  %v6183_v23 = vld [vmem:[#allocation2 + $0x1cc] ss:$36 sps:$4 sm:$0xff]  }
 0x10b   : > { %1694 = vst [vmem:[#allocation2 + $0xc4] sm:$0xf] %v1496_v54  ;;  %v1745_v31 = vsel %vm7638_vm14, %v1743_v37, %v1744_v17  ;;  %v8817_v0 = vshll.u32 %v6832_v30, 16  ;;  %v1746_v47 = vrot.slane %v1744_v17, 4  ;;  %v1747_v45 = vrot.slane %v6824_v25, 7  ;;  %4033 = vmatprep.mubr.bf16.mxu0 %v6177_v1  ;;  %v6230_v1 = vld [vmem:[%s8711_s3 + $0x208] sm:$0xff]  }
 0x10c   : > { %v1499_v27 = vrot.slane %v8815_v51, 7  ;;  %v1503_v50 = vrot.slane %v8816_v28, 6  ;;  %1873 = vst [vmem:[#allocation2 + $0xc8] sm:$0xf] %v1745_v31  ;;  %v1750_v41 = vrot.slane %v6832_v30, 7  ;;  %v8818_v55 = vshrl.u32 %v6893_v53, 16 }
 0x10d   : > { %v1504_v60 = vrot.slane %v8817_v0, 7  ;;  %v8819_v56 = vshll.u32 %v6893_v53, 16  ;;  %v1748_v17 = vsel %vm7638_vm14, %v1746_v47, %v1747_v45  ;;  %v1749_v4 = vrot.slane %v1747_v45, 4  ;;  %v6181_v0 = vld [vmem:[#allocation2 + $0x5c] ss:$36 sps:$4 sm:$0xff]  }
 0x10e   : > { %v1500_v33 = vor.u32 %v1499_v27, %v1498_v38  ;;  %v1508_v52 = vrot.slane %v8818_v55, 6  ;;  %v8820_v25 = vshrl.u32 %v6895_v29, 16  ;;  %1874 = vst [vmem:[#allocation2 + $0xec] sm:$0xf] %v1748_v17  ;;  %v8821_v10 = vshll.u32 %v6895_v29, 16 }
 0x10f   : > { %v1509_v12 = vrot.slane %v8819_v56, 7  ;;  %v1505_v26 = vor.u32 %v1504_v60, %v1503_v50  ;;  %v1751_v54 = vsel %vm7638_vm14, %v1749_v4, %v1750_v41  ;;  %v6175_v27 = vld [vmem:[#allocation2 + $0x10] ss:$36 sps:$4 sm:$0xff]   ;;  %4250 = vmatmul.mubr.bf16.vlgmr.msra.gmra.mrb[72].mxu1 %v6178_v35  ;;  %v1752_v31 = vrot.slane %v1750_v41, 4 }
 0x110   : > { %v1513_v19 = vrot.slane %v8820_v25, 6  ;;  %v1501_v38 = vsel %vm7631_vm12, %v1497_v22, %v1500_v33  ;;  %v1502_v30 = vrot.slane %v1500_v33, 4  ;;  %v1514_v37 = vrot.slane %v8821_v10, 7  ;;  %1875 = vst [vmem:[#allocation2 + $0x110] sm:$0xf] %v1751_v54  ;;  %4257 = vmatprep.mubr.bf16.mxu1 %v6183_v23  ;;  %5779 = vmatpush3.bf16.msra.mxu1 %v7391_v32  ;;  %v6243_v32 = vld [vmem:[%s8711_s3 + $0x210] sm:$0xff]  }
 0x111   : > { %v1510_v63 = vor.u32 %v1509_v12, %v1508_v52  ;;  %1695 = vst [vmem:[#allocation2 + $0xe8] sm:$0xf] %v1501_v38  ;;  %v1507_v51 = vrot.slane %v1505_v26, 4  ;;  %v1753_v47 = vrot.slane %v6893_v53, 7  ;;  %v1756_v45 = vrot.slane %v6895_v29, 7  ;;  %5780 = vmatprep.subr.bf16.mxu1 %v6230_v1 }
 0x112   : > { %v1506_v22 = vsel %vm7631_vm12, %v1502_v30, %v1505_v26  ;;  %v1515_v50 = vor.u32 %v1514_v37, %v1513_v19  ;;  %v8822_v33 = vshrl.u32 %v6956_v44, 16  ;;  %v8823_v52 = vshll.u32 %v6956_v44, 16  ;;  %4034 = vmatmul.mubr.bf16.vlgmr.msra.gmra.mrb[0].mxu0 %v6175_v27  ;;  %v6186_v26 = vld [vmem:[#allocation2 + $0x1c8] ss:$36 sps:$4 sm:$0xff]   ;;  %v6310_v30 = vld [vmem:[%s8711_s3 + $0x180] sm:$0xff]  }
 0x113   : > { %v1512_v28 = vrot.slane %v1510_v63, 4  ;;  %1696 = vst [vmem:[#allocation2 + $0x10c] sm:$0xf] %v1506_v22  ;;  %v1511_v60 = vsel %vm7631_vm12, %v1507_v51, %v1510_v63  ;;  %v8824_v12 = vshrl.u32 %v6965_v39, 16  ;;  %v1754_v53 = vsel %vm7638_vm14, %v1752_v31, %v1753_v47  ;;  %4178 = vmatpush1.bf16.msra.mxu0 %v6310_v30  ;;  %4041 = vmatprep.mubr.bf16.mxu0 %v6181_v0  ;;  %v6189_v63 = vld [vmem:[#allocation2 + $0x214] ss:$36 sps:$4 sm:$0xff]  }
 0x114   : > { %v1518_v35 = vrot.slane %v8822_v33, 6  ;;  %1697 = vst [vmem:[#allocation2 + $0x130] sm:$0xf] %v1511_v60  ;;  %v1517_v41 = vrot.slane %v1515_v50, 4  ;;  %v1519_v56 = vrot.slane %v8823_v52, 7  ;;  %v1755_v29 = vrot.slane %v1753_v47, 4  ;;  %5781 = vmatpush3.bf16.msra.mxu1 %v6230_v1 }
 0x115   : > { %v1516_v55 = vsel %vm7631_vm12, %v1512_v28, %v1515_v50  ;;  %v1523_v23 = vrot.slane %v8824_v12, 6  ;;  %1876 = vst [vmem:[#allocation2 + $0x134] sm:$0xf] %v1754_v53  ;;  %v8825_v4 = vshll.u32 %v6965_v39, 16  ;;  %v1758_v19 = vrot.slane %v1756_v45, 4  ;;  %5782 = vmatprep.subr.bf16.mxu1 %v6243_v32  ;;  %v7778_v30 = vld [vmem:[%s6488_s30 + $0x98] sm:$0xff]  }
 0x116   : > { %1698 = vst [vmem:[#allocation2 + $0x154] sm:$0xf] %v1516_v55  ;;  %v1520_v17 = vor.u32 %v1519_v56, %v1518_v35  ;;  %v1759_v38 = vrot.slane %v6956_v44, 7  ;;  %v1757_v10 = vsel %vm7638_vm14, %v1755_v29, %v1756_v45  ;;  %v1762_v37 = vrot.slane %v6965_v39, 7  ;;  %v6244_v55 = vld [vmem:[%s8711_s3 + $0x218] sm:$0xff]   ;;  %v6311_v56 = vld [vmem:[%s8711_s3 + $0x188] sm:$0xff]  }
 0x117   : > { %v1524_v25 = vrot.slane %v8825_v4, 7  ;;  %v8826_v54 = vshrl.u32 %v7047_v8, 16  ;;  %v8827_v27 = vshll.u32 %v7047_v8, 16  ;;  %v8828_v28 = vmov 0   ;;  %1877 = vst [vmem:[#allocation2 + $0x158] sm:$0xf] %v1757_v10  ;;  %4258 = vmatmul.mubr.bf16.gmra.mrb[76].mxu1 %v6186_v26 }
 0x118   : > { %4179 = vmatprep.subr.bf16.mxu0 %v8828_v28  ;;  %v1521_v44 = vsel %vm7631_vm12, %v1517_v41, %v1520_v17  ;;  %v1522_v50 = vrot.slane %v1520_v17, 4  ;;  %v1760_v0 = vsel %vm7638_vm14, %v1758_v19, %v1759_v38  ;;  %v1761_v39 = vrot.slane %v1759_v38, 4  ;;  %v6185_v41 = vld [vmem:[#allocation2 + $0x58] ss:$36 sps:$4 sm:$0xff]   ;;  %v6187_v12 = vld [vmem:[#allocation2 + $0xa4] ss:$36 sps:$4 sm:$0xff]   ;;  %4265 = vmatprep.mubr.bf16.mxu1 %v6189_v63 }
 0x119   : > { %v1528_v51 = vrot.slane %v8826_v54, 6  ;;  %v1529_v22 = vrot.slane %v8827_v27, 7  ;;  %v1525_v31 = vor.u32 %v1524_v25, %v1523_v23  ;;  %1699 = vst [vmem:[#allocation2 + $0x178] sm:$0xf] %v1521_v44  ;;  %1878 = vst [vmem:[#allocation2 + $0x17c] sm:$0xf] %v1760_v0  ;;  %4180 = vmatpush1.bf16.msra.mxu0 %v6311_v56  ;;  %5783 = vmatpush3.bf16.msra.mxu1 %v6243_v32 }
 0x11a   : > { %v8829_v47 = vshrl.u32 %v7056_v62, 16  ;;  %v8830_v33 = vshll.u32 %v7056_v62, 16  ;;  %v1763_v23 = vsel %vm7638_vm14, %v1761_v39, %v1762_v37  ;;  %v1764_v17 = vrot.slane %v1762_v37, 4  ;;  %4181 = vmatprep.subr.bf16.mxu0 %v8828_v28  ;;  %5784 = vmatprep.subr.bf16.mxu1 %v6244_v55  ;;  %v6312_v0 = vld [vmem:[%s8711_s3 + $0x190] sm:$0xff]   ;;  %v6195_v39 = vld [vmem:[#allocation2 + $0x25c] ss:$36 sps:$4 sm:$0xff]  }
 0x11b   : > { %v1530_v60 = vor.u32 %v1529_v22, %v1528_v51  ;;  %v1526_v1 = vsel %vm7631_vm12, %v1522_v50, %v1525_v31  ;;  %v1527_v52 = vrot.slane %v1525_v31, 4  ;;  %1879 = vst [vmem:[#allocation2 + $0x1a0] sm:$0xf] %v1763_v23  ;;  %v1765_v4 = vrot.slane %v7047_v8, 7  ;;  %v6251_v8 = vld [vmem:[%s8711_s3 + $0x220] sm:$0xff]   ;;  %4042 = vmatmul.mubr.bf16.gmra.mrb[4].mxu0 %v6185_v41 }
 0x11c   : > { %v1533_v45 = vrot.slane %v8829_v47, 6  ;;  %v1534_v35 = vrot.slane %v8830_v33, 7  ;;  %1700 = vst [vmem:[#allocation2 + $0x19c] sm:$0xf] %v1526_v1  ;;  %v1768_v25 = vrot.slane %v7056_v62, 7  ;;  %v8831_v19 = vshrl.u32 %v7108_v16, 16  ;;  %4049 = vmatprep.mubr.bf16.mxu0 %v6187_v12 }
 0x11d   : > { %v1532_v53 = vrot.slane %v1530_v60, 4  ;;  %v1531_v26 = vsel %vm7631_vm12, %v1527_v52, %v1530_v60  ;;  %v8832_v37 = vshll.u32 %v7108_v16, 16  ;;  %v8833_v51 = vshrl.u32 %v7117_v43, 16  ;;  %v6192_v62 = vld [vmem:[#allocation2 + $0x210] ss:$36 sps:$4 sm:$0xff]   ;;  %4182 = vmatpush1.bf16.msra.mxu0 %v6312_v0  ;;  %5785 = vmatpush3.bf16.msra.mxu1 %v6244_v55 }
 0x11e   : > { %v1535_v29 = vor.u32 %v1534_v35, %v1533_v45  ;;  %v1538_v38 = vrot.slane %v8831_v19, 6  ;;  %1701 = vst [vmem:[#allocation2 + $0x1c0] sm:$0xf] %v1531_v26  ;;  %v1766_v32 = vsel %vm7638_vm14, %v1764_v17, %v1765_v4  ;;  %v1767_v22 = vrot.slane %v1765_v4, 4  ;;  %4183 = vmatprep.subr.bf16.mxu0 %v8828_v28  ;;  %5786 = vmatprep.subr.bf16.mxu1 %v6251_v8  ;;  %v6191_v17 = vld [vmem:[#allocation2 + $0xa0] ss:$36 sps:$4 sm:$0xff]  }
 0x11f   : > { %v1539_v54 = vrot.slane %v8832_v37, 7  ;;  %v1543_v27 = vrot.slane %v8833_v51, 6  ;;  %v8834_v44 = vshll.u32 %v7117_v43, 16  ;;  %v1770_v31 = vrot.slane %v1768_v25, 4  ;;  %1880 = vst [vmem:[#allocation2 + $0x1c4] sm:$0xf] %v1766_v32  ;;  %4266 = vmatmul.mubr.bf16.gmra.mrb[80].mxu1 %v6192_v62 }
 0x120   : > { %v1536_v63 = vsel %vm7631_vm12, %v1532_v53, %v1535_v29  ;;  %v1537_v10 = vrot.slane %v1535_v29, 4  ;;  %v1771_v47 = vrot.slane %v7108_v16, 7  ;;  %v5630_v45 = vunpack.c.l.bf16 %v7778_v30  ;;  %v6252_v29 = vld [vmem:[%s8711_s3 + $0x228] sm:$0xff]   ;;  %4273 = vmatprep.mubr.bf16.mxu1 %v6195_v39 }
 0x121   : > { %1702 = vst [vmem:[#allocation2 + $0x1e4] sm:$0xf] %v1536_v63  ;;  %v1544_v50 = vrot.slane %v8834_v44, 7  ;;  %v1540_v60 = vor.u32 %v1539_v54, %v1538_v38  ;;  %v5631_v33 = vunpack.c.h.bf16 %v7778_v30  ;;  %v1769_v35 = vsel %vm7638_vm14, %v1767_v22, %v1768_v25  ;;  %v6193_v63 = vld [vmem:[#allocation2 + $0xec] ss:$36 sps:$4 sm:$0xff]   ;;  %5787 = vmatpush3.bf16.msra.mxu1 %v6251_v8 }
 0x122   : > { %v1774_v1 = vrot.slane %v7117_v43, 7  ;;  %v8835_v52 = vshrl.u32 %v7182_v15, 16  ;;  %1881 = vst [vmem:[#allocation2 + $0x1e8] sm:$0xf] %v1769_v35  ;;  %v1772_v23 = vsel %vm7638_vm14, %v1770_v31, %v1771_v47  ;;  %v1773_v53 = vrot.slane %v1771_v47, 4  ;;  %5788 = vmatprep.subr.bf16.mxu1 %v6252_v29 }
 0x123   : > { %v1545_v41 = vor.u32 %v1544_v50, %v1543_v27  ;;  %v1541_v16 = vsel %vm7631_vm12, %v1537_v10, %v1540_v60  ;;  %v1542_v12 = vrot.slane %v1540_v60, 4  ;;  %1882 = vst [vmem:[#allocation2 + $0x20c] sm:$0xf] %v1772_v23  ;;  %v8836_v55 = vshll.u32 %v7182_v15, 16  ;;  %v6313_v10 = vld [vmem:[%s8711_s3 + $0x198] sm:$0xff]   ;;  %4050 = vmatmul.mubr.bf16.gmra.mrb[8].mxu0 %v6191_v17 }
 0x124   : > { %v1548_v56 = vrot.slane %v8835_v52, 6  ;;  %1703 = vst [vmem:[#allocation2 + $0x208] sm:$0xf] %v1541_v16  ;;  %v8837_v4 = vshrl.u32 %v7190_v2, 16  ;;  %v8838_v19 = vshll.u32 %v7190_v2, 16  ;;  %4184 = vmatpush1.bf16.msra.mxu0 %v6313_v10  ;;  %v1775_v54 = vsel %vm7638_vm14, %v1773_v53, %v1774_v1  ;;  %4057 = vmatprep.mubr.bf16.mxu0 %v6193_v63  ;;  %v6314_v16 = vld [vmem:[%s8711_s3 + $0x1a0] sm:$0xff]  }
 0x125   : > { %v1547_v43 = vrot.slane %v1545_v41, 4  ;;  %v1549_v26 = vrot.slane %v8836_v55, 7  ;;  %v1546_v37 = vsel %vm7631_vm12, %v1542_v12, %v1545_v41  ;;  %v1776_v51 = vrot.slane %v1774_v1, 4  ;;  %4185 = vmatprep.subr.bf16.mxu0 %v8828_v28  ;;  %1883 = vst [vmem:[#allocation2 + $0x230] sm:$0xf] %v1775_v54  ;;  %5789 = vmatpush3.bf16.msra.mxu1 %v6252_v29  ;;  %v6259_v63 = vld [vmem:[%s8711_s3 + $0x238] sm:$0xff]  }
 0x126   : > { %v1553_v25 = vrot.slane %v8837_v4, 6  ;;  %v1554_v38 = vrot.slane %v8838_v19, 7  ;;  %v401_v27 = vmul.f32 %v5630_v45, %v6591_v18  ;;  %1704 = vst [vmem:[#allocation2 + $0x22c] sm:$0xf] %v1546_v37  ;;  %v1777_v22 = vrot.slane %v7182_v15, 7  ;;  %v6258_v15 = vld [vmem:[%s8711_s3 + $0x230] sm:$0xff]  }
 0x127   : > { %v1550_v62 = vor.u32 %v1549_v26, %v1548_v56  ;;  %v1780_v44 = vrot.slane %v7190_v2, 7  ;;  %v8839_v50 = vshrl.u32 %v7246_v14, 16  ;;  %v8840_v0 = vshll.u32 %v7246_v14, 16  ;;  %v6198_v2 = vld [vmem:[#allocation2 + $0x258] ss:$36 sps:$4 sm:$0xff]   ;;  %5790 = vmatprep.subr.bf16.mxu1 %v6258_v15 }
 0x128   : > { %v1555_v32 = vor.u32 %v1554_v38, %v1553_v25  ;;  %v8841_v60 = vshrl.u32 %v7248_v3, 16  ;;  %v8842_v45 = vshll.u32 %v7248_v3, 16  ;;  %v1778_v1 = vsel %vm7638_vm14, %v1776_v51, %v1777_v22  ;;  %v6201_v56 = vld [vmem:[#allocation2 + $0x2a4] ss:$36 sps:$4 sm:$0xff]   ;;  %4186 = vmatpush1.bf16.msra.mxu0 %v6314_v16  ;;  %4274 = vmatmul.mubr.bf16.gmra.mrb[84].mxu1 %v6198_v2  ;;  %v6207_v16 = vld [vmem:[#allocation2 + $0x2ec] ss:$36 sps:$4 sm:$0xff]  }
 0x129   : > { %v1558_v31 = vrot.slane %v8839_v50, 6  ;;  %v1559_v39 = vrot.slane %v8840_v0, 7  ;;  %v1551_v8 = vsel %vm7631_vm12, %v1547_v43, %v1550_v62  ;;  %v1552_v41 = vrot.slane %v1550_v62, 4  ;;  %1884 = vst [vmem:[#allocation2 + $0x254] sm:$0xf] %v1778_v1  ;;  %4187 = vmatprep.subr.bf16.mxu0 %v8828_v28  ;;  %4281 = vmatprep.mubr.bf16.mxu1 %v6201_v56 }
 0x12a   : > { %v1563_v47 = vrot.slane %v8841_v60, 6  ;;  %v1564_v35 = vrot.slane %v8842_v45, 7  ;;  %v1779_v52 = vrot.slane %v1777_v22, 4  ;;  %1705 = vst [vmem:[#allocation2 + $0x250] sm:$0xf] %v1551_v8  ;;  %v1557_v12 = vrot.slane %v1555_v32, 4  ;;  %5791 = vmatpush3.bf16.msra.mxu1 %v6258_v15 }
 0x12b   : > { %v1560_v23 = vor.u32 %v1559_v39, %v1558_v31  ;;  %v1782_v17 = vrot.slane %v1780_v44, 4  ;;  %v1556_v43 = vsel %vm7631_vm12, %v1552_v41, %v1555_v32  ;;  %v1783_v26 = vrot.slane %v7246_v14, 7  ;;  %v6197_v10 = vld [vmem:[#allocation2 + $0xe8] ss:$36 sps:$4 sm:$0xff]   ;;  %v317_v8 = vld [vmem:[%s6488_s30 + $0xa0] sm:$0x1]  ;;  %5792 = vmatprep.subr.bf16.mxu1 %v6259_v63 }
 0x12c   : > { %v1565_v53 = vor.u32 %v1564_v35, %v1563_v47  ;;  %v1781_v55 = vsel %vm7638_vm14, %v1779_v52, %v1780_v44  ;;  %1706 = vst [vmem:[#allocation2 + $0x274] sm:$0xf] %v1556_v43  ;;  %v1786_v19 = vrot.slane %v7248_v3, 7  ;;  %v8843_v37 = vshrl.u32 %v7295_v59, 16  ;;  %v6199_v3 = vld [vmem:[#allocation2 + $0x134] ss:$36 sps:$4 sm:$0xff]   ;;  %4058 = vmatmul.mubr.bf16.gmra.mrb[12].mxu0 %v6197_v10 }
 0x12d   : > { %1885 = vst [vmem:[#allocation2 + $0x278] sm:$0xf] %v1781_v55  ;;  %v1561_v4 = vsel %vm7631_vm12, %v1557_v12, %v1560_v23  ;;  %v1562_v25 = vrot.slane %v1560_v23, 4  ;;  %v1784_v14 = vsel %vm7638_vm14, %v1782_v17, %v1783_v26  ;;  %v1785_v29 = vrot.slane %v1783_v26, 4  ;;  %v6315_v32 = vld [vmem:[%s8711_s3 + $0x1a8] sm:$0xff]   ;;  %4065 = vmatprep.mubr.bf16.mxu0 %v6199_v3  ;;  %v6317_v3 = vld [vmem:[%s8711_s3 + $0x1b8] sm:$0xff]  }
 0x12e   : > { %v1567_v38 = vrot.slane %v1565_v53, 4  ;;  %1707 = vst [vmem:[#allocation2 + $0x298] sm:$0xf] %v1561_v4  ;;  %v1568_v54 = vrot.slane %v8843_v37, 6  ;;  %v8844_v51 = vshll.u32 %v7295_v59, 16  ;;  %4188 = vmatpush1.bf16.msra.mxu0 %v6315_v32  ;;  %v8845_v44 = vshrl.u32 %v7299_v48, 16  ;;  %5793 = vmatpush3.bf16.msra.mxu1 %v6259_v63 }
 0x12f   : > { %v1566_v22 = vsel %vm7631_vm12, %v1562_v25, %v1565_v53  ;;  %1886 = vst [vmem:[#allocation2 + $0x29c] sm:$0xf] %v1784_v14  ;;  %v402_v31 = vmul.f32 %v5631_v33, %v6591_v18  ;;  %v7876_v0 = vadd.f32 %v6617_v36, %v401_v27  ;;  %4189 = vmatprep.subr.bf16.mxu0 %v8828_v28  ;;  %v8846_v47 = vshll.u32 %v7299_v48, 16  ;;  %v6204_v41 = vld [vmem:[#allocation2 + $0x2a0] ss:$36 sps:$4 sm:$0xff]   ;;  %s6009_s30 = smul.u32 140, %s8903_s22 }
 0x130   : > { %v1569_v62 = vrot.slane %v8844_v51, 7  ;;  %v1573_v50 = vrot.slane %v8845_v44, 6  ;;  %1708 = vst [vmem:[#allocation2 + $0x2bc] sm:$0xf] %v1566_v22  ;;  %v1787_v39 = vsel %vm7638_vm14, %v1785_v29, %v1786_v19  ;;  %v1788_v35 = vrot.slane %v1786_v19, 4  ;;  %4282 = vmatmul.mubr.bf16.gmra.mrb[88].mxu1 %v6204_v41 }
 0x131   : > { %v1574_v45 = vrot.slane %v8846_v47, 7  ;;  %1887 = vst [vmem:[#allocation2 + $0x2c0] sm:$0xf] %v1787_v39  ;;  %v1789_v2 = vrot.slane %v7295_v59, 7  ;;  %v1792_v30 = vrot.slane %v7299_v48, 7  ;;  %v1628_v33 = vshrl.u32 %v7581_v24, 16  ;;  %4289 = vmatprep.mubr.bf16.mxu1 %v6207_v16  ;;  %s8454_s24 = scalar_lea.vmem %s8713_s5, %s6009_s30 }
 0x132   : > { %v1570_v60 = vor.u32 %v1569_v62, %v1568_v54  ;;  %v1636_v27 = vshrl.u32 %v7583_v21, 16  ;;  %v1639_v15 = vshll.u32 %v7583_v21, 16  ;;  %v6316_v48 = vld [vmem:[%s8711_s3 + $0x1b0] sm:$0xff]   ;;  %v1649_v23 = vshll.u32 %v7620_v5, 16  ;;  %v6210_v41 = vld [vmem:[#allocation2 + $0x2e8] ss:$36 sps:$4 sm:$0xff]  }
 0x133   : > { %v1575_v56 = vor.u32 %v1574_v45, %v1573_v50  ;;  %4190 = vmatpush1.bf16.msra.mxu0 %v6316_v48  ;;  %v1790_v59 = vsel %vm7638_vm14, %v1788_v35, %v1789_v2  ;;  %v1791_v12 = vrot.slane %v1789_v2, 4  ;;  %v1951_v53 = vrot.slane %v1628_v33, 4  ;;  %v6203_v4 = vld [vmem:[#allocation2 + $0x130] ss:$36 sps:$4 sm:$0xff]  }
 0x134   : > { %v1571_v1 = vsel %vm7631_vm12, %v1567_v38, %v1570_v60  ;;  %v1572_v52 = vrot.slane %v1570_v60, 4  ;;  %4191 = vmatprep.subr.bf16.mxu0 %v8828_v28  ;;  %1888 = vst [vmem:[#allocation2 + $0x2e4] sm:$0xf] %v1790_v59  ;;  %v1954_v43 = vrot.slane %v1639_v15, 5  ;;  %v447_v55 = vadd.f32 %v6617_v36, %v402_v31  ;;  %4066 = vmatmul.mubr.bf16.gmra.mrb[16].mxu0 %v6203_v4 }
 0x135   : > { %1709 = vst [vmem:[#allocation2 + $0x2e0] sm:$0xf] %v1571_v1  ;;  %v358_v26 = vunpack.c.l.bf16 %v317_v8  ;;  %v1793_v25 = vsel %vm7638_vm14, %v1791_v12, %v1792_v30  ;;  %v1952_v19 = vor.u32 %v1951_v53, %v7604_v6  ;;  %v1956_v38 = vrot.slane %v1636_v27, 4  ;;  %v6205_v6 = vld [vmem:[#allocation2 + $0x17c] ss:$36 sps:$4 sm:$0xff]  }
 0x136   : > { %v1576_v17 = vsel %vm7631_vm12, %v1572_v52, %v1575_v56  ;;  %v7912_v10 = vrot.slane %v1649_v23, 5  ;;  %1889 = vst [vmem:[#allocation2 + $0x308] sm:$0xf] %v1793_v25  ;;  %v1577_v14 = vrot.slane %v1575_v56, 4  ;;  %v8847_v29 = vshrl.u32 %v7344_v61, 16  ;;  %4073 = vmatprep.mubr.bf16.mxu0 %v6205_v6  ;;  %v6318_v56 = vld [vmem:[%s8711_s3 + $0x1c0] sm:$0xff]  }
 0x137   : > { %1710 = vst [vmem:[#allocation2 + $0x304] sm:$0xf] %v1576_v17  ;;  %v8848_v37 = vshll.u32 %v7344_v61, 16  ;;  %v8849_v51 = vshrl.u32 %v7354_v9, 16  ;;  %4192 = vmatpush1.bf16.msra.mxu0 %v6317_v3  ;;  %v1953_v32 = vrot.slane %v1952_v19, 4  ;;  %v1957_v22 = vor.u32 %v1956_v38, %v1954_v43 }
 0x138   : > { %v1578_v63 = vrot.slane %v8847_v29, 6  ;;  %v8850_v44 = vshll.u32 %v7354_v9, 16  ;;  %v1794_v31 = vrot.slane %v1792_v30, 4  ;;  %4193 = vmatprep.subr.bf16.mxu0 %v8828_v28  ;;  %v1795_v60 = vrot.slane %v7344_v61, 7  ;;  %v6209_v19 = vld [vmem:[#allocation2 + $0x178] ss:$36 sps:$4 sm:$0xff]   ;;  %4290 = vmatmul.mubr.bf16.gmra.mrb[92].mxu1 %v6210_v41 }
 0x139   : > { %v1579_v54 = vrot.slane %v8848_v37, 7  ;;  %v1583_v62 = vrot.slane %v8849_v51, 6  ;;  %v403_v47 = vmul.f32 %v6591_v18, %v358_v26  ;;  %v1955_v45 = vsel %vm6695_vm8, %v1953_v32, %v1954_v43  ;;  %v6213_v18 = vld [vmem:[#allocation2 + $0x334] ss:$36 sps:$4 sm:$0xff]   ;;  %v6211_v51 = vld [vmem:[#allocation2 + $0x1c4] ss:$36 sps:$4 sm:$0xff]  }
 0x13a   : > { %v1584_v50 = vrot.slane %v8850_v44, 7  ;;  %v1958_v35 = vrot.slane %v1957_v22, 4  ;;  %v1798_v8 = vrot.slane %v7354_v9, 7  ;;  %2024 = vst [vmem:[#allocation2 + $0x454] sm:$0xf] %v1955_v45  ;;  %v1796_v52 = vsel %vm7638_vm14, %v1794_v31, %v1795_v60  ;;  %4297 = vmatprep.mubr.bf16.mxu1 %v6213_v18 }
 0x13b   : > { %v1580_v39 = vor.u32 %v1579_v54, %v1578_v63  ;;  %v1797_v61 = vrot.slane %v1795_v60, 4  ;;  %4194 = vmatpush1.bf16.msra.mxu0 %v6318_v56  ;;  %1890 = vst [vmem:[#allocation2 + $0x32c] sm:$0xf] %v1796_v52  ;;  %v487_v16 = vmax.f32 %v7876_v0, 0.0  ;;  %v488_v48 = vmax.f32 %v447_v55, 0.0  ;;  %v6320_v52 = vld [vmem:[%s8711_s3 + $0x1d0] sm:$0xff]  }
 0x13c   : > { %v1585_v2 = vor.u32 %v1584_v50, %v1583_v62  ;;  %v1960_v9 = vsel %vm6695_vm8, %v1958_v35, %v7912_v10  ;;  %v1646_v59 = vshrl.u32 %v7620_v5, 16  ;;  %4195 = vmatprep.subr.bf16.mxu0 %v8828_v28  ;;  %v8851_v17 = vshrl.u32 %v7383_v49, 16  ;;  %v6319_v62 = vld [vmem:[%s8711_s3 + $0x1c8] sm:$0xff]   ;;  %4074 = vmatmul.mubr.bf16.gmra.mrb[20].mxu0 %v6209_v19  ;;  %v6216_v45 = vld [vmem:[#allocation2 + $0x330] ss:$36 sps:$4 sm:$0xff]  }
 0x13d   : > { %v1581_v30 = vsel %vm7631_vm12, %v1577_v14, %v1580_v39  ;;  %v1582_v1 = vrot.slane %v1580_v39, 4  ;;  %2025 = vst [vmem:[#allocation2 + $0x478] sm:$0xf] %v1960_v9  ;;  %v1799_v53 = vsel %vm7638_vm14, %v1797_v61, %v1798_v8  ;;  %v448_v26 = vadd.f32 %v6617_v36, %v403_v47  ;;  %4081 = vmatprep.mubr.bf16.mxu0 %v6211_v51 }
 0x13e   : > { %1711 = vst [vmem:[#allocation2 + $0x328] sm:$0xf] %v1581_v30  ;;  %v1588_v43 = vrot.slane %v8851_v17, 6  ;;  %1891 = vst [vmem:[#allocation2 + $0x350] sm:$0xf] %v1799_v53  ;;  %v7951_v0 = vpack.c.bf16 %v487_v16, %v487_v16  ;;  %v7953_v55 = vpack.c.bf16 %v488_v48, %v488_v48  ;;  %v1961_v4 = vrot.slane %v1646_v59, 4 }
 0x13f   : > { %v1586_v12 = vsel %vm7631_vm12, %v1582_v1, %v1585_v2  ;;  %v1587_v25 = vrot.slane %v1585_v2, 4  ;;  %v8852_v38 = vshll.u32 %v7383_v49, 16  ;;  %v8853_v29 = vshrl.u32 %v7393_v7, 16  ;;  %4196 = vmatpush1.bf16.msra.mxu0 %v6319_v62  ;;  %v6219_v30 = vld [vmem:[#allocation2 + $0x37c] ss:$36 sps:$4 sm:$0xff]  }
 0x140   : > { %1712 = vst [vmem:[#allocation2 + $0x34c] sm:$0xf] %v1586_v12  ;;  %v8854_v36 = vshll.u32 %v7393_v7, 16  ;;  %v1800_v54 = vrot.slane %v1798_v8, 4  ;;  %1946 = vst [vmem:[#allocation2 + $0x4bc] sm:$0xf] %v7951_v0  ;;  %v1962_v6 = vor.u32 %v1961_v4, %v7912_v10  ;;  %4197 = vmatprep.subr.bf16.mxu0 %v8828_v28  ;;  %4298 = vmatmul.mubr.bf16.gmra.mrb[96].mxu1 %v6216_v45 }
 0x141   : > { %v1589_v14 = vrot.slane %v8852_v38, 7  ;;  %v1593_v63 = vrot.slane %v8853_v29, 6  ;;  %v1965_v3 = vshll.u32 %v7951_v0, 16  ;;  %v1969_v32 = vshrl.u32 %v7951_v0, 16  ;;  %1947 = vst [vmem:[#allocation2 + $0x4e0] sm:$0xf] %v7953_v55  ;;  %4305 = vmatprep.mubr.bf16.mxu1 %v6219_v30 }
 0x142   : > { %v1594_v37 = vrot.slane %v8854_v36, 7  ;;  %v1975_v22 = vshll.u32 %v7953_v55, 16  ;;  %v1801_v31 = vrot.slane %v7383_v49, 7  ;;  %v1804_v39 = vrot.slane %v7393_v7, 7 }
 0x143   : > { %v1590_v44 = vor.u32 %v1589_v14, %v1588_v43  ;;  %v1963_v60 = vrot.slane %v1962_v6, 4  ;;  %v1967_v47 = vrot.slane %v1965_v3, 5  ;;  %v1971_v10 = vrot.slane %v1969_v32, 4  ;;  %4198 = vmatpush1.bf16.msra.mxu0 %v6320_v52  ;;  %v6215_v43 = vld [vmem:[#allocation2 + $0x1c0] ss:$36 sps:$4 sm:$0xff]  }
 0x144   : > { %v7973_v50 = vor.u32 %v1594_v37, %v1593_v63  ;;  %v1802_v8 = vsel %vm7638_vm14, %v1800_v54, %v1801_v31  ;;  %v1803_v41 = vrot.slane %v1801_v31, 4  ;;  %v1977_v7 = vrot.slane %v1975_v22, 5  ;;  %4199 = vmatprep.subr.bf16.mxu0 %v8828_v28  ;;  %v6217_v63 = vld [vmem:[#allocation2 + $0x20c] ss:$36 sps:$4 sm:$0xff]   ;;  %v6321_v54 = vld [vmem:[%s8711_s3 + $0x1d8] sm:$0xff]   ;;  %4082 = vmatmul.mubr.bf16.gmra.mrb[24].mxu0 %v6215_v43 }
 0x145   : > { %v1591_v35 = vsel %vm7631_vm12, %v1587_v25, %v1590_v44  ;;  %v1592_v2 = vrot.slane %v1590_v44, 4  ;;  %v1968_v49 = vsel %vm6695_vm8, %v1963_v60, %v1967_v47  ;;  %v1972_v1 = vor.u32 %v1971_v10, %v1967_v47  ;;  %1892 = vst [vmem:[#allocation2 + $0x374] sm:$0xf] %v1802_v8  ;;  %v6222_v6 = vld [vmem:[#allocation2 + $0x378] ss:$36 sps:$4 sm:$0xff]   ;;  %4089 = vmatprep.mubr.bf16.mxu0 %v6217_v63 }
 0x146   : > { %1713 = vst [vmem:[#allocation2 + $0x370] sm:$0xf] %v1591_v35  ;;  %v489_v61 = vmax.f32 %v448_v26, 0.0  ;;  %2026 = vst [vmem:[#allocation2 + $0x49c] sm:$0xf] %v1968_v49  ;;  %v1805_v56 = vsel %vm7638_vm14, %v1803_v41, %v1804_v39  ;;  %v1979_v9 = vshrl.u32 %v7953_v55, 16 }
 0x147   : > { %v1596_v18 = vsel %vm7631_vm12, %v1592_v2, %v7973_v50  ;;  %v1973_v16 = vrot.slane %v1972_v1, 4  ;;  %1893 = vst [vmem:[#allocation2 + $0x398] sm:$0xf] %v1805_v56  ;;  %v1597_v12 = vrot.slane %v7973_v50, 4  ;;  %v8855_v53 = vshrl.u32 %v7453_v58, 16  ;;  %4200 = vmatpush1.bf16.msra.mxu0 %v6321_v54  ;;  %v6322_v41 = vld [vmem:[%s8711_s3 + $0x1e0] sm:$0xff]  }
 0x148   : > { %1714 = vst [vmem:[#allocation2 + $0x394] sm:$0xf] %v1596_v18  ;;  %v7993_v48 = vpack.c.bf16 %v489_v61, %v489_v61  ;;  %v1981_v26 = vrot.slane %v1979_v9, 4  ;;  %v8856_v4 = vshll.u32 %v7453_v58, 16  ;;  %v8857_v19 = vshrl.u32 %v7458_v57, 16  ;;  %4201 = vmatprep.subr.bf16.mxu0 %v8828_v28  ;;  %v4531_v18 = vld [vmem:[%s8712_s4 + $0x10] sm:$0xff]  ;;  %4306 = vmatmul.mubr.bf16.gmra.mrb[100].mxu1 %v6222_v6 }
 0x149   : > { %v1598_v17 = vrot.slane %v8855_v53, 6  ;;  %v8858_v14 = vshll.u32 %v7458_v57, 16  ;;  %v1978_v36 = vsel %vm6695_vm8, %v1973_v16, %v1977_v7  ;;  %v1806_v51 = vrot.slane %v1804_v39, 4  ;;  %v6226_v50 = vld [vmem:[#allocation2 + $0x3c4] ss:$36 sps:$4 sm:$0xff]   ;;  %4576 = vperm.xlu1 %6020, %v4531_v18  }
 0x14a   : > { %v1599_v25 = vrot.slane %v8856_v4, 7  ;;  %v1603_v38 = vrot.slane %v8857_v19, 6  ;;  %v1985_v37 = vshll.u32 %v7993_v48, 16  ;;  %v1807_v62 = vrot.slane %v7453_v58, 7  ;;  %2027 = vst [vmem:[#allocation2 + $0x4c0] sm:$0xf] %v1978_v36  ;;  %4313 = vmatprep.mubr.bf16.mxu1 %v6226_v50 }
 0x14b   : > { %v1604_v29 = vrot.slane %v8858_v14, 7  ;;  %v1982_v3 = vor.u32 %v1981_v26, %v1977_v7  ;;  %v1810_v44 = vrot.slane %v7458_v57, 7  ;;  %v8859_v10 = vshrl.u32 %v7481_v20, 16  ;;  %v4529_v57 = vld [vmem:[%s8712_s4] sm:$0xff]  ;;  %4202 = vmatpush1.bf16.msra.mxu0 %v6322_v41  ;;  %v6224_v36 = vld [vmem:[#allocation2 + $0x254] ss:$36 sps:$4 sm:$0xff]  }
 0x14c   : > { %v1600_v32 = vor.u32 %v1599_v25, %v1598_v17  ;;  %v1987_v31 = vrot.slane %v1985_v37, 5  ;;  %v1808_v60 = vsel %vm7638_vm14, %v1806_v51, %v1807_v62  ;;  %v1809_v47 = vrot.slane %v1807_v62, 4  ;;  %4203 = vmatprep.subr.bf16.mxu0 %v8828_v28  ;;  %4566 = vperm.xlu0 %6019, %v4529_v57   ;;  %v6323_v62 = vld [vmem:[%s8711_s3 + $0x1e8] sm:$0xff]  }
 0x14d   : > { %v1605_v22 = vor.u32 %v1604_v29, %v1603_v38  ;;  %v1608_v39 = vrot.slane %v8859_v10, 6  ;;  %v1983_v58 = vrot.slane %v1982_v3, 4  ;;  %1894 = vst [vmem:[#allocation2 + $0x3bc] sm:$0xf] %v1808_v60  ;;  %v8860_v30 = vshll.u32 %v7481_v20, 16  ;;  %v4533_v10 = vld [vmem:[%s8712_s4 + $0x20] sm:$0xff] }
 0x14e   : > { %v1601_v45 = vsel %vm7631_vm12, %v1597_v12, %v1600_v32  ;;  %v1602_v35 = vrot.slane %v1600_v32, 4  ;;  %v1811_v8 = vsel %vm7638_vm14, %v1809_v47, %v1810_v44  ;;  %v8861_v1 = vshrl.u32 %v7489_v34, 16  ;;  %v6221_v12 = vld [vmem:[#allocation2 + $0x208] ss:$36 sps:$4 sm:$0xff]  }
 0x14f   : > { %v1607_v2 = vrot.slane %v1605_v22, 4  ;;  %1715 = vst [vmem:[#allocation2 + $0x3b8] sm:$0xf] %v1601_v45  ;;  %v1609_v49 = vrot.slane %v8860_v30, 7  ;;  %v8862_v52 = vshll.u32 %v7489_v34, 16  ;;  %v1988_v56 = vsel %vm6695_vm8, %v1983_v58, %v1987_v31  ;;  %4204 = vmatpush1.bf16.msra.mxu0 %v6323_v62 }
 0x150   : > { %v1613_v7 = vrot.slane %v8861_v1, 6  ;;  %v1606_v9 = vsel %vm7631_vm12, %v1602_v35, %v1605_v22  ;;  %1895 = vst [vmem:[#allocation2 + $0x3e0] sm:$0xf] %v1811_v8  ;;  %v1812_v16 = vrot.slane %v1810_v44, 4  ;;  %2028 = vst [vmem:[#allocation2 + $0x4e4] sm:$0xf] %v1988_v56  ;;  %4205 = vmatprep.subr.bf16.mxu0 %v8828_v28  ;;  %4571 = vperm.xlu0 %6019, %v4530_v11  }
 0x151   : > { %v1614_v61 = vrot.slane %v8862_v52, 7  ;;  %1716 = vst [vmem:[#allocation2 + $0x3dc] sm:$0xf] %v1606_v9  ;;  %v1610_v53 = vor.u32 %v1609_v49, %v1608_v39  ;;  %v1813_v43 = vrot.slane %v7481_v20, 7  ;;  %v1816_v26 = vrot.slane %v7489_v34, 7  ;;  %v4532_v34 = vld [vmem:[%s8712_s4 + $0x18] sm:$0xff]  ;;  %4090 = vmatmul.mubr.bf16.gmra.mrb[28].mxu0 %v6221_v12 }
 0x152   : > { %v8863_v4 = vshrl.u32 %v7545_v40, 16  ;;  %v8864_v19 = vshll.u32 %v7545_v40, 16  ;;  %v8865_v14 = vshrl.u32 %v7550_v42, 16  ;;  %v8866_v63 = vshll.u32 %v7550_v42, 16  ;;  %v6229_v44 = vld [vmem:[#allocation2 + $0x3c0] ss:$36 sps:$4 sm:$0xff]   ;;  %4581 = vperm.xlu1 %6020, %v4532_v34   ;;  %4097 = vmatprep.mubr.bf16.mxu0 %v6224_v36 }
 0x153   : > { %v1615_v17 = vor.u32 %v1614_v61, %v1613_v7  ;;  %v1611_v37 = vsel %vm7631_vm12, %v1607_v2, %v1610_v53  ;;  %v1612_v54 = vrot.slane %v1610_v53, 4  ;;  %v1814_v51 = vsel %vm7638_vm14, %v1812_v16, %v1813_v43  ;;  %v8076_v35 = vpop.f32.mrb[0].mxu1  ;;  %v6324_v7 = vld [vmem:[%s8711_s3 + $0x1f0] sm:$0xff]   ;;  %4314 = vmatmul.mubr.bf16.gmra.mrb[104].mxu1 %v6229_v44 }
 0x154   : > { %v1618_v25 = vrot.slane %v8863_v4, 6  ;;  %v1619_v38 = vrot.slane %v8864_v19, 7  ;;  %v1623_v29 = vrot.slane %v8865_v14, 6  ;;  %v1624_v20 = vrot.slane %v8866_v63, 7  ;;  %1717 = vst [vmem:[#allocation2 + $0x400] sm:$0xf] %v1611_v37  ;;  %4206 = vmatpush1.bf16.msra.mxu0 %v6324_v7  ;;  %4586 = vperm.xlu0 %6019, %v4533_v10  }
 0x155   : > { %v1815_v6 = vrot.slane %v1813_v43, 4  ;;  %1896 = vst [vmem:[#allocation2 + $0x404] sm:$0xf] %v1814_v51  ;;  %v1617_v3 = vrot.slane %v1615_v17, 4  ;;  %v1616_v50 = vsel %vm7631_vm12, %v1612_v54, %v1615_v17  ;;  %v1818_v31 = vrot.slane %v1816_v26, 4  ;;  %v3685_v41 = vpop.f32.mrb[1].mxu1  ;;  %4207 = vmatprep.subr.bf16.mxu0 %v8828_v28 }
 0x156   : > { %v1620_v32 = vor.u32 %v1619_v38, %v1618_v25  ;;  %v1625_v22 = vor.u32 %v1624_v20, %v1623_v29  ;;  %v1819_v60 = vrot.slane %v7545_v40, 7  ;;  %v1822_v47 = vrot.slane %v7550_v42, 7  ;;  %1718 = vst [vmem:[#allocation2 + $0x424] sm:$0xf] %v1616_v50  ;;  %v4534_v40 = vld [vmem:[%s8712_s4 + $0x28] sm:$0xff]  ;;  %v8092_v61 = vpop.f32.mrb[2].mxu1 }
 0x157   : > { %v1817_v39 = vsel %vm7638_vm14, %v1815_v6, %v1816_v26  ;;  %v6233_v42 = vld [vmem:[#allocation2 + $0x40c] ss:$36 sps:$4 sm:$0xff]   ;;  %v1630_v30 = vrot.slane %v1628_v33, 6  ;;  %v8867_v49 = vshll.u32 %v7581_v24, 16  ;;  %v1638_v18 = vrot.slane %v1636_v27, 6  ;;  %v3688_v9 = vpop.f32.mrb[3].mxu1  ;;  %4591 = vperm.xlu1 %6020, %v4534_v40  }
 0x158   : > { %v1621_v58 = vsel %vm7631_vm12, %v1617_v3, %v1620_v32  ;;  %v1622_v45 = vrot.slane %v1620_v32, 4  ;;  %v1627_v2 = vrot.slane %v1625_v22, 4  ;;  %1897 = vst [vmem:[#allocation2 + $0x428] sm:$0xf] %v1817_v39  ;;  %v1820_v57 = vsel %vm7638_vm14, %v1818_v31, %v1819_v60  ;;  %v6228_v33 = vld [vmem:[#allocation2 + $0x250] ss:$36 sps:$4 sm:$0xff]   ;;  %4321 = vmatprep.mubr.bf16.mxu1 %v6233_v42 }
 0x159   : > { %1719 = vst [vmem:[#allocation2 + $0x448] sm:$0xf] %v1621_v58  ;;  %v1821_v8 = vrot.slane %v1819_v60, 4  ;;  %v1631_v1 = vrot.slane %v8867_v49, 7  ;;  %1898 = vst [vmem:[#allocation2 + $0x44c] sm:$0xf] %v1820_v57  ;;  %4098 = vmatmul.mubr.bf16.gmra.mrb[32].mxu0 %v6228_v33 }
 0x15a   : > { %v1626_v52 = vsel %vm7631_vm12, %v1622_v45, %v1625_v22  ;;  %v4535_v12 = vld [vmem:[%s8712_s4 + $0x30] sm:$0xff]  ;;  %v1641_v27 = vrot.slane %v1639_v15, 7  ;;  %v1824_v53 = vrot.slane %v1822_v47, 4  ;;  %v1825_v28 = vrot.slane %v7581_v24, 7  ;;  %v4536_v43 = vld [vmem:[%s8712_s4 + $0x38] sm:$0xff]  ;;  %v4537_v37 = vld [vmem:[%s8712_s4 + $0x40] sm:$0xff] }
 0x15b   : > { %1720 = vst [vmem:[#allocation2 + $0x46c] sm:$0xf] %v1626_v52  ;;  %v1823_v56 = vsel %vm7638_vm14, %v1821_v8, %v1822_v47  ;;  %v1632_v16 = vor.u32 %v1631_v1, %v1630_v30  ;;  %v1828_v17 = vrot.slane %v7583_v21, 7  ;;  %v6231_v26 = vld [vmem:[#allocation2 + $0x29c] ss:$36 sps:$4 sm:$0xff]   ;;  %v1648_v25 = vrot.slane %v1646_v59, 6  ;;  %4596 = vperm.xlu0 %6019, %v4535_v12   ;;  %4601 = vperm.xlu1 %6020, %v4536_v43  }
 0x15c   : > { %1899 = vst [vmem:[#allocation2 + $0x470] sm:$0xf] %v1823_v56  ;;  %v1651_v15 = vrot.slane %v1649_v23, 7  ;;  %v6325_v19 = vld [vmem:[%s8711_s3 + $0x1f8] sm:$0xff]   ;;  %v1642_v38 = vor.u32 %v1641_v27, %v1638_v18  ;;  %v1826_v14 = vsel %vm7638_vm14, %v1824_v53, %v1825_v28  ;;  %v1827_v29 = vrot.slane %v1825_v28, 4  ;;  %v8131_v3 = vpop.f32.mrb[4].mxu1  ;;  %4105 = vmatprep.mubr.bf16.mxu0 %v6231_v26 }
 0x15d   : > { %v1633_v11 = vsel %vm7631_vm12, %v1627_v2, %v1632_v16  ;;  %v1634_v4 = vrot.slane %v1632_v16, 4  ;;  %4208 = vmatpush1.bf16.msra.mxu0 %v6325_v19  ;;  %v1830_v63 = vrot.slane %v1828_v17, 4  ;;  %1900 = vst [vmem:[#allocation2 + $0x494] sm:$0xf] %v1826_v14  ;;  %v1831_v59 = vrot.slane %v7620_v5, 7  ;;  %v4538_v31 = vld [vmem:[%s8712_s4 + $0x48] sm:$0xff] }
 0x15e   : > { %1721 = vst [vmem:[#allocation2 + $0x490] sm:$0xf] %v1633_v11  ;;  %v1652_v20 = vor.u32 %v1651_v15, %v1648_v25  ;;  %v8868_v34 = vrot.slane %v7581_v24, 5  ;;  %v2030_v36 = vrot.slane %v7583_v21, 5  ;;  %v6236_v54 = vld [vmem:[#allocation2 + $0x408] ss:$36 sps:$4 sm:$0xff]   ;;  %v1829_v6 = vsel %vm7638_vm14, %v1827_v29, %v1828_v17 }
 0x15f   : > { %v6239_v51 = vld [vmem:[#allocation2 + $0x454] ss:$36 sps:$4 sm:$0xff]   ;;  %v1643_v62 = vsel %vm7631_vm12, %v1634_v4, %v1642_v38  ;;  %1901 = vst [vmem:[#allocation2 + $0x4b8] sm:$0xf] %v1829_v6  ;;  %v3693_v24 = vpop.f32.mrb[5].mxu1  ;;  %v1644_v21 = vrot.slane %v1642_v38, 4  ;;  %v1832_v32 = vsel %vm7638_vm14, %v1830_v63, %v1831_v59  ;;  %4606 = vperm.xlu0 %6019, %v4537_v37   ;;  %4611 = vperm.xlu1 %6020, %v4538_v31  }
 0x160   : > { %v2029_v23 = vrot.slane %v8868_v34, 4  ;;  %1722 = vst [vmem:[#allocation2 + $0x4b4] sm:$0xf] %v1643_v62  ;;  %v2032_v50 = vrot.slane %v2030_v36, 4  ;;  %v8140_v60 = vpop.f32.mrb[6].mxu1  ;;  %v2033_v47 = vrot.slane %v7620_v5, 5  ;;  %4322 = vmatmul.mubr.bf16.gmra.mrb[108].mxu1 %v6236_v54 }
 0x161   : > { %1902 = vst [vmem:[#allocation2 + $0x4dc] sm:$0xf] %v1832_v32  ;;  %v2036_v10 = vrot.slane %v7951_v0, 5  ;;  %v2039_v39 = vrot.slane %v7953_v55, 5  ;;  %v2042_v46 = vrot.slane %v7993_v48, 5  ;;  %v3696_v58 = vpop.f32.mrb[7].mxu1  ;;  %v1653_v45 = vsel %vm7631_vm12, %v1644_v21, %v1652_v20  ;;  %4329 = vmatprep.mubr.bf16.mxu1 %v6239_v51 }
 0x162   : > { %v2031_v44 = vsel %vm6668_vm6, %v2029_v23, %v2030_v36  ;;  %v4539_v2 = vld [vmem:[%s8712_s4 + $0x50] sm:$0xff]  ;;  %v6235_v40 = vld [vmem:[#allocation2 + $0x298] ss:$36 sps:$4 sm:$0xff]   ;;  %1723 = vst [vmem:[#allocation2 + $0x4d8] sm:$0xf] %v1653_v45  ;;  %v2034_v5 = vsel %vm6668_vm6, %v2032_v50, %v2033_v47  ;;  %v2035_v0 = vrot.slane %v2033_v47, 4 }
 0x163   : > { %2079 = vst [vmem:[#allocation2 + $0x458] sm:$0xf] %v2031_v44  ;;  %v2038_v55 = vrot.slane %v2036_v10, 4  ;;  %v2041_v42 = vrot.slane %v2039_v39, 4  ;;  %v6237_v48 = vld [vmem:[#allocation2 + $0x2e4] ss:$36 sps:$4 sm:$0xff]   ;;  %4616 = vperm.xlu0 %6019, %v4539_v2   ;;  %4106 = vmatmul.mubr.bf16.gmra.mrb[36].mxu0 %v6235_v40 }
 0x164   : > { %2080 = vst [vmem:[#allocation2 + $0x47c] sm:$0xf] %v2034_v5  ;;  %v2037_v13 = vsel %vm6668_vm6, %v2035_v0, %v2036_v10  ;;  %v4541_v41 = vld [vmem:[%s8712_s4 + $0x60] sm:$0xff]  ;;  %v6242_v30 = vld [vmem:[#allocation2 + $0x450] ss:$36 sps:$4 sm:$0xff]   ;;  %v8162_v49 = vpop.f32.mrb[8].mxu1  ;;  %4113 = vmatprep.mubr.bf16.mxu0 %v6237_v48 }
 0x165   : > { %v2040_v57 = vsel %vm6668_vm6, %v2038_v55, %v2039_v39  ;;  %v2043_v8 = vsel %vm6668_vm6, %v2041_v42, %v2042_v46  ;;  %2081 = vst [vmem:[#allocation2 + $0x4a0] sm:$0xf] %v2037_v13  ;;  %v6247_v1 = vld [vmem:[#allocation2 + $0x49c] ss:$36 sps:$4 sm:$0xff]   ;;  %v3701_v7 = vpop.f32.mrb[9].mxu1  ;;  %v4543_v16 = vld [vmem:[%s8712_s4 + $0x70] sm:$0xff] }
 0x166   : > { %2082 = vst [vmem:[#allocation2 + $0x4c4] sm:$0xf] %v2040_v57  ;;  %2083 = vst [vmem:[#allocation2 + $0x4e8] sm:$0xf] %v2043_v8  ;;  %v8164_v52 = vpop.f32.mrb[10].mxu1  ;;  %v4540_v9 = vld [vmem:[%s8712_s4 + $0x58] sm:$0xff] }
 0x167   : > { %8870 = vst [vmem:[#allocation3_spill] sm:$0xff] %v8164_v52  ;;  %4626 = vperm.xlu0 %6019, %v4541_v41   ;;  %v3704_v18 = vpop.f32.mrb[11].mxu1  ;;  %v6241_v33 = vld [vmem:[#allocation2 + $0x2e0] ss:$36 sps:$4 sm:$0xff]   ;;  %v6245_v56 = vld [vmem:[#allocation2 + $0x32c] ss:$36 sps:$4 sm:$0xff]   ;;  %4621 = vperm.xlu1 %6020, %v4540_v9  }
 0x168   : > { %4330 = vmatmul.mubr.bf16.gmra.mrb[112].mxu1 %v6242_v30  ;;  %v2257_v12 = vld [vmem:[#allocation2 + $0x4e0] sm:$0xff]  ;;  %v4542_v27 = vld [vmem:[%s8712_s4 + $0x68] sm:$0xff]  ;;  %v6250_v53 = vld [vmem:[#allocation2 + $0x498] ss:$36 sps:$4 sm:$0xff]   ;;  %v8175_v28 = vpop.f32.mrb[12].mxu1 }
 0x169   : > { %4337 = vmatprep.mubr.bf16.mxu1 %v6247_v1  ;;  %8871 = vst [vmem:[#allocation4_spill] sm:$0xff] %v8175_v28  ;;  %v4545_v17 = vld [vmem:[%s8712_s4 + $0x80] sm:$0xff]  ;;  %v5365_v43 = vcombine.high %v2257_v12, %v2257_v12  ;;  %v3709_v26 = vpop.f32.mrb[13].mxu1  ;;  %v4544_v25 = vld [vmem:[%s8712_s4 + $0x78] sm:$0xff]  ;;  %v4547_v15 = vld [vmem:[%s8712_s4 + $0x90] sm:$0xff]  ;;  %v5364_v63 = vcombine.low %v2257_v12, %v2257_v12 }
 0x16a   : > { %v8180_v11 = vpop.f32.mrb[14].mxu1  ;;  %v6249_v19 = vld [vmem:[#allocation2 + $0x328] ss:$36 sps:$4 sm:$0xff]   ;;  %v6253_v38 = vld [vmem:[#allocation2 + $0x374] ss:$36 sps:$4 sm:$0xff]   ;;  %v4549_v29 = vld [vmem:[%s8712_s4 + $0xa0] sm:$0xff] }
 0x16b   : > { %4636 = vperm.xlu0 %6019, %v4543_v16   ;;  %4114 = vmatmul.mubr.bf16.gmra.mrb[40].mxu0 %v6241_v33  ;;  %8872 = vst [vmem:[#allocation5_spill] sm:$0xff] %v8180_v11  ;;  %v3712_v4 = vpop.f32.mrb[15].mxu1  ;;  %v4546_v14 = vld [vmem:[%s8712_s4 + $0x88] sm:$0xff]  ;;  %v6262_v59 = vld [vmem:[#allocation2 + $0x20] ss:$36 sps:$4 sm:$0xff]   ;;  %v4548_v37 = vld [vmem:[%s8712_s4 + $0x98] sm:$0xff] }
 0x16c   : > { %4121 = vmatprep.mubr.bf16.mxu0 %v6245_v56  ;;  %4631 = vperm.xlu1 %6020, %v4542_v27   ;;  %v8194_v20 = vpop.f32.mrb[16].mxu1  ;;  %v4551_v54 = vld [vmem:[%s8712_s4 + $0xb0] sm:$0xff]  ;;  %v6260_v62 = vld [vmem:[#allocation2 + $0x3bc] ss:$36 sps:$4 sm:$0xff]   ;;  %v4550_v6 = vld [vmem:[%s8712_s4 + $0xa8] sm:$0xff] }
 0x16d   : > { %8873 = vst [vmem:[#allocation6_spill] sm:$0xff] %v8194_v20  ;;  %v3717_v34 = vpop.f32.mrb[17].mxu1  ;;  %v6256_v51 = vld [vmem:[#allocation2 + $0x370] ss:$36 sps:$4 sm:$0xff]   ;;  %v4553_v24 = vld [vmem:[%s8712_s4 + $0xc0] sm:$0xff]  ;;  %v4552_v47 = vld [vmem:[%s8712_s4 + $0xb8] sm:$0xff] }
 0x16e   : > { %v8196_v23 = vpop.f32.mrb[18].mxu1  ;;  %v6264_v21 = vld [vmem:[#allocation2 + $0x68] ss:$36 sps:$4 sm:$0xff]   ;;  %v6267_v22 = vld [vmem:[#allocation2 + $0xb0] ss:$36 sps:$4 sm:$0xff]   ;;  %v4557_v45 = vld [vmem:[%s8712_s4 + $0xe0] sm:$0xff] }
 0x16f   : > { %4646 = vperm.xlu0 %6019, %v4545_v17   ;;  %8874 = vst [vmem:[#allocation7_spill] sm:$0xff] %v8196_v23  ;;  %v3720_v36 = vpop.f32.mrb[19].mxu1  ;;  %v4555_v10 = vld [vmem:[%s8712_s4 + $0xd0] sm:$0xff]  ;;  %v6263_v39 = vld [vmem:[#allocation2 + $0x3b8] ss:$36 sps:$4 sm:$0xff]   ;;  %v4554_v58 = vld [vmem:[%s8712_s4 + $0xc8] sm:$0xff] }
 0x170   : > { %4338 = vmatmul.mubr.bf16.gmra.mrb[116].mxu1 %v6250_v53  ;;  %4641 = vperm.xlu1 %6020, %v4544_v25   ;;  %v8210_v32 = vpop.f32.mrb[20].mxu1  ;;  %v6265_v46 = vld [vmem:[#allocation2 + $0x404] ss:$36 sps:$4 sm:$0xff]   ;;  %v6269_v2 = vld [vmem:[#allocation2 + $0xf8] ss:$36 sps:$4 sm:$0xff]   ;;  %v4559_v13 = vld [vmem:[%s8712_s4 + $0xf0] sm:$0xff] }
 0x171   : > { %4345 = vmatprep.mubr.bf16.mxu1 %v5365_v43  ;;  %v3725_v44 = vpop.f32.mrb[21].mxu1  ;;  %v6272_v5 = vld [vmem:[#allocation2 + $0x140] ss:$36 sps:$4 sm:$0xff]   ;;  %v4556_v48 = vld [vmem:[%s8712_s4 + $0xd8] sm:$0xff]  ;;  %v6270_v8 = vld [vmem:[#allocation2 + $0x44c] ss:$36 sps:$4 sm:$0xff]  }
 0x172   : > { %v8212_v50 = vpop.f32.mrb[22].mxu1  ;;  %v6268_v57 = vld [vmem:[#allocation2 + $0x400] ss:$36 sps:$4 sm:$0xff]   ;;  %v4558_v41 = vld [vmem:[%s8712_s4 + $0xe8] sm:$0xff]  ;;  %v6277_v18 = vld [vmem:[#allocation2 + $0x1d0] ss:$36 sps:$4 sm:$0xff]  }
 0x173   : > { %4656 = vperm.xlu0 %6019, %v4547_v15   ;;  %4122 = vmatmul.mubr.bf16.gmra.mrb[44].mxu0 %v6249_v19  ;;  %v3728_v31 = vpop.f32.mrb[23].mxu1  ;;  %v4561_v30 = vld [vmem:[%s8712_s4 + $0x100] sm:$0xff]  ;;  %v6274_v1 = vld [vmem:[#allocation2 + $0x188] ss:$36 sps:$4 sm:$0xff]   ;;  %v4560_v16 = vld [vmem:[%s8712_s4 + $0xf8] sm:$0xff] }
 0x174   : > { %4129 = vmatprep.mubr.bf16.mxu0 %v6253_v38  ;;  %4651 = vperm.xlu1 %6020, %v4546_v14   ;;  %v8226_v40 = vpop.f32.mrb[24].mxu1  ;;  %v4563_v12 = vld [vmem:[%s8712_s4 + $0x110] sm:$0xff]  ;;  %v6273_v27 = vld [vmem:[#allocation2 + $0x448] ss:$36 sps:$4 sm:$0xff]   ;;  %v6279_v43 = vld [vmem:[#allocation2 + $0x218] ss:$36 sps:$4 sm:$0xff]  }
 0x175   : > { %v3733_v0 = vpop.f32.mrb[25].mxu1  ;;  %v6275_v53 = vld [vmem:[#allocation2 + $0x494] ss:$36 sps:$4 sm:$0xff]   ;;  %v4562_v17 = vld [vmem:[%s8712_s4 + $0x108] sm:$0xff]  ;;  %v6281_v4 = vld [vmem:[#allocation2 + $0x260] ss:$36 sps:$4 sm:$0xff]  }
 0x176   : > { %v8228_v55 = vpop.f32.mrb[26].mxu1  ;;  %v2256_v15 = vld [vmem:[#allocation2 + $0x4d8] sm:$0xff]  ;;  %v6278_v14 = vld [vmem:[#allocation2 + $0x490] ss:$36 sps:$4 sm:$0xff]  }
 0x177   : > { %4666 = vperm.xlu0 %6019, %v4549_v29   ;;  %v3736_v42 = vpop.f32.mrb[27].mxu1  ;;  %v5363_v29 = vcombine.high %v2256_v15, %v2256_v15  ;;  %v6287_v34 = vld [vmem:[#allocation2 + $0x2f0] ss:$36 sps:$4 sm:$0xff]   ;;  %v6284_v31 = vld [vmem:[#allocation2 + $0x18] ss:$36 sps:$4 sm:$0xff]  }
 0x178   : > { %4346 = vmatmul.mubr.bf16.gmra.mrb[120].mxu1 %v5364_v63  ;;  %4661 = vperm.xlu1 %6020, %v4548_v37   ;;  %v8242_v7 = vpop.f32.mrb[28].mxu1  ;;  %v6283_v63 = vld [vmem:[#allocation2 + $0x2a8] ss:$36 sps:$4 sm:$0xff]  }
 0x179   : > { %5794 = vmatprep.mubr.bf16.mxu1 %v6262_v59  ;;  %v3741_v33 = vpop.f32.mrb[29].mxu1  ;;  %v6294_v0 = vld [vmem:[#allocation2 + $0xac] ss:$36 sps:$4 sm:$0xff]  }
 0x17a   : > { %v8244_v56 = vpop.f32.mrb[30].mxu1  ;;  %v6303_v33 = vld [vmem:[#allocation2 + $0x4e8] ss:$0 sps:$4 sm:$0xff]  }
 0x17b   : > { %4676 = vperm.xlu0 %6019, %v4551_v54   ;;  %4130 = vmatmul.mubr.bf16.gmra.mrb[48].mxu0 %v6256_v51  ;;  %v3744_v9 = vpop.f32.mrb[31].mxu1  ;;  %v5362_v51 = vcombine.low %v2256_v15, %v2256_v15 }
 0x17c   : > { %4137 = vmatprep.mubr.bf16.mxu0 %v6260_v62  ;;  %4671 = vperm.xlu1 %6020, %v4550_v6   ;;  %v8255_v26 = vpop.f32.mrb[32].mxu1  ;;  %v6286_v62 = vld [vmem:[#allocation2 + $0x1c] ss:$36 sps:$4 sm:$0xff]  }
 0x17d   : > { %v3749_v25 = vpop.f32.mrb[33].mxu1  ;;  %v6288_v6 = vld [vmem:[#allocation2 + $0x338] ss:$36 sps:$4 sm:$0xff]  }
 0x17e   : > { %v8257_v19 = vpop.f32.mrb[34].mxu1 }
 0x17f   : > { %4686 = vperm.xlu0 %6019, %v4553_v24   ;;  %v3752_v38 = vpop.f32.mrb[35].mxu1  ;;  %v6291_v24 = vld [vmem:[#allocation2 + $0x380] ss:$36 sps:$4 sm:$0xff]  }
 0x180   : > { %5795 = vmatmul.mubr.bf16.vlgmr.msra.gmra.mrb[124].mxu1 %v6264_v21  ;;  %4681 = vperm.xlu1 %6020, %v4552_v47  }
 0x181   : > { %5798 = vmatprep.mubr.bf16.mxu1 %v6267_v22 }
 0x183   : > { %4696 = vperm.xlu0 %6019, %v4555_v10   ;;  %4138 = vmatmul.mubr.bf16.gmra.mrb[52].mxu0 %v6263_v39  ;;  %v6289_v10 = vld [vmem:[#allocation2 + $0x64] ss:$36 sps:$4 sm:$0xff]  }
 0x184   : > { %4145 = vmatprep.mubr.bf16.mxu0 %v6265_v46  ;;  %4691 = vperm.xlu1 %6020, %v4554_v58   ;;  %v6293_v39 = vld [vmem:[#allocation2 + $0x3c8] ss:$36 sps:$4 sm:$0xff]   ;;  %v6296_v46 = vld [vmem:[#allocation2 + $0x410] ss:$36 sps:$4 sm:$0xff]  }
 0x187   : > { %4706 = vperm.xlu0 %6019, %v4557_v45   ;;  %v8259_v59 = vpop.f32.mrb[36].mxu1 }
 0x188   : > { %5799 = vmatmul.mubr.bf16.gmra.mrb[128].mxu1 %v6269_v2  ;;  %4701 = vperm.xlu1 %6020, %v4556_v48   ;;  %v3757_v36 = vpop.f32.mrb[37].mxu1  ;;  %v6292_v2 = vld [vmem:[#allocation2 + $0x60] ss:$36 sps:$4 sm:$0xff]   ;;  %v6298_v48 = vld [vmem:[#allocation2 + $0x458] ss:$36 sps:$4 sm:$0xff]  }
 0x189   : > { %5802 = vmatprep.mubr.bf16.mxu1 %v6272_v5  ;;  %v8261_v37 = vpop.f32.mrb[38].mxu1 }
 0x18a   : > { %v3760_v54 = vpop.f32.mrb[39].mxu1 }
 0x18b   : > { %4716 = vperm.xlu0 %6019, %v4559_v13   ;;  %4146 = vmatmul.mubr.bf16.gmra.mrb[56].mxu0 %v6268_v57  ;;  %v6301_v13 = vld [vmem:[#allocation2 + $0x4a0] ss:$36 sps:$4 sm:$0xff]  }
 0x18c   : > { %4153 = vmatprep.mubr.bf16.mxu0 %v6270_v8  ;;  %4711 = vperm.xlu1 %6020, %v4558_v41   ;;  %v6297_v41 = vld [vmem:[#allocation2 + $0xa8] ss:$36 sps:$4 sm:$0xff]  }
 0x18f   : > { %4726 = vperm.xlu0 %6019, %v4561_v30  }
 0x190   : > { %5803 = vmatmul.mubr.bf16.gmra.mrb[132].mxu1 %v6274_v1  ;;  %4721 = vperm.xlu1 %6020, %v4560_v16   ;;  %v6299_v1 = vld [vmem:[#allocation2 + $0xf4] ss:$36 sps:$4 sm:$0xff]  }
 0x191   : > { %5806 = vmatprep.mubr.bf16.mxu1 %v6277_v18 }
 0x192   : > { %v8263_v21 = vpop.f32.mrb[40].mxu1 }
 0x193   : > { %4736 = vperm.xlu0 %6019, %v4563_v12   ;;  %4154 = vmatmul.mubr.bf16.gmra.mrb[60].mxu0 %v6273_v27  ;;  %v3765_v22 = vpop.f32.mrb[41].mxu1  ;;  %v6302_v12 = vld [vmem:[#allocation2 + $0xf0] ss:$36 sps:$4 sm:$0xff]  }
 0x194   : > { %4161 = vmatprep.mubr.bf16.mxu0 %v6275_v53  ;;  %4731 = vperm.xlu1 %6020, %v4562_v17   ;;  %v8265_v44 = vpop.f32.mrb[42].mxu1  ;;  %v6304_v53 = vld [vmem:[#allocation2 + $0x13c] ss:$36 sps:$4 sm:$0xff]  }
 0x195   : > { %v3768_v47 = vpop.f32.mrb[43].mxu1 }
 0x198   : > { %5807 = vmatmul.mubr.bf16.gmra.mrb[136].mxu1 %v6279_v43  ;;  %v6306_v43 = vld [vmem:[#allocation2 + $0x138] ss:$36 sps:$4 sm:$0xff]  }
 0x199   : > { %5810 = vmatprep.mubr.bf16.mxu1 %v6281_v4 }
 0x19b   : > { %4162 = vmatmul.mubr.bf16.gmra.mrb[64].mxu0 %v6278_v14 }
 0x19c   : > { %4169 = vmatprep.mubr.bf16.mxu0 %v5363_v29 }
 0x19e   : > { %v8267_v58 = vpop.f32.mrb[44].mxu1 }
 0x19f   : > { %v3773_v45 = vpop.f32.mrb[45].mxu1 }
 0x1a0   : > { %5811 = vmatmul.mubr.bf16.gmra.mrb[140].mxu1 %v6283_v63  ;;  %v8269_v5 = vpop.f32.mrb[46].mxu1 }
 0x1a1   : > { %5814 = vmatprep.mubr.bf16.mxu1 %v6287_v34  ;;  %v3776_v42 = vpop.f32.mrb[47].mxu1 }
 0x1a3   : > { %4170 = vmatmul.mubr.bf16.gmra.mrb[72].mxu0 %v5362_v51 }
 0x1a4   : > { %4209 = vmatprep.mubr.bf16.mxu0 %v6286_v62 }
 0x1a7   : > { %v8271_v57 = vpop.f32.mrb[48].mxu1 }
 0x1a8   : > { %5815 = vmatmul.mubr.bf16.gmra.mrb[144].mxu1 %v6288_v6  ;;  %v3781_v8 = vpop.f32.mrb[49].mxu1 }
 0x1a9   : > { %5818 = vmatprep.mubr.bf16.mxu1 %v6291_v24  ;;  %v8273_v30 = vpop.f32.mrb[50].mxu1 }
 0x1aa   : > { %v3784_v18 = vpop.f32.mrb[51].mxu1 }
 0x1ab   : > { %4210 = vmatmul.mubr.bf16.vlgmr.msra.gmra.mrb[0].mxu0 %v6284_v31 }
 0x1ac   : > { %4217 = vmatprep.mubr.bf16.mxu0 %v6289_v10 }
 0x1af   : > { %v8275_v9 = vpop.f32.mrb[52].mxu1 }
 0x1b0   : > { %5819 = vmatmul.mubr.bf16.gmra.mrb[148].mxu1 %v6293_v39  ;;  %v3789_v16 = vpop.f32.mrb[53].mxu1 }
 0x1b1   : > { %5822 = vmatprep.mubr.bf16.mxu1 %v6296_v46  ;;  %v8277_v27 = vpop.f32.mrb[54].mxu1 }
 0x1b2   : > { %v3792_v17 = vpop.f32.mrb[55].mxu1 }
 0x1b3   : > { %4218 = vmatmul.mubr.bf16.gmra.mrb[4].mxu0 %v6292_v2 }
 0x1b4   : > { %4225 = vmatprep.mubr.bf16.mxu0 %v6294_v0 }
 0x1b8   : > { %5823 = vmatmul.mubr.bf16.gmra.mrb[152].mxu1 %v6298_v48 }
 0x1b9   : > { %5826 = vmatprep.mubr.bf16.mxu1 %v6301_v13 }
 0x1bb   : > { %4226 = vmatmul.mubr.bf16.gmra.mrb[8].mxu0 %v6297_v41 }
 0x1bc   : > { %4233 = vmatprep.mubr.bf16.mxu0 %v6299_v1 }
 0x1bd   : > { %v8279_v4 = vpop.f32.mrb[56].mxu1 }
 0x1be   : > { %v3797_v25 = vpop.f32.mrb[57].mxu1 }
 0x1bf   : > { %v8281_v15 = vpop.f32.mrb[58].mxu1 }
 0x1c0   : > { %5827 = vmatmul.mubr.bf16.gmra.mrb[156].mxu1 %v6303_v33  ;;  %v3800_v38 = vpop.f32.mrb[59].mxu1 }
 0x1c3   : > { %4234 = vmatmul.mubr.bf16.gmra.mrb[12].mxu0 %v6302_v12 }
 0x1c4   : > { %4241 = vmatprep.mubr.bf16.mxu0 %v6304_v53 }
 0x1c5   : > { %v8283_v14 = vpop.f32.mrb[60].mxu1 }
 0x1c6   : > { %v3805_v29 = vpop.f32.mrb[61].mxu1 }
 0x1c7   : > { %v8285_v63 = vpop.f32.mrb[62].mxu1 }
 0x1c8   : > { %v3808_v34 = vpop.f32.mrb[63].mxu1 }
 0x1cb   : > { %4242 = vmatmul.mubr.bf16.gmra.mrb[16].mxu0 %v6306_v43 }
 0x1cf   : > { %v8287_v36 = vpop.f32.mrb[64].mxu1 }
 0x1d0   : > { %v3813_v54 = vpop.f32.mrb[65].mxu1 }
 0x1d1   : > { %v8289_v51 = vpop.f32.mrb[66].mxu1 }
 0x1d2   : > { %v3816_v62 = vpop.f32.mrb[67].mxu1 }
 0x1da   : > { %v3819_v6 = vpop.f32.mrb[68].mxu1 }
 0x1db   : > { %v3821_v24 = vpop.f32.mrb[69].mxu1 }
 0x1dc   : > { %v3822_v22 = vpop.f32.mrb[70].mxu1 }
 0x1dd   : > { %v3823_v31 = vpop.f32.mrb[71].mxu1  ;;  %v3995_v47 = vpop.f32.mrb[68].mxu0 }
 0x1de   : > { %v8291_v10 = vadd.f32 %v3995_v47, %v3819_v6  ;;  %v3997_v39 = vpop.f32.mrb[69].mxu0 }
 0x1df   : > { %v3998_v46 = vpop.f32.mrb[70].mxu0 }
 0x1e0   : > { %v3999_v45 = vpop.f32.mrb[71].mxu0 }
 0x1e2   : > { %v4251_v2 = vpop.f32.mrb[72].mxu1 }
 0x1e3   : > { %v4253_v0 = vpop.f32.mrb[73].mxu1 }
 0x1e4   : > { %v4254_v42 = vpop.f32.mrb[74].mxu1 }
 0x1e5   : > { %v4256_v48 = vpop.f32.mrb[75].mxu1 }
 0x1ea   : > { %v4259_v13 = vpop.f32.mrb[76].mxu1 }
 0x1eb   : > { %v4261_v8 = vpop.f32.mrb[77].mxu1 }
 0x1ec   : > { %v4262_v41 = vpop.f32.mrb[78].mxu1 }
 0x1ed   : > { %v4264_v1 = vpop.f32.mrb[79].mxu1 }
 0x1f2   : > { %v4267_v18 = vpop.f32.mrb[80].mxu1 }
 0x1f3   : > { %v4269_v33 = vpop.f32.mrb[81].mxu1 }
 0x1f4   : > { %v4270_v16 = vpop.f32.mrb[82].mxu1 }
 0x1f5   : > { %v4272_v12 = vpop.f32.mrb[83].mxu1 }
 0x1fb   : > { %v4275_v53 = vpop.f32.mrb[84].mxu1 }
 0x1fc   : > { %v4277_v17 = vpop.f32.mrb[85].mxu1 }
 0x1fd   : > { %v4278_v43 = vpop.f32.mrb[86].mxu1 }
 0x1fe   : > { %v4280_v25 = vpop.f32.mrb[87].mxu1 }
 0x203   : > { %v8293_v38 = vpop.f32.mrb[88].mxu1 }
 0x204   : > { %v4285_v29 = vpop.f32.mrb[89].mxu1 }
 0x205   : > { %v8295_v34 = vpop.f32.mrb[90].mxu1 }
 0x206   : > { %v4288_v54 = vpop.f32.mrb[91].mxu1 }
 0x20b   : > { %v8297_v62 = vpop.f32.mrb[92].mxu1 }
 0x20c   : > { %v4293_v6 = vpop.f32.mrb[93].mxu1 }
 0x20d   : > { %v8299_v24 = vpop.f32.mrb[94].mxu1 }
 0x20e   : > { %v4296_v22 = vpop.f32.mrb[95].mxu1 }
 0x20f   : > { %v4075_v31 = vpop.f32.mrb[20].mxu0 }
 0x210   : > { %v5872_v47 = vadd.f32 %v4075_v31, %v8210_v32  ;;  %v4077_v39 = vpop.f32.mrb[21].mxu0 }
 0x211   : > { %v4078_v46 = vpop.f32.mrb[22].mxu0 }
 0x212   : > { %v5874_v45 = vadd.f32 %v4078_v46, %v8212_v50  ;;  %v8303_v0 = vadd.f32 %v5872_v47, %v4251_v2  ;;  %v4080_v48 = vpop.f32.mrb[23].mxu0 }
 0x213   : > { %v8305_v8 = vpop.f32.mrb[96].mxu1 }
 0x214   : > { %v8307_v1 = vadd.f32 %v5874_v45, %v4254_v42  ;;  %v4301_v33 = vpop.f32.mrb[97].mxu1 }
 0x215   : > { %v8309_v12 = vpop.f32.mrb[98].mxu1 }
 0x216   : > { %v4304_v17 = vpop.f32.mrb[99].mxu1 }
 0x217   : > { %v4083_v25 = vpop.f32.mrb[24].mxu0 }
 0x218   : > { %v5876_v29 = vadd.f32 %v4083_v25, %v8226_v40  ;;  %v4085_v54 = vpop.f32.mrb[25].mxu0 }
 0x219   : > { %v4086_v32 = vpop.f32.mrb[26].mxu0 }
 0x21a   : > { %v5878_v6 = vadd.f32 %v4086_v32, %v8228_v55  ;;  %v8313_v22 = vadd.f32 %v5876_v29, %v4259_v13  ;;  %v4088_v50 = vpop.f32.mrb[27].mxu0 }
 0x21b   : > { %v8315_v2 = vpop.f32.mrb[100].mxu1 }
 0x21c   : > { %v8317_v31 = vadd.f32 %v5878_v6, %v4262_v41  ;;  %v4309_v42 = vpop.f32.mrb[101].mxu1  ;;  %v8331_v6 = vpop.permute.xlu0 %4566 }
 0x21d   : > { %v8319_v47 = vpop.f32.mrb[102].mxu1 }
 0x21e   : > { %v4312_v39 = vpop.f32.mrb[103].mxu1 }
 0x224   : > { %v4091_v46 = vpop.f32.mrb[28].mxu0 }
 0x225   : > { %v5880_v45 = vadd.f32 %v4091_v46, %v8242_v7  ;;  %v4093_v48 = vpop.f32.mrb[29].mxu0 }
 0x226   : > { %v4094_v40 = vpop.f32.mrb[30].mxu0  ;;  %v8325_v13 = vpop.f32.mrb[104].mxu1 }
 0x227   : > { %v5882_v33 = vadd.f32 %v4094_v40, %v8244_v56  ;;  %v8323_v17 = vadd.f32 %v5880_v45, %v4267_v18  ;;  %v4096_v55 = vpop.f32.mrb[31].mxu0  ;;  %v4317_v41 = vpop.f32.mrb[105].mxu1 }
 0x228   : > { %v8329_v29 = vpop.f32.mrb[106].mxu1  ;;  %v8343_v40 = vpop.permute.xlu0 %4571 }
 0x229   : > { %v8327_v25 = vadd.f32 %v5882_v33, %v4270_v16  ;;  %v4320_v54 = vpop.f32.mrb[107].mxu1  ;;  %v8345_v55 = vpop.permute.xlu1 %4576 }
 0x22c   : > { %v4099_v32 = vpop.f32.mrb[32].mxu0 }
 0x22d   : > { %v5884_v7 = vadd.f32 %v4099_v32, %v8255_v26  ;;  %v4101_v50 = vpop.f32.mrb[33].mxu0 }
 0x22e   : > { %v4102_v42 = vpop.f32.mrb[34].mxu0  ;;  %v8354_v50 = vpop.permute.xlu0 %4586 }
 0x22f   : > { %v5886_v56 = vadd.f32 %v4102_v42, %v8257_v19  ;;  %v8335_v18 = vadd.f32 %v5884_v7, %v4275_v53  ;;  %v4104_v39 = vpop.f32.mrb[35].mxu0  ;;  %8875 = vst [vmem:[#allocation8_spill] sm:$0xff] %v8354_v50 }
 0x230   : > { %v8359_v39 = vpop.permute.xlu1 %4581 }
 0x231   : > { %v8339_v16 = vadd.f32 %v5886_v56, %v4278_v43 }
 0x233   : > { %v8337_v46 = vpop.f32.mrb[108].mxu1 }
 0x234   : > { %v4325_v45 = vpop.f32.mrb[109].mxu1 }
 0x235   : > { %v8341_v48 = vpop.f32.mrb[110].mxu1 }
 0x236   : > { %v4328_v33 = vpop.f32.mrb[111].mxu1  ;;  %v4107_v26 = vpop.f32.mrb[36].mxu0 }
 0x237   : > { %v5888_v41 = vadd.f32 %v4107_v26, %v8259_v59  ;;  %v4109_v54 = vpop.f32.mrb[37].mxu0 }
 0x238   : > { %v4110_v19 = vpop.f32.mrb[38].mxu0 }
 0x239   : > { %v5890_v53 = vadd.f32 %v4110_v19, %v8261_v37  ;;  %v8350_v32 = vadd.f32 %v5888_v41, %v8293_v38  ;;  %v4112_v43 = vpop.f32.mrb[39].mxu0  ;;  %v8364_v41 = vpop.permute.xlu0 %4596 }
 0x23a   : > { %8876 = vst [vmem:[#allocation9_spill] sm:$0xff] %v8364_v41 }
 0x23b   : > { %v8352_v7 = vpop.f32.mrb[112].mxu1  ;;  %v8357_v42 = vadd.f32 %v5890_v53, %v8295_v34  ;;  %v8370_v53 = vpop.permute.xlu1 %4591 }
 0x23c   : > { %v4333_v56 = vpop.f32.mrb[113].mxu1  ;;  %8877 = vst [vmem:[#allocation10_spill] sm:$0xff] %v8370_v53 }
 0x23d   : > { %v8361_v45 = vpop.f32.mrb[114].mxu1 }
 0x23e   : > { %v4336_v59 = vpop.f32.mrb[115].mxu1  ;;  %v4115_v33 = vpop.f32.mrb[40].mxu0 }
 0x23f   : > { %v5892_v37 = vadd.f32 %v4115_v33, %v8263_v21  ;;  %v4117_v26 = vpop.f32.mrb[41].mxu0  ;;  %v8382_v20 = vpop.permute.xlu1 %4601 }
 0x240   : > { %v4118_v38 = vpop.f32.mrb[42].mxu0  ;;  %v8379_v26 = vpop.permute.xlu0 %4606  ;;  %8879 = vst [vmem:[#allocation12_spill] sm:$0xff] %v8382_v20 }
 0x241   : > { %v8367_v54 = vadd.f32 %v5892_v37, %v8297_v62  ;;  %v5894_v19 = vadd.f32 %v4118_v38, %v8265_v44  ;;  %v4120_v34 = vpop.f32.mrb[43].mxu0  ;;  %8878 = vst [vmem:[#allocation11_spill] sm:$0xff] %v8379_v26 }
 0x243   : > { %v8372_v43 = vpop.f32.mrb[116].mxu1  ;;  %v8375_v56 = vadd.f32 %v5894_v19, %v8299_v24 }
 0x244   : > { %v4341_v59 = vpop.f32.mrb[117].mxu1  ;;  %v4617_v26 = vpop.permute.xlu0 %4616 }
 0x245   : > { %v8377_v23 = vpop.f32.mrb[118].mxu1 }
 0x246   : > { %v4344_v21 = vpop.f32.mrb[119].mxu1  ;;  %v4123_v33 = vpop.f32.mrb[44].mxu0 }
 0x247   : > { %v5896_v62 = vadd.f32 %v4123_v33, %v8267_v58  ;;  %v4125_v37 = vpop.f32.mrb[45].mxu0  ;;  %v8393_v58 = vpop.permute.xlu1 %4611 }
 0x248   : > { %v4126_v44 = vpop.f32.mrb[46].mxu0  ;;  %8880 = vst [vmem:[#allocation13_spill] sm:$0xff] %v8393_v58 }
 0x249   : > { %v5898_v38 = vadd.f32 %v4126_v44, %v8269_v5  ;;  %v4128_v34 = vpop.f32.mrb[47].mxu0  ;;  %v8386_v41 = vadd.f32 %v5896_v62, %v8305_v8 }
 0x24b   : > { %v8388_v24 = vpop.f32.mrb[120].mxu1  ;;  %v8391_v59 = vadd.f32 %v5898_v38, %v8309_v12  ;;  %v8402_v12 = vpop.permute.xlu0 %4626 }
 0x24c   : > { %v4349_v19 = vpop.f32.mrb[121].mxu1 }
 0x24d   : > { %v4350_v21 = vpop.f32.mrb[122].mxu1 }
 0x24e   : > { %v4351_v11 = vpop.f32.mrb[123].mxu1  ;;  %v4131_v33 = vpop.f32.mrb[48].mxu0 }
 0x24f   : > { %v5900_v37 = vadd.f32 %v4131_v33, %v8271_v57  ;;  %v4133_v20 = vpop.f32.mrb[49].mxu0  ;;  %v4622_v11 = vpop.permute.xlu1 %4621 }
 0x250   : > { %v4134_v5 = vpop.f32.mrb[50].mxu0 }
 0x251   : > { %v5902_v44 = vadd.f32 %v4134_v5, %v8273_v30  ;;  %v4136_v8 = vpop.f32.mrb[51].mxu0  ;;  %v8398_v62 = vadd.f32 %v5900_v37, %v8315_v2  ;;  %v4637_v37 = vpop.permute.xlu0 %4636 }
 0x253   : > { %v8400_v34 = vpop.f32.mrb[124].mxu1  ;;  %v8407_v19 = vadd.f32 %v5902_v44, %v8319_v47  ;;  %v4632_v58 = vpop.permute.xlu1 %4631 }
 0x254   : > { %v8404_v38 = vpop.f32.mrb[125].mxu1 }
 0x255   : > { %v8409_v21 = vpop.f32.mrb[126].mxu1 }
 0x256   : > { %v8411_v20 = vpop.f32.mrb[127].mxu1  ;;  %v4139_v57 = vpop.f32.mrb[52].mxu0 }
 0x257   : > { %v5904_v30 = vadd.f32 %v4139_v57, %v8275_v9  ;;  %v4141_v33 = vpop.f32.mrb[53].mxu0 }
 0x258   : > { %v4142_v2 = vpop.f32.mrb[54].mxu0  ;;  %v8429_v33 = vpop.permute.xlu0 %4646 }
 0x259   : > { %v5906_v5 = vadd.f32 %v4142_v2, %v8277_v27  ;;  %v4144_v8 = vpop.f32.mrb[55].mxu0  ;;  %v8416_v28 = vadd.f32 %v5904_v30, %v8325_v13  ;;  %v4642_v13 = vpop.permute.xlu1 %4641 }
 0x25b   : > { %v8418_v53 = vpop.f32.mrb[128].mxu1  ;;  %v8423_v44 = vadd.f32 %v5906_v5, %v8329_v29 }
 0x25c   : > { %8881 = vst [vmem:[#allocation14_spill] sm:$0xff] %v8418_v53  ;;  %v8420_v47 = vpop.f32.mrb[129].mxu1 }
 0x25d   : > { %8882 = vst [vmem:[#allocation15_spill] sm:$0xff] %v8420_v47  ;;  %v8425_v50 = vpop.f32.mrb[130].mxu1 }
 0x25e   : > { %8883 = vst [vmem:[#allocation16_spill] sm:$0xff] %v8425_v50  ;;  %v8427_v9 = vpop.f32.mrb[131].mxu1  ;;  %v4147_v57 = vpop.f32.mrb[56].mxu0 }
 0x25f   : > { %8884 = vst [vmem:[#allocation17_spill] sm:$0xff] %v8427_v9  ;;  %v5908_v27 = vadd.f32 %v4147_v57, %v8279_v4  ;;  %v4149_v2 = vpop.f32.mrb[57].mxu0  ;;  %v4657_v4 = vpop.permute.xlu0 %4656 }
 0x260   : > { %v4150_v30 = vpop.f32.mrb[58].mxu0 }
 0x261   : > { %v5910_v8 = vadd.f32 %v4150_v30, %v8281_v15  ;;  %v4152_v53 = vpop.f32.mrb[59].mxu0  ;;  %v8434_v47 = vadd.f32 %v5908_v27, %v8337_v46  ;;  %v4652_v15 = vpop.permute.xlu1 %4651 }
 0x263   : > { %v5804_v29 = vpop.f32.mrb[132].mxu1  ;;  %v8440_v9 = vadd.f32 %v5910_v8, %v8341_v48  ;;  %v8462_v8 = vpop.permute.xlu0 %4666 }
 0x264   : > { %v4428_v5 = vadd.f32 %v8303_v0, %v5804_v29  ;;  %v8437_v50 = vpop.f32.mrb[133].mxu1 }
 0x265   : > { %v5805_v52 = vpop.f32.mrb[134].mxu1 }
 0x266   : > { %v4431_v57 = vadd.f32 %v8307_v1, %v5805_v52  ;;  %v8444_v2 = vpop.f32.mrb[135].mxu1  ;;  %v4155_v53 = vpop.f32.mrb[60].mxu0  ;;  %v8447_v27 = vmul.f32 %v4617_v26, %v4428_v5 }
 0x267   : > { %v5912_v46 = vadd.f32 %v4155_v53, %v8283_v14  ;;  %v4157_v30 = vpop.f32.mrb[61].mxu0 }
 0x268   : > { %v8449_v0 = vmul.f32 %v4622_v11, %v4431_v57  ;;  %v4158_v29 = vpop.f32.mrb[62].mxu0  ;;  %v4662_v57 = vpop.permute.xlu1 %4661 }
 0x269   : > { %v5914_v52 = vadd.f32 %v4158_v29, %v8285_v63  ;;  %v4160_v48 = vpop.f32.mrb[63].mxu0  ;;  %v8460_v14 = vadd.f32 %v5912_v46, %v8352_v7 }
 0x26a   : > { %8885 = vst [vmem:[#allocation18_spill] sm:$0xff] %v8449_v0  ;;  %v5660_v1 = vpack.c.bf16 %v8449_v0, %v8447_v27 }
 0x26b   : > { %v5808_v26 = vpop.f32.mrb[136].mxu1  ;;  %v8467_v53 = vadd.f32 %v5914_v52, %v8361_v45 }
 0x26c   : > { %5740 = vst [vmem:[%s8454_s24 + $0x28] sm:$0xff] %v5660_v1   ;;  %v4444_v11 = vadd.f32 %v8323_v17, %v5808_v26  ;;  %v4435_v5 = vpop.f32.mrb[137].mxu1 }
 0x26d   : > { %v4436_v63 = vadd.f32 %v8313_v22, %v4435_v5  ;;  %v5809_v30 = vpop.f32.mrb[138].mxu1 }
 0x26e   : > { %v4447_v29 = vadd.f32 %v8327_v25, %v5809_v30  ;;  %v4438_v48 = vpop.f32.mrb[139].mxu1  ;;  %v4163_v0 = vpop.f32.mrb[64].mxu0  ;;  %v8473_v1 = vmul.f32 %v4637_v37, %v4444_v11 }
 0x26f   : > { %v4439_v7 = vadd.f32 %v8317_v31, %v4438_v48  ;;  %v5916_v46 = vadd.f32 %v4163_v0, %v8287_v36  ;;  %v4165_v17 = vpop.f32.mrb[65].mxu0  ;;  %v8478_v45 = vmul.f32 %v8402_v12, %v4436_v63  ;;  %v4677_v25 = vpop.permute.xlu0 %4676 }
 0x270   : > { %v8475_v26 = vmul.f32 %v4642_v13, %v4447_v29  ;;  %v4166_v22 = vpop.f32.mrb[66].mxu0  ;;  %v4672_v36 = vpop.permute.xlu1 %4671 }
 0x271   : > { %v8480_v52 = vmul.f32 %v4632_v58, %v4439_v7  ;;  %v5918_v5 = vadd.f32 %v4166_v22, %v8289_v51  ;;  %v4168_v30 = vpop.f32.mrb[67].mxu0  ;;  %v8486_v37 = vadd.f32 %v5916_v46, %v8372_v43 }
 0x272   : > { %v5670_v31 = vpack.c.bf16 %v8475_v26, %v8473_v1 }
 0x273   : > { %v5665_v13 = vpack.c.bf16 %v8480_v52, %v8478_v45  ;;  %v5812_v0 = vpop.f32.mrb[140].mxu1  ;;  %v8493_v11 = vadd.f32 %v5918_v5, %v8377_v23  ;;  %v4687_v46 = vpop.permute.xlu0 %4686 }
 0x274   : > { %5742 = vst [vmem:[%s8454_s24 + $0x38] sm:$0xff] %v5670_v31   ;;  %v4460_v12 = vadd.f32 %v8350_v32, %v5812_v0  ;;  %v4451_v58 = vpop.f32.mrb[141].mxu1  ;;  %v4682_v5 = vpop.permute.xlu1 %4681 }
 0x275   : > { %5741 = vst [vmem:[%s8454_s24 + $0x30] sm:$0xff] %v5665_v13   ;;  %v4452_v51 = vadd.f32 %v8335_v18, %v4451_v58  ;;  %v5813_v63 = vpop.f32.mrb[142].mxu1 }
 0x276   : > { %v4463_v29 = vadd.f32 %v8357_v42, %v5813_v63  ;;  %v4454_v48 = vpop.f32.mrb[143].mxu1  ;;  %v4171_v43 = vpop.f32.mrb[72].mxu0  ;;  %v8500_v32 = vmul.f32 %v4657_v4, %v4460_v12 }
 0x277   : > { %v4455_v7 = vadd.f32 %v8339_v16, %v4454_v48  ;;  %v4172_v17 = vadd.f32 %v4171_v43, %v8291_v10  ;;  %v4173_v22 = vpop.f32.mrb[73].mxu0  ;;  %v8505_v18 = vmul.f32 %v8429_v33, %v4452_v51  ;;  %v4697_v12 = vpop.permute.xlu0 %4696 }
 0x278   : > { %v8502_v23 = vmul.f32 %v4662_v57, %v4463_v29  ;;  %v4174_v31 = vpop.f32.mrb[74].mxu0  ;;  %v4692_v63 = vpop.permute.xlu1 %4691 }
 0x279   : > { %v8507_v42 = vmul.f32 %v4652_v15, %v4455_v7  ;;  %v4175_v16 = vpop.f32.mrb[75].mxu0  ;;  %v8512_v13 = vadd.f32 %v8388_v24, %v4172_v17 }
 0x27a   : > { %v5680_v30 = vpack.c.bf16 %v8502_v23, %v8500_v32 }
 0x27b   : > { %v5675_v10 = vpack.c.bf16 %v8507_v42, %v8505_v18  ;;  %v5816_v4 = vpop.f32.mrb[144].mxu1 }
 0x27c   : > { %5744 = vst [vmem:[%s8454_s24 + $0x48] sm:$0xff] %v5680_v30   ;;  %v4476_v57 = vadd.f32 %v8386_v41, %v5816_v4  ;;  %v4467_v0 = vpop.f32.mrb[145].mxu1 }
 0x27d   : > { %5743 = vst [vmem:[%s8454_s24 + $0x40] sm:$0xff] %v5675_v10   ;;  %v4468_v33 = vadd.f32 %v8367_v54, %v4467_v0  ;;  %v5817_v15 = vpop.f32.mrb[146].mxu1  ;;  %v4702_v10 = vpop.permute.xlu1 %4701 }
 0x27e   : > { %v4479_v58 = vadd.f32 %v8391_v59, %v5817_v15  ;;  %v4470_v51 = vpop.f32.mrb[147].mxu1  ;;  %v4211_v29 = vpop.f32.mrb[0].mxu0  ;;  %v8523_v43 = vmul.f32 %v4677_v25, %v4476_v57 }
 0x27f   : > { %v4471_v24 = vadd.f32 %v8375_v56, %v4470_v51  ;;  %v5862_v48 = vadd.f32 %v4211_v29, %v8076_v35  ;;  %v4213_v7 = vpop.f32.mrb[1].mxu0  ;;  %v8528_v17 = vmul.f32 %v8462_v8, %v4468_v33 }
 0x280   : > { %v8525_v41 = vmul.f32 %v4682_v5, %v4479_v58  ;;  %v4214_v54 = vpop.f32.mrb[2].mxu0  ;;  %v8538_v5 = vpop.permute.xlu0 %4706 }
 0x281   : > { %v8530_v22 = vmul.f32 %v4672_v36, %v4471_v24  ;;  %v4388_v59 = vadd.f32 %v5862_v48, %v8404_v38  ;;  %v5863_v31 = vadd.f32 %v4214_v54, %v8092_v61  ;;  %v4216_v56 = vpop.f32.mrb[3].mxu0 }
 0x282   : > { %v5690_v35 = vpack.c.bf16 %v8525_v41, %v8523_v43 }
 0x283   : > { %v5685_v25 = vpack.c.bf16 %v8530_v22, %v8528_v17  ;;  %v5820_v30 = vpop.f32.mrb[148].mxu1  ;;  %v4739_v8 = vmul.f32 %v8331_v6, %v4388_v59  ;;  %v4391_v16 = vadd.f32 %v5863_v31, %v8411_v20 }
 0x284   : > { %5746 = vst [vmem:[%s8454_s24 + $0x58] sm:$0xff] %v5690_v35   ;;  %v4492_v36 = vadd.f32 %v8416_v28, %v5820_v30  ;;  %v4483_v38 = vpop.f32.mrb[149].mxu1  ;;  %v4712_v35 = vpop.permute.xlu1 %4711 }
 0x285   : > { %5745 = vst [vmem:[%s8454_s24 + $0x50] sm:$0xff] %v5685_v25   ;;  %v4484_v61 = vadd.f32 %v8398_v62, %v4483_v38  ;;  %v5821_v4 = vpop.f32.mrb[150].mxu1  ;;  %v4740_v57 = vmul.f32 %v8343_v40, %v4391_v16  ;;  %v4991_v15 = vmul.f32 %v4739_v8, %v4739_v8 }
 0x286   : > { %v4495_v0 = vadd.f32 %v8423_v44, %v5821_v4  ;;  %v4486_v33 = vpop.f32.mrb[151].mxu1  ;;  %v4219_v58 = vpop.f32.mrb[4].mxu0  ;;  %v8550_v48 = vmul.f32 %v4697_v12, %v4492_v36 }
 0x287   : > { %v4487_v6 = vadd.f32 %v8407_v19, %v4486_v33  ;;  %v5635_v20 = vpack.c.bf16 %v4740_v57, %v4739_v8  ;;  %v4950_v51 = vadd.f32 %v4740_v57, %v4739_v8  ;;  %v4992_v29 = vmul.f32 %v4740_v57, %v4740_v57  ;;  %v4221_v24 = vpop.f32.mrb[5].mxu0  ;;  %v4717_v44 = vpop.permute.xlu0 %4716 }
 0x288   : > { %v5864_v28 = vadd.f32 %v4219_v58, %v8131_v3  ;;  %v8552_v62 = vmul.f32 %v4687_v46, %v4484_v61  ;;  %v4222_v7 = vpop.f32.mrb[6].mxu0  ;;  %v8554_v40 = vmul.f32 %v4702_v10, %v4495_v0  ;;  %v4722_v58 = vpop.permute.xlu1 %4721 }
 0x289   : > { %v8556_v54 = vmul.f32 %v4692_v63, %v4487_v6  ;;  %5636 = vst [vmem:[%s8454_s24] sm:$0xff] %v5635_v20   ;;  %v5026_v19 = vadd.f32 %v4992_v29, %v4991_v15  ;;  %v5865_v31 = vadd.f32 %v4222_v7, %v8140_v60  ;;  %v4224_v3 = vpop.f32.mrb[7].mxu0  ;;  %v8887_v7 = vld [vmem:[#allocation15_spill] sm:$0xff] }
 0x28a   : > { %v4396_v59 = vadd.f32 %v5864_v28, %v8400_v34  ;;  %v5700_v46 = vpack.c.bf16 %v8554_v40, %v8550_v48 }
 0x28b   : > { %v5695_v12 = vpack.c.bf16 %v8556_v54, %v8552_v62  ;;  %v5824_v56 = vpop.f32.mrb[152].mxu1  ;;  %v4399_v63 = vadd.f32 %v5865_v31, %v8409_v21  ;;  %v4727_v61 = vpop.permute.xlu0 %4726 }
 0x28c   : > { %v4741_v25 = vmul.f32 %v8345_v55, %v4396_v59  ;;  %v4508_v30 = vadd.f32 %v8460_v14, %v5824_v56  ;;  %v4499_v8 = vpop.f32.mrb[153].mxu1  ;;  %5748 = vst [vmem:[%s8454_s24 + $0x68] sm:$0xff] %v5700_v46   ;;  %v8888_v59 = vld [vmem:[#allocation17_spill] sm:$0xff] }
 0x28d   : > { %5747 = vst [vmem:[%s8454_s24 + $0x60] sm:$0xff] %v5695_v12   ;;  %v4500_v60 = vadd.f32 %v8434_v47, %v4499_v8  ;;  %v5825_v34 = vpop.f32.mrb[154].mxu1  ;;  %v4742_v38 = vmul.f32 %v8359_v39, %v4399_v63  ;;  %v8889_v12 = vld [vmem:[#allocation8_spill] sm:$0xff] }
 0x28e   : > { %v4951_v16 = vadd.f32 %v4950_v51, %v4741_v25  ;;  %v4993_v36 = vmul.f32 %v4741_v25, %v4741_v25  ;;  %v4502_v10 = vpop.f32.mrb[155].mxu1  ;;  %v4227_v4 = vpop.f32.mrb[8].mxu0  ;;  %v4511_v55 = vadd.f32 %v8467_v53, %v5825_v34  ;;  %v8575_v6 = vmul.f32 %v4717_v44, %v4508_v30  ;;  %v8890_v30 = vld [vmem:[#allocation10_spill] sm:$0xff] }
 0x28f   : > { %v4503_v21 = vadd.f32 %v8440_v9, %v4502_v10  ;;  %v5640_v14 = vpack.c.bf16 %v4742_v38, %v4741_v25  ;;  %v4994_v33 = vmul.f32 %v4742_v38, %v4742_v38  ;;  %v4229_v15 = vpop.f32.mrb[9].mxu0  ;;  %v5866_v47 = vadd.f32 %v4227_v4, %v8162_v49  ;;  %v8886_v9 = vld [vmem:[#allocation3_spill] sm:$0xff]  ;;  %v4737_v25 = vpop.permute.xlu0 %4736 }
 0x290   : > { %v5027_v57 = vadd.f32 %v5026_v19, %v4993_v36  ;;  %v4952_v0 = vadd.f32 %v4951_v16, %v4742_v38  ;;  %v4230_v20 = vpop.f32.mrb[10].mxu0  ;;  %v8577_v39 = vmul.f32 %v4722_v58, %v4511_v55  ;;  %v8581_v53 = vmul.f32 %v8538_v5, %v4500_v60  ;;  %v8891_v55 = vld [vmem:[#allocation4_spill] sm:$0xff]  ;;  %v4732_v15 = vpop.permute.xlu1 %4731 }
 0x291   : > { %5736 = vst [vmem:[%s8454_s24 + $0x8] sm:$0xff] %v5640_v14   ;;  %v5867_v29 = vadd.f32 %v4230_v20, %v8886_v9  ;;  %v4232_v28 = vpop.f32.mrb[11].mxu0  ;;  %v8584_v24 = vmul.f32 %v4712_v35, %v4503_v21  ;;  %v4404_v19 = vadd.f32 %v5866_v47, %v8887_v7  ;;  %v8892_v47 = vld [vmem:[#allocation14_spill] sm:$0xff] }
 0x292   : > { %v5028_v51 = vadd.f32 %v5027_v57, %v4994_v33  ;;  %v5710_v49 = vpack.c.bf16 %v8577_v39, %v8575_v6 }
 0x293   : > { %v5828_v44 = vpop.f32.mrb[156].mxu1  ;;  %v4407_v31 = vadd.f32 %v5867_v29, %v8888_v59  ;;  %v5705_v3 = vpack.c.bf16 %v8584_v24, %v8581_v53  ;;  %v4743_v56 = vmul.f32 %v8889_v12, %v4404_v19  ;;  %v8894_v19 = vld [vmem:[#allocation9_spill] sm:$0xff] }
 0x294   : > { %v4524_v5 = vadd.f32 %v5828_v44, %v8512_v13  ;;  %v4515_v46 = vpop.f32.mrb[157].mxu1  ;;  %5750 = vst [vmem:[%s8454_s24 + $0x78] sm:$0xff] %v5710_v49  }
 0x295   : > { %v4516_v35 = vadd.f32 %v8486_v37, %v4515_v46  ;;  %v5829_v63 = vpop.f32.mrb[158].mxu1  ;;  %v4744_v8 = vmul.f32 %v8890_v30, %v4407_v31  ;;  %5749 = vst [vmem:[%s8454_s24 + $0x70] sm:$0xff] %v5705_v3   ;;  %v4953_v16 = vadd.f32 %v4952_v0, %v4743_v56  ;;  %v4995_v36 = vmul.f32 %v4743_v56, %v4743_v56  ;;  %v8897_v30 = vld [vmem:[#allocation6_spill] sm:$0xff] }
 0x296   : > { %v8598_v60 = vmul.f32 %v4737_v25, %v4524_v5  ;;  %v4518_v34 = vpop.f32.mrb[159].mxu1  ;;  %v4235_v38 = vpop.f32.mrb[12].mxu0  ;;  %v8896_v5 = vld [vmem:[#allocation12_spill] sm:$0xff] }
 0x297   : > { %v4519_v13 = vadd.f32 %v8493_v11, %v4518_v34  ;;  %v5645_v10 = vpack.c.bf16 %v4744_v8, %v4743_v56  ;;  %v4996_v4 = vmul.f32 %v4744_v8, %v4744_v8  ;;  %v5868_v21 = vadd.f32 %v4235_v38, %v8891_v55  ;;  %v4237_v57 = vpop.f32.mrb[13].mxu0  ;;  %v8893_v11 = vld [vmem:[#allocation5_spill] sm:$0xff]  ;;  %v8899_v55 = vld [vmem:[#allocation11_spill] sm:$0xff] }
 0x298   : > { %v5551_v37 = vpack.c.bf16 %v8598_v60, %v8598_v60  ;;  %v5029_v14 = vadd.f32 %v5028_v51, %v4995_v36  ;;  %v4954_v33 = vadd.f32 %v4953_v16, %v4744_v8  ;;  %v4238_v58 = vpop.f32.mrb[14].mxu0  ;;  %v8607_v20 = vmul.f32 %v4727_v61, %v4516_v35  ;;  %v8895_v51 = vld [vmem:[#allocation16_spill] sm:$0xff]  ;;  %v8898_v36 = vld [vmem:[#allocation7_spill] sm:$0xff] }
 0x299   : > { %5737 = vst [vmem:[%s8454_s24 + $0x10] sm:$0xff] %v5645_v10   ;;  %v4412_v0 = vadd.f32 %v5868_v21, %v8892_v47  ;;  %v5869_v9 = vadd.f32 %v4238_v58, %v8893_v11  ;;  %v4240_v29 = vpop.f32.mrb[15].mxu0  ;;  %v8610_v28 = vmul.f32 %v4732_v15, %v4519_v13  ;;  %v5001_v11 = vmul.f32 %v8447_v27, %v8447_v27 }
 0x29a   : > { %4949 = vst [vmem:[%s8454_s24 + $0x88] sm:$0xf] %v5551_v37  ;;  %v5030_v7 = vadd.f32 %v5029_v14, %v4996_v4  ;;  %v8900_v37 = vld [vmem:[#allocation13_spill] sm:$0xff] }
 0x29b   : > { %v4745_v49 = vmul.f32 %v8894_v19, %v4412_v0  ;;  %v4415_v44 = vadd.f32 %v5869_v9, %v8895_v51  ;;  %v5715_v59 = vpack.c.bf16 %v8610_v28, %v8607_v20 }
 0x29d   : > { %v4955_v31 = vadd.f32 %v4954_v33, %v4745_v49  ;;  %v4997_v3 = vmul.f32 %v4745_v49, %v4745_v49  ;;  %v4746_v46 = vmul.f32 %v8896_v5, %v4415_v44  ;;  %5751 = vst [vmem:[%s8454_s24 + $0x80] sm:$0xff] %v5715_v59   ;;  %v5004_v59 = vmul.f32 %v8480_v52, %v8480_v52 }
 0x29e   : > { %v4243_v61 = vpop.f32.mrb[16].mxu0 }
 0x29f   : > { %v5031_v12 = vadd.f32 %v5030_v7, %v4997_v3  ;;  %v5650_v56 = vpack.c.bf16 %v4746_v46, %v4745_v49  ;;  %v4956_v25 = vadd.f32 %v4955_v31, %v4746_v46  ;;  %v4998_v35 = vmul.f32 %v4746_v46, %v4746_v46  ;;  %v4245_v63 = vpop.f32.mrb[17].mxu0 }
 0x2a0   : > { %v5870_v8 = vadd.f32 %v4243_v61, %v8897_v30  ;;  %v4246_v34 = vpop.f32.mrb[18].mxu0  ;;  %v5003_v49 = vmul.f32 %v8478_v45, %v8478_v45  ;;  %v5006_v61 = vmul.f32 %v8475_v26, %v8475_v26 }
 0x2a1   : > { %5738 = vst [vmem:[%s8454_s24 + $0x18] sm:$0xff] %v5650_v56   ;;  %v5032_v16 = vadd.f32 %v5031_v12, %v4998_v35  ;;  %v5871_v38 = vadd.f32 %v4246_v34, %v8898_v36  ;;  %v4248_v13 = vpop.f32.mrb[19].mxu0 }
 0x2a2   : > { %v4420_v10 = vadd.f32 %v5870_v8, %v8437_v50  ;;  %v8901_v50 = vld [vmem:[#allocation18_spill] sm:$0xff] }
 0x2a3   : > { %v4423_v4 = vadd.f32 %v5871_v38, %v8444_v2  ;;  %v5002_v2 = vmul.f32 %v8901_v50, %v8901_v50 }
 0x2a4   : > { %v4747_v21 = vmul.f32 %v8899_v55, %v4420_v10 }
 0x2a5   : > { %v4748_v57 = vmul.f32 %v8900_v37, %v4423_v4 }
 0x2a6   : > { %v4957_v14 = vadd.f32 %v4956_v25, %v4747_v21  ;;  %v4999_v33 = vmul.f32 %v4747_v21, %v4747_v21 }
 0x2a7   : > { %v5655_v15 = vpack.c.bf16 %v4748_v57, %v4747_v21  ;;  %v5000_v58 = vmul.f32 %v4748_v57, %v4748_v57 }
 0x2a8   : > { %v5033_v47 = vadd.f32 %v5032_v16, %v4999_v33  ;;  %v4958_v0 = vadd.f32 %v4957_v14, %v4748_v57 }
 0x2a9   : > { %5739 = vst [vmem:[%s8454_s24 + $0x20] sm:$0xff] %v5655_v15  }
 0x2aa   : > { %v4959_v9 = vadd.f32 %v4958_v0, %v8447_v27  ;;  %v5034_v29 = vadd.f32 %v5033_v47, %v5000_v58  ;;  %v5005_v27 = vmul.f32 %v8473_v1, %v8473_v1 }
 0x2ac   : > { %v4960_v7 = vadd.f32 %v4959_v9, %v8901_v50  ;;  %v5035_v19 = vadd.f32 %v5034_v29, %v5001_v11 }
 0x2ae   : > { %v4961_v51 = vadd.f32 %v4960_v7, %v8478_v45  ;;  %v5036_v44 = vadd.f32 %v5035_v19, %v5002_v2  ;;  %v5007_v45 = vmul.f32 %v8505_v18, %v8505_v18 }
 0x2b0   : > { %v4962_v31 = vadd.f32 %v4961_v51, %v8480_v52  ;;  %v5037_v3 = vadd.f32 %v5036_v44, %v5003_v49  ;;  %v5008_v52 = vmul.f32 %v8507_v42, %v8507_v42 }
 0x2b2   : > { %v4963_v5 = vadd.f32 %v4962_v31, %v8473_v1  ;;  %v5038_v46 = vadd.f32 %v5037_v3, %v5004_v59  ;;  %v5009_v1 = vmul.f32 %v8500_v32, %v8500_v32  ;;  %v5024_v31 = vmul.f32 %v8610_v28, %v8610_v28 }
 0x2b4   : > { %v4964_v12 = vadd.f32 %v4963_v5, %v8475_v26  ;;  %v5039_v56 = vadd.f32 %v5038_v46, %v5005_v27  ;;  %v5010_v26 = vmul.f32 %v8502_v23, %v8502_v23  ;;  %v5025_v27 = vmul.f32 %v8598_v60, %v8598_v60 }
 0x2b6   : > { %v4965_v25 = vadd.f32 %v4964_v12, %v8505_v18  ;;  %v5040_v35 = vadd.f32 %v5039_v56, %v5006_v61  ;;  %v5011_v18 = vmul.f32 %v8528_v17, %v8528_v17 }
 0x2b8   : > { %v4966_v63 = vadd.f32 %v4965_v25, %v8507_v42  ;;  %v5041_v30 = vadd.f32 %v5040_v35, %v5007_v45  ;;  %v5012_v42 = vmul.f32 %v8530_v22, %v8530_v22 }
 0x2ba   : > { %v4967_v8 = vadd.f32 %v4966_v63, %v8500_v32  ;;  %v5042_v34 = vadd.f32 %v5041_v30, %v5008_v52  ;;  %v5013_v32 = vmul.f32 %v8523_v43, %v8523_v43 }
 0x2bc   : > { %v4968_v16 = vadd.f32 %v4967_v8, %v8502_v23  ;;  %v5043_v36 = vadd.f32 %v5042_v34, %v5009_v1  ;;  %v5014_v23 = vmul.f32 %v8525_v41, %v8525_v41 }
 0x2be   : > { %v4969_v38 = vadd.f32 %v4968_v16, %v8528_v17  ;;  %v5044_v13 = vadd.f32 %v5043_v36, %v5010_v26  ;;  %v5015_v17 = vmul.f32 %v8552_v62, %v8552_v62 }
 0x2c0   : > { %v4970_v10 = vadd.f32 %v4969_v38, %v8530_v22  ;;  %v5045_v4 = vadd.f32 %v5044_v13, %v5011_v18  ;;  %v5016_v22 = vmul.f32 %v8556_v54, %v8556_v54 }
 0x2c2   : > { %v4971_v55 = vadd.f32 %v4970_v10, %v8523_v43  ;;  %v5046_v21 = vadd.f32 %v5045_v4, %v5012_v42  ;;  %v5017_v43 = vmul.f32 %v8550_v48, %v8550_v48 }
 0x2c4   : > { %v4972_v37 = vadd.f32 %v4971_v55, %v8525_v41  ;;  %v5047_v57 = vadd.f32 %v5046_v21, %v5013_v32  ;;  %v5018_v41 = vmul.f32 %v8554_v40, %v8554_v40 }
 0x2c6   : > { %v4973_v14 = vadd.f32 %v4972_v37, %v8552_v62  ;;  %v5048_v33 = vadd.f32 %v5047_v57, %v5014_v23  ;;  %v5019_v62 = vmul.f32 %v8581_v53, %v8581_v53 }
 0x2c8   : > { %v4974_v15 = vadd.f32 %v4973_v14, %v8556_v54  ;;  %v5049_v58 = vadd.f32 %v5048_v33, %v5015_v17  ;;  %v5020_v54 = vmul.f32 %v8584_v24, %v8584_v24 }
 0x2ca   : > { %v4975_v47 = vadd.f32 %v4974_v15, %v8550_v48  ;;  %v5050_v0 = vadd.f32 %v5049_v58, %v5016_v22  ;;  %v5021_v48 = vmul.f32 %v8575_v6, %v8575_v6 }
 0x2cc   : > { %v4976_v11 = vadd.f32 %v4975_v47, %v8554_v40  ;;  %v5051_v9 = vadd.f32 %v5050_v0, %v5017_v43  ;;  %v5022_v40 = vmul.f32 %v8577_v39, %v8577_v39 }
 0x2ce   : > { %v4977_v29 = vadd.f32 %v4976_v11, %v8581_v53  ;;  %v5052_v50 = vadd.f32 %v5051_v9, %v5018_v41  ;;  %v5023_v53 = vmul.f32 %v8607_v20, %v8607_v20 }
 0x2d0   : > { %v4978_v2 = vadd.f32 %v4977_v29, %v8584_v24  ;;  %v5053_v7 = vadd.f32 %v5052_v50, %v5019_v62 }
 0x2d2   : > { %v4979_v19 = vadd.f32 %v4978_v2, %v8575_v6  ;;  %v5054_v49 = vadd.f32 %v5053_v7, %v5020_v54 }
 0x2d4   : > { %v4980_v51 = vadd.f32 %v4979_v19, %v8577_v39  ;;  %v5055_v44 = vadd.f32 %v5054_v49, %v5021_v48 }
 0x2d6   : > { %v4981_v59 = vadd.f32 %v4980_v51, %v8607_v20  ;;  %v5056_v24 = vadd.f32 %v5055_v44, %v5022_v40 }
 0x2d8   : > { %v4982_v3 = vadd.f32 %v4981_v59, %v8610_v28  ;;  %v5057_v6 = vadd.f32 %v5056_v24, %v5023_v53 }
 0x2da   : > { %v4983_v5 = vadd.f32 %v4982_v3, %v8598_v60  ;;  %v5058_v39 = vadd.f32 %v5057_v6, %v5024_v31 }
 0x2dc   : > { %v4984_v46 = vrot.slane %v4983_v5, 4  ;;  %v5059_v61 = vadd.f32 %v5058_v39, %v5025_v27 }
 0x2de   : > { %v4985_v12 = vadd.f32 %v4984_v46, %v4983_v5  ;;  %v5060_v56 = vrot.slane %v5059_v61, 4 }
 0x2e0   : > { %v4986_v45 = vrot.slane %v4985_v12, 2  ;;  %v5061_v25 = vadd.f32 %v5060_v56, %v5059_v61 }
 0x2e2   : > { %v4987_v20 = vadd.f32 %v4986_v45, %v4985_v12  ;;  %v5062_v35 = vrot.slane %v5061_v25, 2 }
 0x2e4   : > { %v4988_v52 = vrot.slane %v4987_v20, 1  ;;  %v5063_v63 = vadd.f32 %v5062_v35, %v5061_v25 }
 0x2e6   : > { %v4989_v28 = vadd.f32 %v4988_v52, %v4987_v20  ;;  %v5064_v30 = vrot.slane %v5063_v63, 1 }
 0x2e8   : > { %4990 = vst [vmem:[%s262_s28] sm:$0x1] %v4989_v28  ;;  %v5065_v60 = vadd.f32 %v5064_v30, %v5063_v63 }
 0x2ea   : > { %5066 = vst [vmem:[%s262_s28 + $0x1] sm:$0x1] %v5065_v60 }
 0x2eb PF: > { %s17_s21 = sadd.s32 1, %s6332_s21  }
 0x2ec   : > { %p14_p4 = scmp.ge.s32.totalorder %s17_s21, 4  }
 0x2ee   :  { %16 = sbr.rel (!%p14_p4) target bundleno = 1 (0x1), region = 82 }

</bundles_post_ra>
